<compile_context>
chip_gen: v5e
topology: v5e:2x2
jax: 0.10.0
libtpu: 0.0.40
codegen_flags: <defaults>
</compile_context>

<pallas_src>
import functools
import inspect

import jax
import jax.numpy as jnp
from jax import lax
from jax.experimental import pallas as pl
from jax.experimental.pallas import tpu as pltpu


try:
    _SUPPORTS_PIPELINE_MODE = (
        hasattr(pl, "Buffered")
        and "pipeline_mode" in inspect.signature(pl.BlockSpec).parameters
    )
except (TypeError, ValueError):   # pragma: no cover
    _SUPPORTS_PIPELINE_MODE = False


def _cross_attn_kernel(m1_ref, m2_ref,
                       wqkv_ref, bqkv_ref, wo1_ref, wo2_ref, vecs_ref,
                       out1_ref, out2_ref,
                       *, T, L, H, D, eps, mxu_dtype, approx_recip):
    E = H * D
    TL = T * L
    inv_scale = 1.0 / (D ** 0.5)

    x1 = m1_ref[...]                      # (TL, E) input dtype
    x2 = m2_ref[...]
    wqkv = wqkv_ref[...]                  # (E, 3E) mxu dtype
    bqkv = bqkv_ref[...]                  # (1, 3E) f32

    # Two independent fused-QKV projections (no in-kernel concat/slice copies).
    qkv1 = jnp.dot(x1.astype(mxu_dtype), wqkv,
                   preferred_element_type=jnp.float32) + bqkv     # (TL, 3E) f32
    qkv2 = jnp.dot(x2.astype(mxu_dtype), wqkv,
                   preferred_element_type=jnp.float32) + bqkv

    def attend_project(qkv_q, qkv_kv, wo_ref):
        """softmax(Q K^T / sqrt(D)) V, projected by Wo, accumulated per head.

        Returns y = concat_h(attn_h) @ Wo in f32, shape (TL, E); the per-head
        accumulation avoids any (TL, E) VMEM scratch round-trip.
        """
        y = jnp.zeros((TL, E), jnp.float32)
        for h in range(H):                                   # static unroll
            lo = h * D
            q = (qkv_q[:, lo:lo + D] * inv_scale).astype(mxu_dtype).reshape(T, L, D)
            k = qkv_kv[:, E + lo:E + lo + D].astype(mxu_dtype).reshape(T, L, D)
            v = qkv_kv[:, 2 * E + lo:2 * E + lo + D].astype(mxu_dtype).reshape(T, L, D)
            s = jnp.einsum('tld,tmd->tlm', q, k,
                           preferred_element_type=jnp.float32)     # (T, L, L)
            s = s - jnp.max(s, axis=-1, keepdims=True)
            p = jnp.exp(s)
            denom = jnp.sum(p, axis=-1, keepdims=True)
            if approx_recip:
                p = p * pl.reciprocal(denom, approx=True)
            else:
                p = p / denom
            o = jnp.einsum('tlm,tmd->tld', p.astype(mxu_dtype), v,
                           preferred_element_type=jnp.float32)     # (T, L, D)
            wo_h = wo_ref[lo:lo + D, :]                            # (D, E) static
            y = y + jnp.dot(o.reshape(TL, D).astype(mxu_dtype), wo_h,
                            preferred_element_type=jnp.float32)
        return y

    bo1 = vecs_ref[0:1, :]
    bo2 = vecs_ref[1:2, :]
    gamma = vecs_ref[2:3, :]
    beta = vecs_ref[3:4, :]

    y12 = attend_project(qkv1, qkv2, wo1_ref) + bo1   # out1(attn(Q1, K2, V2))
    y21 = attend_project(qkv2, qkv1, wo2_ref) + bo2   # out2(attn(Q2, K1, V1))

    def layer_norm(x):
        mu = jnp.mean(x, axis=-1, keepdims=True)
        xm = x - mu
        var = jnp.mean(xm * xm, axis=-1, keepdims=True)
        return xm * lax.rsqrt(var + eps) * gamma + beta

    x1f = x1.astype(jnp.float32)
    x2f = x2.astype(jnp.float32)
    # mat1_to_mat2_attention = norm(mat2 + out1(attn(Q1, K2, V2)))
    out2_ref[...] = layer_norm(x2f + y12).astype(out2_ref.dtype)
    # mat2_to_mat1_attention = norm(mat1 + out2(attn(Q2, K1, V1)))
    out1_ref[...] = layer_norm(x1f + y21).astype(out1_ref.dtype)


def _vmem_capacity_bytes():
    try:
        cap = getattr(pltpu.get_tpu_info(), "vmem_capacity_bytes", None)
        if cap:
            return int(cap)
    except Exception:   # pragma: no cover - no TPU / old API
        pass
    return 128 * 2 ** 20


def _vmem_bytes_estimate(T, L, E, H, in_isz, out_isz, w_isz, const_bufs):
    TL = T * L
    f32 = 4
    slabs_in = 2 * 2 * TL * E * in_isz        # m1/m2 tiles, double-buffered
    slabs_out = 2 * 2 * TL * E * out_isz      # out tiles, double-buffered
    qkv = 2 * TL * 3 * E * f32                # f32 QKV projections, both dirs
    yacc = 2 * TL * E * f32                   # per-direction output accumulators
    attn = 6 * T * L * L * f32                # live score / prob tiles (slack)
    weights = const_bufs * (5 * E * E * w_isz + 7 * E * f32)
    return slabs_in + slabs_out + qkv + yacc + attn + weights


def _choose_batch_tile(BN, L, E, H, in_isz, out_isz, w_isz, const_bufs,
                       budget_bytes, prefer_even_steps):
    """Largest divisor T of BN whose working set fits the VMEM budget."""
    # Packed-sublane tile for the HBM<->VMEM slabs (8 rows f32, 16 bf16, ...).
    sublane = 8 * (4 // max(1, min(in_isz, out_isz)))
    feasible = []
    for T in range(1, BN + 1):
        if BN % T:
            continue
        if (T * L) % sublane != 0 and T != BN:
            continue
        if _vmem_bytes_estimate(T, L, E, H, in_isz, out_isz, w_isz,
                                const_bufs) > budget_bytes:
            continue
        feasible.append(T)
    if not feasible:
        for T in range(1, BN + 1):
            if BN % T == 0 and (T * L) % sublane == 0:
                return T
        return BN
    if prefer_even_steps:
        # Megacore (v7x): give both TensorCores equal work once the tile
        # already feeds the MXU a reasonably large M dimension.
        for T in sorted(feasible, reverse=True):
            steps = BN // T
            if steps >= 2 and steps % 2 == 0 and T * L >= 512:
                return T
    return max(feasible)


def msa_bidirectional_cross_attention(mat1, mat2, params, *, num_heads,
                                      mxu_dtype=jnp.bfloat16, out_dtype=None):
    """Returns (mat2_to_mat1_attention, mat1_to_mat2_attention), matching PyTorch."""
    B, N, L, E = mat1.shape
    D = E // num_heads
    assert D * num_heads == E, "embed_dim must be divisible by num_heads"
    BN = B * N
    rows = BN * L

    mxu_dtype = jnp.dtype(mxu_dtype)
    in_dtype = jnp.dtype(mat1.dtype)
    out_dtype = jnp.dtype(out_dtype) if out_dtype is not None else in_dtype

    m1 = mat1.reshape(rows, E)
    m2 = mat2.reshape(rows, E)

    # Pack parameters: fused QKV weight/bias + one (4, E) slab for
    # bo1 / bo2 / gamma / beta.  MXU weights in mxu_dtype, elementwise params f32.
    wqkv = jnp.concatenate([params["wq"], params["wk"], params["wv"]],
                           axis=1).astype(mxu_dtype)
    bqkv = jnp.concatenate([params["bq"], params["bk"], params["bv"]],
                           axis=1).astype(jnp.float32)
    wo1 = params["wo1"].astype(mxu_dtype)
    wo2 = params["wo2"].astype(mxu_dtype)
    vecs = jnp.concatenate([params["bo1"], params["bo2"],
                            params["gamma"], params["beta"]],
                           axis=0).astype(jnp.float32)

    cap = _vmem_capacity_bytes()                       # 64 MiB v7x, 128 MiB v5e/v6e
    budget = max(16 * 2 ** 20, cap // 3)
    const_bufs = 1 if _SUPPORTS_PIPELINE_MODE else 2
    prefer_even_steps = cap <= 64 * 2 ** 20            # megacore-style part
    T = _choose_batch_tile(BN, L, E, num_heads,
                           in_dtype.itemsize, out_dtype.itemsize,
                           mxu_dtype.itemsize, const_bufs,
                           budget, prefer_even_steps)
    TL = T * L
    grid = (BN // T,)

    est = _vmem_bytes_estimate(T, L, E, num_heads, in_dtype.itemsize,
                               out_dtype.itemsize, mxu_dtype.itemsize, const_bufs)
    vmem_limit = int(min(cap * 3 // 4, max(32 * 2 ** 20, 2 * est)))

    slab_spec = pl.BlockSpec((TL, E), lambda i: (i, 0))

    def const_spec(shape):
        kwargs = ({"pipeline_mode": pl.Buffered(1)}
                  if _SUPPORTS_PIPELINE_MODE else {})
        return pl.BlockSpec(shape, lambda i, _s=shape: (0,) * len(_s), **kwargs)

    kernel = functools.partial(
        _cross_attn_kernel,
        T=T, L=L, H=num_heads, D=D, eps=1e-5,
        mxu_dtype=mxu_dtype,
        approx_recip=(mxu_dtype != jnp.dtype(jnp.float32)))

    out1, out2 = pl.pallas_call(
        kernel,
        out_shape=(jax.ShapeDtypeStruct((rows, E), out_dtype),
                   jax.ShapeDtypeStruct((rows, E), out_dtype)),
        grid_spec=pltpu.PrefetchScalarGridSpec(
            num_scalar_prefetch=0,
            grid=grid,
            in_specs=[slab_spec, slab_spec,
                      const_spec((E, 3 * E)),    # fused Wq|Wk|Wv
                      const_spec((1, 3 * E)),    # fused bq|bk|bv
                      const_spec((E, E)),        # out1 weight
                      const_spec((E, E)),        # out2 weight
                      const_spec((4, E))],       # bo1/bo2/gamma/beta
            out_specs=[slab_spec, slab_spec],
        ),
        compiler_params=pltpu.CompilerParams(
            dimension_semantics=("parallel",),
            vmem_limit_bytes=vmem_limit),
    )(m1, m2, wqkv, bqkv, wo1, wo2, vecs)

    return out1.reshape(B, N, L, E), out2.reshape(B, N, L, E)


def _reference(mat1, mat2, params, *, num_heads):
    """Pure-JAX reference mirroring the PyTorch forward."""
    B, N, L, E = mat1.shape
    D = E // num_heads
    scale = D ** 0.5

    def lin(x, w, b):
        return jnp.einsum("bnle,ef->bnlf", x, w) + b.reshape(E)

    def split(x):  # b n l (h d) -> b n h l d
        return x.reshape(B, N, L, num_heads, D).transpose(0, 1, 3, 2, 4)

    def merge(x):  # b n h l d -> b n l (h d)
        return x.transpose(0, 1, 3, 2, 4).reshape(B, N, L, E)

    def ln(x):
        mu = x.mean(-1, keepdims=True)
        var = ((x - mu) ** 2).mean(-1, keepdims=True)
        return ((x - mu) / jnp.sqrt(var + 1e-5) * params["gamma"].reshape(E)
                + params["beta"].reshape(E))

    def attend(q_src, kv_src, wo, bo, resid):
        Q = split(lin(q_src, params["wq"], params["bq"]))
        K = split(lin(kv_src, params["wk"], params["bk"]))
        V = split(lin(kv_src, params["wv"], params["bv"]))
        s = jnp.einsum("bnhld,bnhmd->bnhlm", Q, K) / scale
        p = jax.nn.softmax(s, axis=-1)
        o = merge(jnp.einsum("bnhlm,bnhmd->bnhld", p, V))
        o = jnp.einsum("bnle,ef->bnlf", o, wo) + bo.reshape(E)
        return ln(resid + o)

    m1_to_m2 = attend(mat1, mat2, params["wo1"], params["bo1"], mat2)
    m2_to_m1 = attend(mat2, mat1, params["wo2"], params["bo2"], mat1)
    return m2_to_m1, m1_to_m2


def init_params(key, embed_dim):
    keys = jax.random.split(key, 10)
    s = 1.0 / (embed_dim ** 0.5)

    def w(k):
        return jax.random.uniform(k, (embed_dim, embed_dim), jnp.float32, -s, s)

    def b(k):
        return jax.random.uniform(k, (1, embed_dim), jnp.float32, -s, s)

    return {
        "wq": w(keys[0]), "bq": b(keys[1]),
        "wk": w(keys[2]), "bk": b(keys[3]),
        "wv": w(keys[4]), "bv": b(keys[5]),
        "wo1": w(keys[6]), "bo1": b(keys[7]),
        "wo2": w(keys[8]), "bo2": b(keys[9]),
        # nn.LayerNorm defaults
        "gamma": jnp.ones((1, embed_dim), jnp.float32),
        "beta": jnp.zeros((1, embed_dim), jnp.float32),
    }


if __name__ == "__main__":
    B, N, L, E, H = 2, 2, 8, 32, 4

    key = jax.random.PRNGKey(0)
    k1, k2, k3 = jax.random.split(key, 3)
    mat1 = jax.random.normal(k1, (B, N, L, E), jnp.float32)
    mat2 = jax.random.normal(k2, (B, N, L, E), jnp.float32)
    params = init_params(k3, E)

    ref_a, ref_b = _reference(mat1, mat2, params, num_heads=H)

    # Exact-semantics path: f32 MXU operands + exact softmax division.
    out_a, out_b = msa_bidirectional_cross_attention(
        mat1, mat2, params, num_heads=H, mxu_dtype=jnp.float32)
    jax.block_until_ready((out_a, out_b))
    assert jnp.allclose(out_a, ref_a, atol=1e-2, rtol=1e-2), "f32 mat2_to_mat1 mismatch"
    assert jnp.allclose(out_b, ref_b, atol=1e-2, rtol=1e-2), "f32 mat1_to_mat2 mismatch"

    # Default fast path: bf16 MXU operands with f32 accumulation.
    fast_a, fast_b = msa_bidirectional_cross_attention(mat1, mat2, params,
                                                       num_heads=H)
    jax.block_until_ready((fast_a, fast_b))
    assert jnp.allclose(fast_a, ref_a, atol=3e-2, rtol=3e-2), "bf16 mat2_to_mat1 mismatch"
    assert jnp.allclose(fast_b, ref_b, atol=3e-2, rtol=3e-2), "bf16 mat1_to_mat2 mismatch"

    print("KERNEL_OK")
</pallas_src>

<mosaic_0001>
module attributes {stable_mosaic.version = 11 : i64} {
  func.func @_cross_attn_kernel(%arg0: i32, %arg1: memref<32x32xf32, #tpu.memory_space<vmem>>, %arg2: memref<32x32xf32, #tpu.memory_space<vmem>>, %arg3: memref<32x96xf32, #tpu.memory_space<vmem>>, %arg4: memref<1x96xf32, #tpu.memory_space<vmem>>, %arg5: memref<32x32xf32, #tpu.memory_space<vmem>>, %arg6: memref<32x32xf32, #tpu.memory_space<vmem>>, %arg7: memref<4x32xf32, #tpu.memory_space<vmem>>, %arg8: memref<32x32xf32, #tpu.memory_space<vmem>>, %arg9: memref<32x32xf32, #tpu.memory_space<vmem>>) attributes {dimension_semantics = [#tpu.dimension_semantics<parallel>], iteration_bounds = array<i64: 1>, scalar_prefetch = 0 : i64, scratch_operands = 0 : i64, tpu.core_type = #tpu.core_type<tc>, window_params = [{transform_indices = @transform_0, window_bounds = array<i64: 32, 32>}, {transform_indices = @transform_1, window_bounds = array<i64: 32, 32>}, {pipeline_mode = #tpu.pipeline_mode<synchronous>, transform_indices = @transform_2, window_bounds = array<i64: 32, 96>}, {pipeline_mode = #tpu.pipeline_mode<synchronous>, transform_indices = @transform_3, window_bounds = array<i64: 1, 96>}, {pipeline_mode = #tpu.pipeline_mode<synchronous>, transform_indices = @transform_4, window_bounds = array<i64: 32, 32>}, {pipeline_mode = #tpu.pipeline_mode<synchronous>, transform_indices = @transform_5, window_bounds = array<i64: 32, 32>}, {pipeline_mode = #tpu.pipeline_mode<synchronous>, transform_indices = @transform_6, window_bounds = array<i64: 4, 32>}, {transform_indices = @transform_7, window_bounds = array<i64: 32, 32>}, {transform_indices = @transform_8, window_bounds = array<i64: 32, 32>}]} {
    %c0 = arith.constant 0 : index
    %c0_0 = arith.constant 0 : index
    %0 = vector.load %arg1[%c0, %c0_0] : memref<32x32xf32, #tpu.memory_space<vmem>>, vector<32x32xf32>
    %c0_1 = arith.constant 0 : index
    %c0_2 = arith.constant 0 : index
    %1 = vector.load %arg2[%c0_1, %c0_2] : memref<32x32xf32, #tpu.memory_space<vmem>>, vector<32x32xf32>
    %c0_3 = arith.constant 0 : index
    %c0_4 = arith.constant 0 : index
    %2 = vector.load %arg3[%c0_3, %c0_4] : memref<32x96xf32, #tpu.memory_space<vmem>>, vector<32x96xf32>
    %c0_5 = arith.constant 0 : index
    %c0_6 = arith.constant 0 : index
    %3 = vector.load %arg4[%c0_5, %c0_6] : memref<1x96xf32, #tpu.memory_space<vmem>>, vector<1x96xf32>
    %cst = arith.constant dense<0.000000e+00> : vector<32x96xf32>
    %4 = tpu.matmul %0, %2, %cst {dimension_numbers = #tpu.dot_dimension_numbers<[1], [0], [0], [1], [0, 0, 1, 1], [], []>} : vector<32x32xf32>, vector<32x96xf32>, vector<32x96xf32> -> vector<32x96xf32>
    %5 = vector.broadcast %3 : vector<1x96xf32> to vector<32x96xf32>
    %6 = arith.addf %4, %5 : vector<32x96xf32>
    %cst_7 = arith.constant dense<0.000000e+00> : vector<32x96xf32>
    %7 = tpu.matmul %1, %2, %cst_7 {dimension_numbers = #tpu.dot_dimension_numbers<[1], [0], [0], [1], [0, 0, 1, 1], [], []>} : vector<32x32xf32>, vector<32x96xf32>, vector<32x96xf32> -> vector<32x96xf32>
    %8 = vector.broadcast %3 : vector<1x96xf32> to vector<32x96xf32>
    %9 = arith.addf %7, %8 : vector<32x96xf32>
    %c0_8 = arith.constant 0 : index
    %c0_9 = arith.constant 0 : index
    %10 = vector.load %arg7[%c0_8, %c0_9] : memref<4x32xf32, #tpu.memory_space<vmem>>, vector<1x32xf32>
    %c1 = arith.constant 1 : index
    %c0_10 = arith.constant 0 : index
    %11 = vector.load %arg7[%c1, %c0_10] : memref<4x32xf32, #tpu.memory_space<vmem>>, vector<1x32xf32>
    %c2 = arith.constant 2 : index
    %c0_11 = arith.constant 0 : index
    %12 = vector.load %arg7[%c2, %c0_11] : memref<4x32xf32, #tpu.memory_space<vmem>>, vector<1x32xf32>
    %c3 = arith.constant 3 : index
    %c0_12 = arith.constant 0 : index
    %13 = vector.load %arg7[%c3, %c0_12] : memref<4x32xf32, #tpu.memory_space<vmem>>, vector<1x32xf32>
    %cst_13 = arith.constant 0.000000e+00 : f32
    %14 = vector.broadcast %cst_13 : f32 to vector<32x32xf32>
    %15 = vector.extract_strided_slice %6 {offsets = [0, 0], sizes = [32, 8], strides = [1, 1]} : vector<32x96xf32> to vector<32x8xf32>
    %cst_14 = arith.constant 0.353553385 : f32
    %16 = vector.broadcast %cst_14 : f32 to vector<32x8xf32>
    %17 = arith.mulf %15, %16 : vector<32x8xf32>
    %18 = vector.shape_cast %17 : vector<32x8xf32> to vector<4x8x8xf32>
    %19 = vector.extract_strided_slice %9 {offsets = [0, 32], sizes = [32, 8], strides = [1, 1]} : vector<32x96xf32> to vector<32x8xf32>
    %20 = vector.shape_cast %19 : vector<32x8xf32> to vector<4x8x8xf32>
    %21 = vector.extract_strided_slice %9 {offsets = [0, 64], sizes = [32, 8], strides = [1, 1]} : vector<32x96xf32> to vector<32x8xf32>
    %22 = vector.shape_cast %21 : vector<32x8xf32> to vector<4x8x8xf32>
    "tpu.trace_start"() <{level = 10 : i32, message = "tld,tmd->tlm"}> : () -> ()
    %cst_15 = arith.constant dense<0.000000e+00> : vector<4x8x8xf32>
    %23 = tpu.matmul %18, %20, %cst_15 {dimension_numbers = #tpu.dot_dimension_numbers<[2], [2], [1], [1], [0, 0, 0, 1, 1, 1], [0], [0]>} : vector<4x8x8xf32>, vector<4x8x8xf32>, vector<4x8x8xf32> -> vector<4x8x8xf32>
    "tpu.trace_stop"() : () -> ()
    %cst_16 = arith.constant dense<0xFF800000> : vector<4x8xf32>
    %24 = vector.multi_reduction <maximumf>, %23, %cst_16 [2] : vector<4x8x8xf32> to vector<4x8xf32>
    %25 = vector.shape_cast %24 : vector<4x8xf32> to vector<4x8x1xf32>
    %26 = vector.broadcast %25 : vector<4x8x1xf32> to vector<4x8x8xf32>
    %27 = arith.subf %23, %26 : vector<4x8x8xf32>
    %28 = math.exp %27 : vector<4x8x8xf32>
    %cst_17 = arith.constant dense<0.000000e+00> : vector<4x8xf32>
    %29 = vector.multi_reduction <add>, %28, %cst_17 [2] : vector<4x8x8xf32> to vector<4x8xf32>
    %30 = vector.shape_cast %29 : vector<4x8xf32> to vector<4x8x1xf32>
    %31 = vector.broadcast %30 : vector<4x8x1xf32> to vector<4x8x8xf32>
    %32 = arith.divf %28, %31 : vector<4x8x8xf32>
    "tpu.trace_start"() <{level = 10 : i32, message = "tlm,tmd->tld"}> : () -> ()
    %cst_18 = arith.constant dense<0.000000e+00> : vector<4x8x8xf32>
    %33 = tpu.matmul %32, %22, %cst_18 {dimension_numbers = #tpu.dot_dimension_numbers<[2], [1], [1], [2], [0, 0, 0, 1, 1, 2], [0], [0]>} : vector<4x8x8xf32>, vector<4x8x8xf32>, vector<4x8x8xf32> -> vector<4x8x8xf32>
    "tpu.trace_stop"() : () -> ()
    %c0_19 = arith.constant 0 : index
    %c0_20 = arith.constant 0 : index
    %34 = vector.load %arg5[%c0_19, %c0_20] : memref<32x32xf32, #tpu.memory_space<vmem>>, vector<8x32xf32>
    %35 = vector.shape_cast %33 : vector<4x8x8xf32> to vector<32x8xf32>
    %cst_21 = arith.constant dense<0.000000e+00> : vector<32x32xf32>
    %36 = tpu.matmul %35, %34, %cst_21 {dimension_numbers = #tpu.dot_dimension_numbers<[1], [0], [0], [1], [0, 0, 1, 1], [], []>} : vector<32x8xf32>, vector<8x32xf32>, vector<32x32xf32> -> vector<32x32xf32>
    %37 = arith.addf %14, %36 : vector<32x32xf32>
    %38 = vector.extract_strided_slice %6 {offsets = [0, 8], sizes = [32, 8], strides = [1, 1]} : vector<32x96xf32> to vector<32x8xf32>
    %cst_22 = arith.constant 0.353553385 : f32
    %39 = vector.broadcast %cst_22 : f32 to vector<32x8xf32>
    %40 = arith.mulf %38, %39 : vector<32x8xf32>
    %41 = vector.shape_cast %40 : vector<32x8xf32> to vector<4x8x8xf32>
    %42 = vector.extract_strided_slice %9 {offsets = [0, 40], sizes = [32, 8], strides = [1, 1]} : vector<32x96xf32> to vector<32x8xf32>
    %43 = vector.shape_cast %42 : vector<32x8xf32> to vector<4x8x8xf32>
    %44 = vector.extract_strided_slice %9 {offsets = [0, 72], sizes = [32, 8], strides = [1, 1]} : vector<32x96xf32> to vector<32x8xf32>
    %45 = vector.shape_cast %44 : vector<32x8xf32> to vector<4x8x8xf32>
    "tpu.trace_start"() <{level = 10 : i32, message = "tld,tmd->tlm"}> : () -> ()
    %cst_23 = arith.constant dense<0.000000e+00> : vector<4x8x8xf32>
    %46 = tpu.matmul %41, %43, %cst_23 {dimension_numbers = #tpu.dot_dimension_numbers<[2], [2], [1], [1], [0, 0, 0, 1, 1, 1], [0], [0]>} : vector<4x8x8xf32>, vector<4x8x8xf32>, vector<4x8x8xf32> -> vector<4x8x8xf32>
    "tpu.trace_stop"() : () -> ()
    %cst_24 = arith.constant dense<0xFF800000> : vector<4x8xf32>
    %47 = vector.multi_reduction <maximumf>, %46, %cst_24 [2] : vector<4x8x8xf32> to vector<4x8xf32>
    %48 = vector.shape_cast %47 : vector<4x8xf32> to vector<4x8x1xf32>
    %49 = vector.broadcast %48 : vector<4x8x1xf32> to vector<4x8x8xf32>
    %50 = arith.subf %46, %49 : vector<4x8x8xf32>
    %51 = math.exp %50 : vector<4x8x8xf32>
    %cst_25 = arith.constant dense<0.000000e+00> : vector<4x8xf32>
    %52 = vector.multi_reduction <add>, %51, %cst_25 [2] : vector<4x8x8xf32> to vector<4x8xf32>
    %53 = vector.shape_cast %52 : vector<4x8xf32> to vector<4x8x1xf32>
    %54 = vector.broadcast %53 : vector<4x8x1xf32> to vector<4x8x8xf32>
    %55 = arith.divf %51, %54 : vector<4x8x8xf32>
    "tpu.trace_start"() <{level = 10 : i32, message = "tlm,tmd->tld"}> : () -> ()
    %cst_26 = arith.constant dense<0.000000e+00> : vector<4x8x8xf32>
    %56 = tpu.matmul %55, %45, %cst_26 {dimension_numbers = #tpu.dot_dimension_numbers<[2], [1], [1], [2], [0, 0, 0, 1, 1, 2], [0], [0]>} : vector<4x8x8xf32>, vector<4x8x8xf32>, vector<4x8x8xf32> -> vector<4x8x8xf32>
    "tpu.trace_stop"() : () -> ()
    %c8 = arith.constant 8 : index
    %c0_27 = arith.constant 0 : index
    %57 = vector.load %arg5[%c8, %c0_27] : memref<32x32xf32, #tpu.memory_space<vmem>>, vector<8x32xf32>
    %58 = vector.shape_cast %56 : vector<4x8x8xf32> to vector<32x8xf32>
    %cst_28 = arith.constant dense<0.000000e+00> : vector<32x32xf32>
    %59 = tpu.matmul %58, %57, %cst_28 {dimension_numbers = #tpu.dot_dimension_numbers<[1], [0], [0], [1], [0, 0, 1, 1], [], []>} : vector<32x8xf32>, vector<8x32xf32>, vector<32x32xf32> -> vector<32x32xf32>
    %60 = arith.addf %37, %59 : vector<32x32xf32>
    %61 = vector.extract_strided_slice %6 {offsets = [0, 16], sizes = [32, 8], strides = [1, 1]} : vector<32x96xf32> to vector<32x8xf32>
    %cst_29 = arith.constant 0.353553385 : f32
    %62 = vector.broadcast %cst_29 : f32 to vector<32x8xf32>
    %63 = arith.mulf %61, %62 : vector<32x8xf32>
    %64 = vector.shape_cast %63 : vector<32x8xf32> to vector<4x8x8xf32>
    %65 = vector.extract_strided_slice %9 {offsets = [0, 48], sizes = [32, 8], strides = [1, 1]} : vector<32x96xf32> to vector<32x8xf32>
    %66 = vector.shape_cast %65 : vector<32x8xf32> to vector<4x8x8xf32>
    %67 = vector.extract_strided_slice %9 {offsets = [0, 80], sizes = [32, 8], strides = [1, 1]} : vector<32x96xf32> to vector<32x8xf32>
    %68 = vector.shape_cast %67 : vector<32x8xf32> to vector<4x8x8xf32>
    "tpu.trace_start"() <{level = 10 : i32, message = "tld,tmd->tlm"}> : () -> ()
    %cst_30 = arith.constant dense<0.000000e+00> : vector<4x8x8xf32>
    %69 = tpu.matmul %64, %66, %cst_30 {dimension_numbers = #tpu.dot_dimension_numbers<[2], [2], [1], [1], [0, 0, 0, 1, 1, 1], [0], [0]>} : vector<4x8x8xf32>, vector<4x8x8xf32>, vector<4x8x8xf32> -> vector<4x8x8xf32>
    "tpu.trace_stop"() : () -> ()
    %cst_31 = arith.constant dense<0xFF800000> : vector<4x8xf32>
    %70 = vector.multi_reduction <maximumf>, %69, %cst_31 [2] : vector<4x8x8xf32> to vector<4x8xf32>
    %71 = vector.shape_cast %70 : vector<4x8xf32> to vector<4x8x1xf32>
    %72 = vector.broadcast %71 : vector<4x8x1xf32> to vector<4x8x8xf32>
    %73 = arith.subf %69, %72 : vector<4x8x8xf32>
    %74 = math.exp %73 : vector<4x8x8xf32>
    %cst_32 = arith.constant dense<0.000000e+00> : vector<4x8xf32>
    %75 = vector.multi_reduction <add>, %74, %cst_32 [2] : vector<4x8x8xf32> to vector<4x8xf32>
    %76 = vector.shape_cast %75 : vector<4x8xf32> to vector<4x8x1xf32>
    %77 = vector.broadcast %76 : vector<4x8x1xf32> to vector<4x8x8xf32>
    %78 = arith.divf %74, %77 : vector<4x8x8xf32>
    "tpu.trace_start"() <{level = 10 : i32, message = "tlm,tmd->tld"}> : () -> ()
    %cst_33 = arith.constant dense<0.000000e+00> : vector<4x8x8xf32>
    %79 = tpu.matmul %78, %68, %cst_33 {dimension_numbers = #tpu.dot_dimension_numbers<[2], [1], [1], [2], [0, 0, 0, 1, 1, 2], [0], [0]>} : vector<4x8x8xf32>, vector<4x8x8xf32>, vector<4x8x8xf32> -> vector<4x8x8xf32>
    "tpu.trace_stop"() : () -> ()
    %c16 = arith.constant 16 : index
    %c0_34 = arith.constant 0 : index
    %80 = vector.load %arg5[%c16, %c0_34] : memref<32x32xf32, #tpu.memory_space<vmem>>, vector<8x32xf32>
    %81 = vector.shape_cast %79 : vector<4x8x8xf32> to vector<32x8xf32>
    %cst_35 = arith.constant dense<0.000000e+00> : vector<32x32xf32>
    %82 = tpu.matmul %81, %80, %cst_35 {dimension_numbers = #tpu.dot_dimension_numbers<[1], [0], [0], [1], [0, 0, 1, 1], [], []>} : vector<32x8xf32>, vector<8x32xf32>, vector<32x32xf32> -> vector<32x32xf32>
    %83 = arith.addf %60, %82 : vector<32x32xf32>
    %84 = vector.extract_strided_slice %6 {offsets = [0, 24], sizes = [32, 8], strides = [1, 1]} : vector<32x96xf32> to vector<32x8xf32>
    %cst_36 = arith.constant 0.353553385 : f32
    %85 = vector.broadcast %cst_36 : f32 to vector<32x8xf32>
    %86 = arith.mulf %84, %85 : vector<32x8xf32>
    %87 = vector.shape_cast %86 : vector<32x8xf32> to vector<4x8x8xf32>
    %88 = vector.extract_strided_slice %9 {offsets = [0, 56], sizes = [32, 8], strides = [1, 1]} : vector<32x96xf32> to vector<32x8xf32>
    %89 = vector.shape_cast %88 : vector<32x8xf32> to vector<4x8x8xf32>
    %90 = vector.extract_strided_slice %9 {offsets = [0, 88], sizes = [32, 8], strides = [1, 1]} : vector<32x96xf32> to vector<32x8xf32>
    %91 = vector.shape_cast %90 : vector<32x8xf32> to vector<4x8x8xf32>
    "tpu.trace_start"() <{level = 10 : i32, message = "tld,tmd->tlm"}> : () -> ()
    %cst_37 = arith.constant dense<0.000000e+00> : vector<4x8x8xf32>
    %92 = tpu.matmul %87, %89, %cst_37 {dimension_numbers = #tpu.dot_dimension_numbers<[2], [2], [1], [1], [0, 0, 0, 1, 1, 1], [0], [0]>} : vector<4x8x8xf32>, vector<4x8x8xf32>, vector<4x8x8xf32> -> vector<4x8x8xf32>
    "tpu.trace_stop"() : () -> ()
    %cst_38 = arith.constant dense<0xFF800000> : vector<4x8xf32>
    %93 = vector.multi_reduction <maximumf>, %92, %cst_38 [2] : vector<4x8x8xf32> to vector<4x8xf32>
    %94 = vector.shape_cast %93 : vector<4x8xf32> to vector<4x8x1xf32>
    %95 = vector.broadcast %94 : vector<4x8x1xf32> to vector<4x8x8xf32>
    %96 = arith.subf %92, %95 : vector<4x8x8xf32>
    %97 = math.exp %96 : vector<4x8x8xf32>
    %cst_39 = arith.constant dense<0.000000e+00> : vector<4x8xf32>
    %98 = vector.multi_reduction <add>, %97, %cst_39 [2] : vector<4x8x8xf32> to vector<4x8xf32>
    %99 = vector.shape_cast %98 : vector<4x8xf32> to vector<4x8x1xf32>
    %100 = vector.broadcast %99 : vector<4x8x1xf32> to vector<4x8x8xf32>
    %101 = arith.divf %97, %100 : vector<4x8x8xf32>
    "tpu.trace_start"() <{level = 10 : i32, message = "tlm,tmd->tld"}> : () -> ()
    %cst_40 = arith.constant dense<0.000000e+00> : vector<4x8x8xf32>
    %102 = tpu.matmul %101, %91, %cst_40 {dimension_numbers = #tpu.dot_dimension_numbers<[2], [1], [1], [2], [0, 0, 0, 1, 1, 2], [0], [0]>} : vector<4x8x8xf32>, vector<4x8x8xf32>, vector<4x8x8xf32> -> vector<4x8x8xf32>
    "tpu.trace_stop"() : () -> ()
    %c24 = arith.constant 24 : index
    %c0_41 = arith.constant 0 : index
    %103 = vector.load %arg5[%c24, %c0_41] : memref<32x32xf32, #tpu.memory_space<vmem>>, vector<8x32xf32>
    %104 = vector.shape_cast %102 : vector<4x8x8xf32> to vector<32x8xf32>
    %cst_42 = arith.constant dense<0.000000e+00> : vector<32x32xf32>
    %105 = tpu.matmul %104, %103, %cst_42 {dimension_numbers = #tpu.dot_dimension_numbers<[1], [0], [0], [1], [0, 0, 1, 1], [], []>} : vector<32x8xf32>, vector<8x32xf32>, vector<32x32xf32> -> vector<32x32xf32>
    %106 = arith.addf %83, %105 : vector<32x32xf32>
    %107 = vector.broadcast %10 : vector<1x32xf32> to vector<32x32xf32>
    %108 = arith.addf %106, %107 : vector<32x32xf32>
    %cst_43 = arith.constant 0.000000e+00 : f32
    %109 = vector.broadcast %cst_43 : f32 to vector<32x32xf32>
    %110 = vector.extract_strided_slice %9 {offsets = [0, 0], sizes = [32, 8], strides = [1, 1]} : vector<32x96xf32> to vector<32x8xf32>
    %cst_44 = arith.constant 0.353553385 : f32
    %111 = vector.broadcast %cst_44 : f32 to vector<32x8xf32>
    %112 = arith.mulf %110, %111 : vector<32x8xf32>
    %113 = vector.shape_cast %112 : vector<32x8xf32> to vector<4x8x8xf32>
    %114 = vector.extract_strided_slice %6 {offsets = [0, 32], sizes = [32, 8], strides = [1, 1]} : vector<32x96xf32> to vector<32x8xf32>
    %115 = vector.shape_cast %114 : vector<32x8xf32> to vector<4x8x8xf32>
    %116 = vector.extract_strided_slice %6 {offsets = [0, 64], sizes = [32, 8], strides = [1, 1]} : vector<32x96xf32> to vector<32x8xf32>
    %117 = vector.shape_cast %116 : vector<32x8xf32> to vector<4x8x8xf32>
    "tpu.trace_start"() <{level = 10 : i32, message = "tld,tmd->tlm"}> : () -> ()
    %cst_45 = arith.constant dense<0.000000e+00> : vector<4x8x8xf32>
    %118 = tpu.matmul %113, %115, %cst_45 {dimension_numbers = #tpu.dot_dimension_numbers<[2], [2], [1], [1], [0, 0, 0, 1, 1, 1], [0], [0]>} : vector<4x8x8xf32>, vector<4x8x8xf32>, vector<4x8x8xf32> -> vector<4x8x8xf32>
    "tpu.trace_stop"() : () -> ()
    %cst_46 = arith.constant dense<0xFF800000> : vector<4x8xf32>
    %119 = vector.multi_reduction <maximumf>, %118, %cst_46 [2] : vector<4x8x8xf32> to vector<4x8xf32>
    %120 = vector.shape_cast %119 : vector<4x8xf32> to vector<4x8x1xf32>
    %121 = vector.broadcast %120 : vector<4x8x1xf32> to vector<4x8x8xf32>
    %122 = arith.subf %118, %121 : vector<4x8x8xf32>
    %123 = math.exp %122 : vector<4x8x8xf32>
    %cst_47 = arith.constant dense<0.000000e+00> : vector<4x8xf32>
    %124 = vector.multi_reduction <add>, %123, %cst_47 [2] : vector<4x8x8xf32> to vector<4x8xf32>
    %125 = vector.shape_cast %124 : vector<4x8xf32> to vector<4x8x1xf32>
    %126 = vector.broadcast %125 : vector<4x8x1xf32> to vector<4x8x8xf32>
    %127 = arith.divf %123, %126 : vector<4x8x8xf32>
    "tpu.trace_start"() <{level = 10 : i32, message = "tlm,tmd->tld"}> : () -> ()
    %cst_48 = arith.constant dense<0.000000e+00> : vector<4x8x8xf32>
    %128 = tpu.matmul %127, %117, %cst_48 {dimension_numbers = #tpu.dot_dimension_numbers<[2], [1], [1], [2], [0, 0, 0, 1, 1, 2], [0], [0]>} : vector<4x8x8xf32>, vector<4x8x8xf32>, vector<4x8x8xf32> -> vector<4x8x8xf32>
    "tpu.trace_stop"() : () -> ()
    %c0_49 = arith.constant 0 : index
    %c0_50 = arith.constant 0 : index
    %129 = vector.load %arg6[%c0_49, %c0_50] : memref<32x32xf32, #tpu.memory_space<vmem>>, vector<8x32xf32>
    %130 = vector.shape_cast %128 : vector<4x8x8xf32> to vector<32x8xf32>
    %cst_51 = arith.constant dense<0.000000e+00> : vector<32x32xf32>
    %131 = tpu.matmul %130, %129, %cst_51 {dimension_numbers = #tpu.dot_dimension_numbers<[1], [0], [0], [1], [0, 0, 1, 1], [], []>} : vector<32x8xf32>, vector<8x32xf32>, vector<32x32xf32> -> vector<32x32xf32>
    %132 = arith.addf %109, %131 : vector<32x32xf32>
    %133 = vector.extract_strided_slice %9 {offsets = [0, 8], sizes = [32, 8], strides = [1, 1]} : vector<32x96xf32> to vector<32x8xf32>
    %cst_52 = arith.constant 0.353553385 : f32
    %134 = vector.broadcast %cst_52 : f32 to vector<32x8xf32>
    %135 = arith.mulf %133, %134 : vector<32x8xf32>
    %136 = vector.shape_cast %135 : vector<32x8xf32> to vector<4x8x8xf32>
    %137 = vector.extract_strided_slice %6 {offsets = [0, 40], sizes = [32, 8], strides = [1, 1]} : vector<32x96xf32> to vector<32x8xf32>
    %138 = vector.shape_cast %137 : vector<32x8xf32> to vector<4x8x8xf32>
    %139 = vector.extract_strided_slice %6 {offsets = [0, 72], sizes = [32, 8], strides = [1, 1]} : vector<32x96xf32> to vector<32x8xf32>
    %140 = vector.shape_cast %139 : vector<32x8xf32> to vector<4x8x8xf32>
    "tpu.trace_start"() <{level = 10 : i32, message = "tld,tmd->tlm"}> : () -> ()
    %cst_53 = arith.constant dense<0.000000e+00> : vector<4x8x8xf32>
    %141 = tpu.matmul %136, %138, %cst_53 {dimension_numbers = #tpu.dot_dimension_numbers<[2], [2], [1], [1], [0, 0, 0, 1, 1, 1], [0], [0]>} : vector<4x8x8xf32>, vector<4x8x8xf32>, vector<4x8x8xf32> -> vector<4x8x8xf32>
    "tpu.trace_stop"() : () -> ()
    %cst_54 = arith.constant dense<0xFF800000> : vector<4x8xf32>
    %142 = vector.multi_reduction <maximumf>, %141, %cst_54 [2] : vector<4x8x8xf32> to vector<4x8xf32>
    %143 = vector.shape_cast %142 : vector<4x8xf32> to vector<4x8x1xf32>
    %144 = vector.broadcast %143 : vector<4x8x1xf32> to vector<4x8x8xf32>
    %145 = arith.subf %141, %144 : vector<4x8x8xf32>
    %146 = math.exp %145 : vector<4x8x8xf32>
    %cst_55 = arith.constant dense<0.000000e+00> : vector<4x8xf32>
    %147 = vector.multi_reduction <add>, %146, %cst_55 [2] : vector<4x8x8xf32> to vector<4x8xf32>
    %148 = vector.shape_cast %147 : vector<4x8xf32> to vector<4x8x1xf32>
    %149 = vector.broadcast %148 : vector<4x8x1xf32> to vector<4x8x8xf32>
    %150 = arith.divf %146, %149 : vector<4x8x8xf32>
    "tpu.trace_start"() <{level = 10 : i32, message = "tlm,tmd->tld"}> : () -> ()
    %cst_56 = arith.constant dense<0.000000e+00> : vector<4x8x8xf32>
    %151 = tpu.matmul %150, %140, %cst_56 {dimension_numbers = #tpu.dot_dimension_numbers<[2], [1], [1], [2], [0, 0, 0, 1, 1, 2], [0], [0]>} : vector<4x8x8xf32>, vector<4x8x8xf32>, vector<4x8x8xf32> -> vector<4x8x8xf32>
    "tpu.trace_stop"() : () -> ()
    %c8_57 = arith.constant 8 : index
    %c0_58 = arith.constant 0 : index
    %152 = vector.load %arg6[%c8_57, %c0_58] : memref<32x32xf32, #tpu.memory_space<vmem>>, vector<8x32xf32>
    %153 = vector.shape_cast %151 : vector<4x8x8xf32> to vector<32x8xf32>
    %cst_59 = arith.constant dense<0.000000e+00> : vector<32x32xf32>
    %154 = tpu.matmul %153, %152, %cst_59 {dimension_numbers = #tpu.dot_dimension_numbers<[1], [0], [0], [1], [0, 0, 1, 1], [], []>} : vector<32x8xf32>, vector<8x32xf32>, vector<32x32xf32> -> vector<32x32xf32>
    %155 = arith.addf %132, %154 : vector<32x32xf32>
    %156 = vector.extract_strided_slice %9 {offsets = [0, 16], sizes = [32, 8], strides = [1, 1]} : vector<32x96xf32> to vector<32x8xf32>
    %cst_60 = arith.constant 0.353553385 : f32
    %157 = vector.broadcast %cst_60 : f32 to vector<32x8xf32>
    %158 = arith.mulf %156, %157 : vector<32x8xf32>
    %159 = vector.shape_cast %158 : vector<32x8xf32> to vector<4x8x8xf32>
    %160 = vector.extract_strided_slice %6 {offsets = [0, 48], sizes = [32, 8], strides = [1, 1]} : vector<32x96xf32> to vector<32x8xf32>
    %161 = vector.shape_cast %160 : vector<32x8xf32> to vector<4x8x8xf32>
    %162 = vector.extract_strided_slice %6 {offsets = [0, 80], sizes = [32, 8], strides = [1, 1]} : vector<32x96xf32> to vector<32x8xf32>
    %163 = vector.shape_cast %162 : vector<32x8xf32> to vector<4x8x8xf32>
    "tpu.trace_start"() <{level = 10 : i32, message = "tld,tmd->tlm"}> : () -> ()
    %cst_61 = arith.constant dense<0.000000e+00> : vector<4x8x8xf32>
    %164 = tpu.matmul %159, %161, %cst_61 {dimension_numbers = #tpu.dot_dimension_numbers<[2], [2], [1], [1], [0, 0, 0, 1, 1, 1], [0], [0]>} : vector<4x8x8xf32>, vector<4x8x8xf32>, vector<4x8x8xf32> -> vector<4x8x8xf32>
    "tpu.trace_stop"() : () -> ()
    %cst_62 = arith.constant dense<0xFF800000> : vector<4x8xf32>
    %165 = vector.multi_reduction <maximumf>, %164, %cst_62 [2] : vector<4x8x8xf32> to vector<4x8xf32>
    %166 = vector.shape_cast %165 : vector<4x8xf32> to vector<4x8x1xf32>
    %167 = vector.broadcast %166 : vector<4x8x1xf32> to vector<4x8x8xf32>
    %168 = arith.subf %164, %167 : vector<4x8x8xf32>
    %169 = math.exp %168 : vector<4x8x8xf32>
    %cst_63 = arith.constant dense<0.000000e+00> : vector<4x8xf32>
    %170 = vector.multi_reduction <add>, %169, %cst_63 [2] : vector<4x8x8xf32> to vector<4x8xf32>
    %171 = vector.shape_cast %170 : vector<4x8xf32> to vector<4x8x1xf32>
    %172 = vector.broadcast %171 : vector<4x8x1xf32> to vector<4x8x8xf32>
    %173 = arith.divf %169, %172 : vector<4x8x8xf32>
    "tpu.trace_start"() <{level = 10 : i32, message = "tlm,tmd->tld"}> : () -> ()
    %cst_64 = arith.constant dense<0.000000e+00> : vector<4x8x8xf32>
    %174 = tpu.matmul %173, %163, %cst_64 {dimension_numbers = #tpu.dot_dimension_numbers<[2], [1], [1], [2], [0, 0, 0, 1, 1, 2], [0], [0]>} : vector<4x8x8xf32>, vector<4x8x8xf32>, vector<4x8x8xf32> -> vector<4x8x8xf32>
    "tpu.trace_stop"() : () -> ()
    %c16_65 = arith.constant 16 : index
    %c0_66 = arith.constant 0 : index
    %175 = vector.load %arg6[%c16_65, %c0_66] : memref<32x32xf32, #tpu.memory_space<vmem>>, vector<8x32xf32>
    %176 = vector.shape_cast %174 : vector<4x8x8xf32> to vector<32x8xf32>
    %cst_67 = arith.constant dense<0.000000e+00> : vector<32x32xf32>
    %177 = tpu.matmul %176, %175, %cst_67 {dimension_numbers = #tpu.dot_dimension_numbers<[1], [0], [0], [1], [0, 0, 1, 1], [], []>} : vector<32x8xf32>, vector<8x32xf32>, vector<32x32xf32> -> vector<32x32xf32>
    %178 = arith.addf %155, %177 : vector<32x32xf32>
    %179 = vector.extract_strided_slice %9 {offsets = [0, 24], sizes = [32, 8], strides = [1, 1]} : vector<32x96xf32> to vector<32x8xf32>
    %cst_68 = arith.constant 0.353553385 : f32
    %180 = vector.broadcast %cst_68 : f32 to vector<32x8xf32>
    %181 = arith.mulf %179, %180 : vector<32x8xf32>
    %182 = vector.shape_cast %181 : vector<32x8xf32> to vector<4x8x8xf32>
    %183 = vector.extract_strided_slice %6 {offsets = [0, 56], sizes = [32, 8], strides = [1, 1]} : vector<32x96xf32> to vector<32x8xf32>
    %184 = vector.shape_cast %183 : vector<32x8xf32> to vector<4x8x8xf32>
    %185 = vector.extract_strided_slice %6 {offsets = [0, 88], sizes = [32, 8], strides = [1, 1]} : vector<32x96xf32> to vector<32x8xf32>
    %186 = vector.shape_cast %185 : vector<32x8xf32> to vector<4x8x8xf32>
    "tpu.trace_start"() <{level = 10 : i32, message = "tld,tmd->tlm"}> : () -> ()
    %cst_69 = arith.constant dense<0.000000e+00> : vector<4x8x8xf32>
    %187 = tpu.matmul %182, %184, %cst_69 {dimension_numbers = #tpu.dot_dimension_numbers<[2], [2], [1], [1], [0, 0, 0, 1, 1, 1], [0], [0]>} : vector<4x8x8xf32>, vector<4x8x8xf32>, vector<4x8x8xf32> -> vector<4x8x8xf32>
    "tpu.trace_stop"() : () -> ()
    %cst_70 = arith.constant dense<0xFF800000> : vector<4x8xf32>
    %188 = vector.multi_reduction <maximumf>, %187, %cst_70 [2] : vector<4x8x8xf32> to vector<4x8xf32>
    %189 = vector.shape_cast %188 : vector<4x8xf32> to vector<4x8x1xf32>
    %190 = vector.broadcast %189 : vector<4x8x1xf32> to vector<4x8x8xf32>
    %191 = arith.subf %187, %190 : vector<4x8x8xf32>
    %192 = math.exp %191 : vector<4x8x8xf32>
    %cst_71 = arith.constant dense<0.000000e+00> : vector<4x8xf32>
    %193 = vector.multi_reduction <add>, %192, %cst_71 [2] : vector<4x8x8xf32> to vector<4x8xf32>
    %194 = vector.shape_cast %193 : vector<4x8xf32> to vector<4x8x1xf32>
    %195 = vector.broadcast %194 : vector<4x8x1xf32> to vector<4x8x8xf32>
    %196 = arith.divf %192, %195 : vector<4x8x8xf32>
    "tpu.trace_start"() <{level = 10 : i32, message = "tlm,tmd->tld"}> : () -> ()
    %cst_72 = arith.constant dense<0.000000e+00> : vector<4x8x8xf32>
    %197 = tpu.matmul %196, %186, %cst_72 {dimension_numbers = #tpu.dot_dimension_numbers<[2], [1], [1], [2], [0, 0, 0, 1, 1, 2], [0], [0]>} : vector<4x8x8xf32>, vector<4x8x8xf32>, vector<4x8x8xf32> -> vector<4x8x8xf32>
    "tpu.trace_stop"() : () -> ()
    %c24_73 = arith.constant 24 : index
    %c0_74 = arith.constant 0 : index
    %198 = vector.load %arg6[%c24_73, %c0_74] : memref<32x32xf32, #tpu.memory_space<vmem>>, vector<8x32xf32>
    %199 = vector.shape_cast %197 : vector<4x8x8xf32> to vector<32x8xf32>
    %cst_75 = arith.constant dense<0.000000e+00> : vector<32x32xf32>
    %200 = tpu.matmul %199, %198, %cst_75 {dimension_numbers = #tpu.dot_dimension_numbers<[1], [0], [0], [1], [0, 0, 1, 1], [], []>} : vector<32x8xf32>, vector<8x32xf32>, vector<32x32xf32> -> vector<32x32xf32>
    %201 = arith.addf %178, %200 : vector<32x32xf32>
    %202 = vector.broadcast %11 : vector<1x32xf32> to vector<32x32xf32>
    %203 = arith.addf %201, %202 : vector<32x32xf32>
    %204 = arith.addf %1, %108 : vector<32x32xf32>
    %cst_76 = arith.constant dense<0.000000e+00> : vector<32xf32>
    %205 = vector.multi_reduction <add>, %204, %cst_76 [1] : vector<32x32xf32> to vector<32xf32>
    %206 = vector.shape_cast %205 : vector<32xf32> to vector<32x1xf32>
    %cst_77 = arith.constant 3.200000e+01 : f32
    %207 = vector.broadcast %cst_77 : f32 to vector<32x1xf32>
    %208 = arith.divf %206, %207 : vector<32x1xf32>
    %209 = vector.broadcast %208 : vector<32x1xf32> to vector<32x32xf32>
    %210 = arith.subf %204, %209 : vector<32x32xf32>
    %211 = arith.mulf %210, %210 : vector<32x32xf32>
    %cst_78 = arith.constant dense<0.000000e+00> : vector<32xf32>
    %212 = vector.multi_reduction <add>, %211, %cst_78 [1] : vector<32x32xf32> to vector<32xf32>
    %213 = vector.shape_cast %212 : vector<32xf32> to vector<32x1xf32>
    %cst_79 = arith.constant 3.200000e+01 : f32
    %214 = vector.broadcast %cst_79 : f32 to vector<32x1xf32>
    %215 = arith.divf %213, %214 : vector<32x1xf32>
    %cst_80 = arith.constant 9.99999974E-6 : f32
    %216 = vector.broadcast %cst_80 : f32 to vector<32x1xf32>
    %217 = arith.addf %215, %216 : vector<32x1xf32>
    %218 = math.rsqrt %217 : vector<32x1xf32>
    %219 = vector.broadcast %218 : vector<32x1xf32> to vector<32x32xf32>
    %220 = arith.mulf %210, %219 : vector<32x32xf32>
    %221 = vector.broadcast %12 : vector<1x32xf32> to vector<32x32xf32>
    %222 = arith.mulf %220, %221 : vector<32x32xf32>
    %223 = vector.broadcast %13 : vector<1x32xf32> to vector<32x32xf32>
    %224 = arith.addf %222, %223 : vector<32x32xf32>
    %c0_81 = arith.constant 0 : index
    %c0_82 = arith.constant 0 : index
    %225 = vector.load %arg9[%c0_81, %c0_82] : memref<32x32xf32, #tpu.memory_space<vmem>>, vector<32x32xf32>
    tpu.vector_store %arg9[%c0_81, %c0_82], %224 {strides = array<i32>} : memref<32x32xf32, #tpu.memory_space<vmem>>, vector<32x32xf32>,
    %226 = arith.addf %0, %203 : vector<32x32xf32>
    %cst_83 = arith.constant dense<0.000000e+00> : vector<32xf32>
    %227 = vector.multi_reduction <add>, %226, %cst_83 [1] : vector<32x32xf32> to vector<32xf32>
    %228 = vector.shape_cast %227 : vector<32xf32> to vector<32x1xf32>
    %cst_84 = arith.constant 3.200000e+01 : f32
    %229 = vector.broadcast %cst_84 : f32 to vector<32x1xf32>
    %230 = arith.divf %228, %229 : vector<32x1xf32>
    %231 = vector.broadcast %230 : vector<32x1xf32> to vector<32x32xf32>
    %232 = arith.subf %226, %231 : vector<32x32xf32>
    %233 = arith.mulf %232, %232 : vector<32x32xf32>
    %cst_85 = arith.constant dense<0.000000e+00> : vector<32xf32>
    %234 = vector.multi_reduction <add>, %233, %cst_85 [1] : vector<32x32xf32> to vector<32xf32>
    %235 = vector.shape_cast %234 : vector<32xf32> to vector<32x1xf32>
    %cst_86 = arith.constant 3.200000e+01 : f32
    %236 = vector.broadcast %cst_86 : f32 to vector<32x1xf32>
    %237 = arith.divf %235, %236 : vector<32x1xf32>
    %cst_87 = arith.constant 9.99999974E-6 : f32
    %238 = vector.broadcast %cst_87 : f32 to vector<32x1xf32>
    %239 = arith.addf %237, %238 : vector<32x1xf32>
    %240 = math.rsqrt %239 : vector<32x1xf32>
    %241 = vector.broadcast %240 : vector<32x1xf32> to vector<32x32xf32>
    %242 = arith.mulf %232, %241 : vector<32x32xf32>
    %243 = vector.broadcast %12 : vector<1x32xf32> to vector<32x32xf32>
    %244 = arith.mulf %242, %243 : vector<32x32xf32>
    %245 = vector.broadcast %13 : vector<1x32xf32> to vector<32x32xf32>
    %246 = arith.addf %244, %245 : vector<32x32xf32>
    %c0_88 = arith.constant 0 : index
    %c0_89 = arith.constant 0 : index
    %247 = vector.load %arg8[%c0_88, %c0_89] : memref<32x32xf32, #tpu.memory_space<vmem>>, vector<32x32xf32>
    tpu.vector_store %arg8[%c0_88, %c0_89], %246 {strides = array<i32>} : memref<32x32xf32, #tpu.memory_space<vmem>>, vector<32x32xf32>,
    return
  }
  func.func @transform_0(%arg0: i32) -> (i32, i32) {
    %c0_i32 = arith.constant 0 : i32
    %c0_i32_0 = arith.constant 0 : i32
    return %arg0, %c0_i32 : i32, i32
  }
  func.func @transform_1(%arg0: i32) -> (i32, i32) {
    %c0_i32 = arith.constant 0 : i32
    %c0_i32_0 = arith.constant 0 : i32
    return %arg0, %c0_i32 : i32, i32
  }
  func.func @transform_2(%arg0: i32) -> (i32, i32) {
    %c0_i32 = arith.constant 0 : i32
    %c0_i32_0 = arith.constant 0 : i32
    %c0_i32_1 = arith.constant 0 : i32
    return %c0_i32, %c0_i32_0 : i32, i32
  }
  func.func @transform_3(%arg0: i32) -> (i32, i32) {
    %c0_i32 = arith.constant 0 : i32
    %c0_i32_0 = arith.constant 0 : i32
    %c0_i32_1 = arith.constant 0 : i32
    return %c0_i32, %c0_i32_0 : i32, i32
  }
  func.func @transform_4(%arg0: i32) -> (i32, i32) {
    %c0_i32 = arith.constant 0 : i32
    %c0_i32_0 = arith.constant 0 : i32
    %c0_i32_1 = arith.constant 0 : i32
    return %c0_i32, %c0_i32_0 : i32, i32
  }
  func.func @transform_5(%arg0: i32) -> (i32, i32) {
    %c0_i32 = arith.constant 0 : i32
    %c0_i32_0 = arith.constant 0 : i32
    %c0_i32_1 = arith.constant 0 : i32
    return %c0_i32, %c0_i32_0 : i32, i32
  }
  func.func @transform_6(%arg0: i32) -> (i32, i32) {
    %c0_i32 = arith.constant 0 : i32
    %c0_i32_0 = arith.constant 0 : i32
    %c0_i32_1 = arith.constant 0 : i32
    return %c0_i32, %c0_i32_0 : i32, i32
  }
  func.func @transform_7(%arg0: i32) -> (i32, i32) {
    %c0_i32 = arith.constant 0 : i32
    %c0_i32_0 = arith.constant 0 : i32
    return %arg0, %c0_i32 : i32, i32
  }
  func.func @transform_8(%arg0: i32) -> (i32, i32) {
    %c0_i32 = arith.constant 0 : i32
    %c0_i32_0 = arith.constant 0 : i32
    return %arg0, %c0_i32 : i32, i32
  }
}

</mosaic_0001>

<bundles_post_ra>
// kernel: tpu_custom_call.1
= control target key start
LH: loop header
LB: loop body
LE: loop exit
PB: predicated region body
PF: predicated region fallthrough
CT: control target
= control target key end

     0   :  { %14 = vsyncpa [#allocation3], 0  ;;  %s4738_s0 = inlined_call_operand.hbm [shape: f32[32,32], index: 0, kind: input, shape index: {}]   ;;  %s4739_s1 = inlined_call_operand.hbm [shape: f32[32,32], index: 1, kind: input, shape index: {}]   ;;  %s4740_s2 = inlined_call_operand.hbm [shape: f32[32,96], index: 2, kind: input, shape index: {}]   ;;  %s4741_s3 = inlined_call_operand.vmem [shape: f32[1,96], index: 3, kind: input, shape index: {}]   ;;  %s4742_s4 = inlined_call_operand.hbm [shape: f32[32,32], index: 4, kind: input, shape index: {}]   ;;  %s4743_s5 = inlined_call_operand.hbm [shape: f32[32,32], index: 5, kind: input, shape index: {}]   ;;  %s4744_s6 = inlined_call_operand.vmem [shape: f32[4,32], index: 6, kind: input, shape index: {}]   ;;  %s4745_s7 = inlined_call_operand.hbm [shape: f32[32,32], index: 7, kind: output, shape index: {0}]   ;;  %s4746_s8 = inlined_call_operand.hbm [shape: f32[32,32], index: 8, kind: output, shape index: {1}]  }
   0x1   :  { %15 = vsyncpa [#allocation6], 0 }
   0x2   :  { %16 = vsyncpa [#allocation9], 0 }
   0x3   :  { %17 = vsyncpa [#allocation4], 0 }
   0x4   :  { %18 = vsyncpa [#allocation13], 0  ;;  %s36_s29 = sshll.u32 %s4739_s1, 4  ;;  %s3859_s30 = smov [#allocation5]   ;;  %s37_s29 = int_to_ptr.hbm [resolvable:$true] %s36_s29 }
   0x5   :  { %s38_s9 = sshll.u32 %s3859_s30, 4  ;;  %s64_s12 = sshll.u32 %s4742_s4, 4  ;;  %s39_s9 = int_to_ptr.vmem [resolvable:$true] %s38_s9  ;;  %s65_s12 = int_to_ptr.hbm [resolvable:$true] %s64_s12 }
   0x6   :  { %s3860_s13 = smov 128   ;;  %s3861_s14 = smov 8  }
   0x7   :  { %44 = dma.hbm_to_vmem [thread:$0]  %s37_s29, 512, %s39_s9, [#allocation6], %s3860_s13, %s3860_s13, %s3861_s14  }
   0x8   :  { %s3862_s15 = smov [#allocation8]   ;;  %s23_s1 = sshll.u32 %s4738_s0, 4  ;;  %s24_s1 = int_to_ptr.hbm [resolvable:$true] %s23_s1 }
   0x9   :  { %s66_s16 = sshll.u32 %s3862_s15, 4  ;;  %s49_s20 = sshll.u32 %s4740_s2, 4  ;;  %s67_s16 = int_to_ptr.vmem [resolvable:$true] %s66_s16  ;;  %s50_s20 = int_to_ptr.hbm [resolvable:$true] %s49_s20 }
   0xa   :  { %72 = dma.hbm_to_vmem [thread:$0]  %s65_s12, 512, %s67_s16, [#allocation9], %s3860_s13, %s3860_s13, %s3861_s14  }
   0xb   :  { %s3863_s21 = smov [#allocation2]   ;;  %s3864_s23 = smov [#allocation7]  }
   0xc   :  { %s25_s22 = sshll.u32 %s3863_s21, 4  ;;  %s51_s0 = sshll.u32 %s3864_s23, 4  ;;  %s26_s22 = int_to_ptr.vmem [resolvable:$true] %s25_s22  ;;  %s52_s0 = int_to_ptr.vmem [resolvable:$true] %s51_s0 }
   0xd   :  { %31 = dma.hbm_to_vmem [thread:$0]  %s24_s1, 512, %s26_s22, [#allocation3], %s3860_s13, %s3860_s13, %s3861_s14  }
   0xe   :  { %s77_s26 = sshll.u32 %s4743_s5, 4  ;;  %s3865_s2 = smov [#allocation10]   ;;  %s78_s26 = int_to_ptr.hbm [resolvable:$true] %s77_s26 }
   0xf   :  { %57 = dma.hbm_to_vmem [thread:$0]  %s50_s20, 512, %s52_s0, [#allocation6], %s3860_s13, %s3860_s13, %s3861_s14  }
  0x10   :  { %s79_s27 = sshll.u32 %s3865_s2, 4  ;;  %s80_s27 = int_to_ptr.vmem [resolvable:$true] %s79_s27 }
  0x11   :  { %85 = dma.hbm_to_vmem [thread:$0]  %s78_s26, 512, %s80_s27, [#allocation9], %s3860_s13, %s3860_s13, %s3861_s14  }
  0x12   :  { %3849 = dma.done.wait [#allocation3], 512  }
  0x13   :  { %3850 = vsyncadd [#allocation3], 4294966784 }
  0x14   :  { %3851 = dma.done.wait [#allocation6], 1024  }
  0x15   :  { %3852 = vsyncadd [#allocation6], 4294966272 }
  0x16   :  { %3853 = dma.done.wait [#allocation9], 1024  }
  0x17   :  { %3854 = vsyncadd [#allocation9], 4294966272  ;;  %v119_v0 = vld [vmem:[#allocation7 + $0x18] sm:$0xff]  ;;  %v118_v1 = vld [vmem:[#allocation7 + $0x10] sm:$0xff]  ;;  %vm124_vm0 = vcmask 261120   ;;  %s3866_s29 = smov 96  }
  0x18   :  { %190 = vmatpush.msra.mxu1 %v119_v0  ;;  %149 = vmatpush.msra.mxu0 %v119_v0  ;;  %v117_v2 = vld [vmem:[#allocation7 + $0x8] sm:$0xff]  ;;  %v116_v3 = vld [vmem:[#allocation7] sm:$0xff]  ;;  %v114_v8 = vld [vmem:[#allocation5 + $0x10] sm:$0xff]  ;;  %s3868_s30 = smov 120   ;;  %vm218_vm1 = vcmask 64512   ;;  %s3869_s9 = smov 64  }
  0x19   :  { %v112_v4 = vld [vmem:[#allocation5] sm:$0xff]  ;;  %v113_v6 = vld [vmem:[#allocation5 + $0x8] sm:$0xff]  ;;  %v110_v9 = vld [vmem:[#allocation2 + $0x10] sm:$0xff]  ;;  %s3870_s10 = smov 80   ;;  %s3871_s11 = smov 56  }
  0x1a   :  { %191 = vmatpush.msra.mxu1 %v118_v1  ;;  %150 = vmatpush.msra.mxu0 %v118_v1  ;;  %v108_v5 = vld [vmem:[#allocation2] sm:$0xff]  ;;  %v109_v7 = vld [vmem:[#allocation2 + $0x8] sm:$0xff]  ;;  %v115_v10 = vld [vmem:[#allocation5 + $0x18] sm:$0xff]  ;;  %s3872_s12 = smov 112   ;;  %s3873_s15 = smov 48  }
  0x1b   :  { %v111_v11 = vld [vmem:[#allocation2 + $0x18] sm:$0xff]  ;;  %v3522_v12 = vld [vmem:[%s4741_s3] ss:$0 sm:$0xff]  ;;  %s3867_s3 = smov 88   ;;  %s3874_s16 = smov 72  }
  0x1c   :  { %192 = vmatpush.msra.mxu1 %v117_v2  ;;  %151 = vmatpush.msra.mxu0 %v117_v2  ;;  %s3875_s17 = smov 104   ;;  %s3876_s18 = smov 40  }
  0x1d   :  { %s3314_s2 = sshll.u32 %s4746_s8, 4  ;;  %s3879_s8 = smov [#allocation11]   ;;  %s3315_s2 = int_to_ptr.hbm [resolvable:$true] %s3314_s2 }
  0x1e   :  { %193 = vmatpush.msra.mxu1 %v116_v3  ;;  %152 = vmatpush.msra.mxu0 %v116_v3  ;;  %s3299_s27 = sshll.u32 %s3879_s8, 4  ;;  %s3300_s27 = int_to_ptr.vmem [resolvable:$true] %s3299_s27 }
  0x1f   :  { %3338 = vmatmul.msk.f32.vlgmr.msra.gmra.mxu1 %vm124_vm0, %v112_v4  ;;  %3334 = vmatmul.msk.f32.vlgmr.msra.gmra.mxu0 %vm124_vm0, %v108_v5 }
  0x27   :  { %3339 = vmatmul.msk.f32.gmra.mxu1 %vm124_vm0, %v113_v6  ;;  %3335 = vmatmul.msk.f32.gmra.mxu0 %vm124_vm0, %v109_v7 }
  0x2f   :  { %3340 = vmatmul.msk.f32.gmra.mxu1 %vm124_vm0, %v114_v8  ;;  %3336 = vmatmul.msk.f32.gmra.mxu0 %vm124_vm0, %v110_v9 }
  0x37   :  { %3341 = vmatmul.msk.f32.gmra.mxu1 %vm124_vm0, %v115_v10  ;;  %3337 = vmatmul.msk.f32.gmra.mxu0 %vm124_vm0, %v111_v11 }
  0x9c   :  { %v195_v13 = vpop.f32.mrf.mxu1  ;;  %v154_v14 = vpop.f32.mrf.mxu0 }
  0x9d   :  { %v3966_v15 = vadd.f32 %v3522_v12, %v195_v13  ;;  %v3993_v28 = vadd.f32 %v3522_v12, %v154_v14 }
  0x9f   :  { %216 = vrot.lane.b32.xlu2 %v3966_v15, %s3866_s29  ;;  %v3996_v30 = vmul.f32 0.35355338, %v3993_v28 }
  0xa4   :  { %v198_v16 = vpop.f32.mrf.mxu1  ;;  %v157_v17 = vpop.f32.mrf.mxu0 }
  0xa5   :  { %v3970_v18 = vadd.f32 %v3522_v12, %v198_v16  ;;  %v4007_v33 = vadd.f32 %v3522_v12, %v157_v17 }
  0xa7   :  { %245 = vrot.lane.b32.xlu0 %v3970_v18, %s3866_s29  ;;  %v4010_v35 = vmul.f32 0.35355338, %v4007_v33 }
  0xac   :  { %v201_v19 = vpop.f32.mrf.mxu1  ;;  %v160_v20 = vpop.f32.mrf.mxu0 }
  0xad   :  { %v3974_v21 = vadd.f32 %v3522_v12, %v201_v19  ;;  %v3976_v22 = vadd.f32 %v3522_v12, %v160_v20 }
  0xaf   :  { %273 = vrot.lane.b32.xlu2 %v3974_v21, %s3866_s29  ;;  %v4002_v32 = vmul.f32 0.35355338, %v3976_v22 }
  0xb4   :  { %v204_v23 = vpop.f32.mrf.mxu1  ;;  %v163_v24 = vpop.f32.mrf.mxu0 }
  0xb5   :  { %v3980_v25 = vadd.f32 %v3522_v12, %v204_v23  ;;  %v3986_v26 = vadd.f32 %v3522_v12, %v163_v24 }
  0xb7   :  { %615 = vrot.lane.b32.xlu1 %v3980_v25, %s3867_s3  ;;  %301 = vrot.lane.b32.xlu0 %v3980_v25, %s3866_s29  ;;  %v3989_v27 = vmul.f32 0.35355338, %v3986_v26  ;;  %v3492_v45 = vpack.i.bf16 %v3980_v25, %v3970_v18 }
  0xbf   :  { %613 = vrot.lane.b32.xlu1 %v3989_v27, %s3868_s30 }
  0xf9   :  { %v217_v29 = vpop.permute.xlu2 %216 }
  0xfa   :  { %3342 = vmatpush.xpose.msk.msra.mxu2 %vm218_vm1, %v217_v29 }
  0xfd   :  { %3343 = vmatmul.msk.f32.vlgmr.msra.gmra.mxu2 %vm218_vm1, %v3996_v30 }
 0x109   :  { %v274_v31 = vpop.permute.xlu2 %273 }
 0x10a   :  { %3346 = vmatpush.xpose.msk.msrb.mxu2 %vm218_vm1, %v274_v31 }
 0x10d   :  { %3347 = vmatmul.msk.f32.vlgmr.msrb.gmra.mxu2 %vm218_vm1, %v4002_v32 }
 0x119   :  { %v246_v34 = vpop.permute.xlu0 %245 }
 0x11a   :  { %3344 = vmatpush.xpose.msk.msrb.mxu0 %vm218_vm1, %v246_v34 }
 0x11d   :  { %3345 = vmatmul.msk.f32.vlgmr.msrb.gmra.mxu0 %vm218_vm1, %v4010_v35 }
 0x129   :  { %v616_v36 = vpop.permute.xlu1 %615  ;;  %v302_v37 = vpop.permute.xlu0 %301 }
 0x12a   :  { %3348 = vmatpush.xpose.msk.msra.mxu3 %vm218_vm1, %v302_v37  ;;  %3360 = vmatpush.xpose.msk.msrb.mxu1 %vm218_vm1, %v616_v36 }
 0x12d   :  { %3349 = vmatmul.msk.f32.vlgmr.msra.gmra.mxu3 %vm218_vm1, %v3989_v27 }
 0x131   :  { %v614_v38 = vpop.permute.xlu1 %613 }
 0x132   :  { %3361 = vmatmul.msk.f32.vlgmr.msrb.gmra.mxu1 %vm218_vm1, %v614_v38 }
 0x180   :  { %v4053_v0 = vpop.f32.mrf.mxu2 }
 0x181   :  { %v328_v1 = vsel %vm218_vm1, %v4053_v0, -inf }
 0x190   :  { %v4057_v2 = vpop.f32.mrf.mxu2 }
 0x191   :  { %v334_v3 = vsel %vm218_vm1, %v4057_v2, -inf }
 0x19a   :  { %v269_v39 = vpop.f32.mrf.mxu0 }
 0x19b   :  { %v331_v40 = vsel %vm218_vm1, %v269_v39, -inf }
 0x19c   :  { %332 = vmax.xlane.f32.xlu0 %v331_v40 }
 0x1af   :  { %v638_v41 = vpop.f32.mrf.mxu1 }
 0x1b0   :  { %v325_v42 = vpop.f32.mrf.mxu3  ;;  %557 = vrot.lane.b32.xlu0 %v4010_v35, %s3868_s30  ;;  %v650_v43 = vsel %vm218_vm1, %v638_v41, -inf }
 0x1b1   :  { %651 = vmax.xlane.f32.xlu2 %v650_v43  ;;  %v337_v44 = vsel %vm218_vm1, %v325_v42, -inf }
 0x1b2   :  { %338 = vmax.xlane.f32.xlu1 %v337_v44 }
 0x1cb   :  { %3493 = vrot.lane.b32.xlu1 %v3492_v45, %s3869_s9 }
 0x20f   :  { %v333_v46 = vpop.xlane.xlu0 %332 }
 0x210   :  { %v341_v47 = vsub.f32 %v269_v39, %v333_v46 }
 0x212   :  { %v346_v48 = vmul.f32 1.442695, %v341_v47 }
 0x214   :  { %3527 = vpow2.f32 %v346_v48 }
 0x21a   :  { %v3528_v49 = vpop.eup %3527 }
 0x21b   :  { %v355_v50 = vsel %vm218_vm1, %v3528_v49, 0.0 }
 0x21c   :  { %356 = vadd.xlane.f32.xlu2 %v355_v50 }
 0x222   :  { %v558_v11 = vpop.permute.xlu0 %557 }
 0x224   :  { %v652_v51 = vpop.xlane.xlu2 %651 }
 0x225   :  { %v656_v52 = vsub.f32 %v638_v41, %v652_v51  ;;  %v339_v53 = vpop.xlane.xlu1 %338 }
 0x226   :  { %v343_v54 = vsub.f32 %v325_v42, %v339_v53 }
 0x227   :  { %v663_v55 = vmul.f32 1.442695, %v656_v52 }
 0x228   :  { %v350_v56 = vmul.f32 1.442695, %v343_v54 }
 0x229   :  { %3529 = vpow2.f32 %v663_v55 }
 0x22a   :  { %3531 = vpow2.f32 %v350_v56 }
 0x22f   :  { %v4029_v57 = vpop.eup %3529 }
 0x230   :  { %v4031_v58 = vpop.eup %3531  ;;  %v674_v59 = vsel %vm218_vm1, %v4029_v57, 0.0 }
 0x231   :  { %675 = vadd.xlane.f32.xlu1 %v674_v59  ;;  %v361_v60 = vsel %vm218_vm1, %v4031_v58, 0.0 }
 0x232   :  { %362 = vadd.xlane.f32.xlu0 %v361_v60 }
 0x234   :  { %559 = vrot.lane.b32.xlu2 %v3970_v18, %s3867_s3 }
 0x23c   :  { %585 = vrot.lane.b32.xlu2 %v4002_v32, %s3868_s30 }
 0x23d   :  { %v3494_v61 = vpop.permute.xlu1 %3493 }
 0x23e   :  { %v3496_v62 = vunpack.i.h.bf16 %v3494_v61  ;;  %v3495_v63 = vunpack.i.l.bf16 %v3494_v61 }
 0x240   :  { %471 = vmatpush.msrb.mxu3 %v3495_v63 }
 0x242   :  { %523 = vmatpush.msra.mxu3 %v3496_v62 }
 0x244   :  { %954 = vrot.lane.b32.xlu2 %v3970_v18, %s3870_s10 }
 0x246   :  { %587 = vrot.lane.b32.xlu0 %v3974_v21, %s3867_s3 }
 0x24c   :  { %1010 = vrot.lane.b32.xlu2 %v3980_v25, %s3870_s10 }
 0x24e   :  { %815 = vrot.lane.b32.xlu0 %v3980_v25, %s3871_s11 }
 0x256   :  { %952 = vrot.lane.b32.xlu0 %v4010_v35, %s3872_s12 }
 0x25e   :  { %1008 = vrot.lane.b32.xlu0 %v3989_v27, %s3872_s12 }
 0x275   :  { %329 = vmax.xlane.f32.xlu2 %v328_v1 }
 0x288   :  { %335 = vmax.xlane.f32.xlu0 %v334_v3 }
 0x28d   :  { %476 = vrot.lane.b32.xlu2 %v3974_v21, %s3869_s9 }
 0x28f   :  { %v357_v4 = vpop.xlane.xlu2 %356 }
 0x290   :  { %3533 = vrcp.f32 %v357_v4  ;;  %v390_v8 = vand.u32 2147483648, %v357_v4  ;;  %v388_v10 = vand.u32 2147483647, %v357_v4  ;;  %vm384_vm3 = vweird.f32 %v357_v4 }
 0x292   :  { %v391_v13 = vor.u32 1.1754944e-38, %v390_v8  ;;  %vm389_vm5 = vcmp.eq.f32.partialorder %v388_v10, 8.507059e+37 }
 0x295   :  { %926 = vrot.lane.b32.xlu2 %v3966_v15, %s3870_s10 }
 0x296   :  { %v3534_v5 = vpop.eup %3533 }
 0x297   :  { %v380_v6 = vmul.f32 %v3534_v5, %v357_v4  ;;  %vm385_vm2 = vweird.f32 %v3534_v5  ;;  %v560_v19 = vpop.permute.xlu2 %559 }
 0x298   :  { %vm386_vm4 = vmor %vm384_vm3, %vm385_vm2 }
 0x299   :  { %v381_v7 = vsub.f32 1.0, %v380_v6 }
 0x29b   :  { %v382_v9 = vmul.f32 %v3534_v5, %v381_v7 }
 0x29d   :  { %v383_v12 = vadd.f32 %v3534_v5, %v382_v9 }
 0x29f   :  { %v387_v14 = vsel %vm386_vm4, %v3534_v5, %v383_v12  ;;  %v586_v37 = vpop.permute.xlu2 %585 }
 0x2a0   :  { %v392_v16 = vsel %vm389_vm5, %v391_v13, %v387_v14 }
 0x2a1   :  { %v393_v17 = vmul.f32 %v3528_v49, %v392_v16 }
 0x2a3   :  { %3351 = vmatmul.msk.f32.vlgmr.msrb.gmra.mxu3 %vm218_vm1, %v393_v17 }
 0x2a4   :  { %3356 = vmatpush.xpose.msk.msrb.mxu3 %vm218_vm1, %v560_v19  ;;  %v676_v20 = vpop.xlane.xlu1 %675 }
 0x2a5   :  { %3535 = vrcp.f32 %v676_v20  ;;  %v363_v23 = vpop.xlane.xlu0 %362  ;;  %v733_v48 = vand.u32 2147483648, %v676_v20  ;;  %vm727_vm11 = vweird.f32 %v676_v20  ;;  %v731_v50 = vand.u32 2147483647, %v676_v20 }
 0x2a6   :  { %3537 = vrcp.f32 %v363_v23  ;;  %v420_v39 = vand.u32 2147483648, %v363_v23  ;;  %v418_v41 = vand.u32 2147483647, %v363_v23  ;;  %vm414_vm7 = vweird.f32 %v363_v23 }
 0x2a7   :  { %v955_v52 = vpop.permute.xlu2 %954  ;;  %v734_v54 = vor.u32 1.1754944e-38, %v733_v48  ;;  %vm732_vm13 = vcmp.eq.f32.partialorder %v731_v50, 8.507059e+37 }
 0x2a8   :  { %v421_v44 = vor.u32 1.1754944e-38, %v420_v39  ;;  %vm419_vm9 = vcmp.eq.f32.partialorder %v418_v41, 8.507059e+37 }
 0x2ab   :  { %v3536_v24 = vpop.eup %3535 }
 0x2ac   :  { %v3538_v29 = vpop.eup %3537  ;;  %v723_v31 = vmul.f32 %v3536_v24, %v676_v20  ;;  %vm728_vm10 = vweird.f32 %v3536_v24 }
 0x2ad   :  { %v410_v34 = vmul.f32 %v3538_v29, %v363_v23  ;;  %vm415_vm6 = vweird.f32 %v3538_v29  ;;  %vm729_vm12 = vmor %vm727_vm11, %vm728_vm10 }
 0x2ae   :  { %v724_v36 = vsub.f32 1.0, %v723_v31  ;;  %vm416_vm8 = vmor %vm414_vm7, %vm415_vm6 }
 0x2af   :  { %v411_v38 = vsub.f32 1.0, %v410_v34 }
 0x2b0   :  { %v725_v42 = vmul.f32 %v3536_v24, %v724_v36 }
 0x2b1   :  { %v412_v40 = vmul.f32 %v3538_v29, %v411_v38 }
 0x2b2   :  { %v726_v46 = vadd.f32 %v3536_v24, %v725_v42 }
 0x2b3   :  { %v413_v43 = vadd.f32 %v3538_v29, %v412_v40 }
 0x2b4   :  { %v730_v53 = vsel %vm729_vm12, %v3536_v24, %v726_v46 }
 0x2b5   :  { %v417_v45 = vsel %vm416_vm8, %v3538_v29, %v413_v43  ;;  %v735_v55 = vsel %vm732_vm13, %v734_v54, %v730_v53 }
 0x2b6   :  { %v422_v47 = vsel %vm419_vm9, %v421_v44, %v417_v45  ;;  %v736_v59 = vmul.f32 %v4029_v57, %v735_v55 }
 0x2b7   :  { %v423_v49 = vmul.f32 %v4031_v58, %v422_v47  ;;  %v1011_v58 = vpop.permute.xlu2 %1010 }
 0x2b8   :  { %v588_v51 = vpop.permute.xlu0 %587 }
 0x2b9   :  { %3353 = vmatmul.msk.f32.vlgmr.msra.gmra.mxu3 %vm218_vm1, %v423_v49  ;;  %3358 = vmatpush.xpose.msk.msra.mxu0 %vm218_vm1, %v588_v51 }
 0x2bc   :  { %3359 = vmatmul.msk.f32.vlgmr.msra.gmra.mxu0 %vm218_vm1, %v586_v37 }
 0x2c0   :  { %v816_v56 = vpop.permute.xlu0 %815 }
 0x2c1   :  { %3357 = vmatmul.msk.f32.vlgmr.msrb.gmra.mxu3 %vm218_vm1, %v558_v11  ;;  %836 = vmatpush.msra.mxu1 %v816_v56 }
 0x2c2   :  { %3365 = vmatmul.msk.f32.vlgmr.msra.gmra.mxu1 %vm218_vm1, %v736_v59 }
 0x2c3   :  { %3376 = vmatpush.xpose.msk.msrb.mxu1 %vm218_vm1, %v955_v52 }
 0x2c7   :  { %3380 = vmatpush.xpose.msk.msra.mxu1 %vm218_vm1, %v1011_v58 }
 0x2c8   :  { %v953_v60 = vpop.permute.xlu0 %952 }
 0x2ca   :  { %3377 = vmatmul.msk.f32.vlgmr.msrb.gmra.mxu1 %vm218_vm1, %v953_v60 }
 0x2d0   :  { %v1009_v61 = vpop.permute.xlu0 %1008 }
 0x2d2   :  { %3381 = vmatmul.msk.f32.vlgmr.msra.gmra.mxu1 %vm218_vm1, %v1009_v61 }
 0x2e8   :  { %v330_v62 = vpop.xlane.xlu2 %329 }
 0x2e9   :  { %v340_v63 = vsub.f32 %v4053_v0, %v330_v62 }
 0x2eb   :  { %v344_v57 = vmul.f32 1.442695, %v340_v63 }
 0x2ed   :  { %3539 = vpow2.f32 %v344_v57 }
 0x2f0   :  { %v477_v42 = vpop.permute.xlu2 %476 }
 0x2f3   :  { %v3540_v1 = vpop.eup %3539 }
 0x2f4   :  { %v352_v3 = vsel %vm218_vm1, %v3540_v1, 0.0 }
 0x2f5   :  { %353 = vadd.xlane.f32.xlu1 %v352_v3 }
 0x2f8   :  { %v927_v58 = vpop.permute.xlu2 %926 }
 0x2fb   :  { %v336_v4 = vpop.xlane.xlu0 %335 }
 0x2fc   :  { %v342_v5 = vsub.f32 %v4057_v2, %v336_v4 }
 0x2fe   :  { %v348_v6 = vmul.f32 1.442695, %v342_v5 }
 0x300   :  { %3541 = vpow2.f32 %v348_v6 }
 0x306   :  { %v3542_v7 = vpop.eup %3541 }
 0x307   :  { %v358_v8 = vsel %vm218_vm1, %v3542_v7, 0.0 }
 0x308   :  { %359 = vadd.xlane.f32.xlu1 %v358_v8 }
 0x321   :  { %424 = vrot.lane.b32.xlu1 %v3966_v15, %s3869_s9 }
 0x326   :  { %v4094_v53 = vpop.f32.mrf.mxu3 }
 0x339   :  { %v610_v9 = vpop.f32.mrf.mxu0 }
 0x33a   :  { %v647_v0 = vsel %vm218_vm1, %v610_v9, -inf }
 0x33c   :  { %v4097_v56 = vpop.f32.mrf.mxu3 }
 0x33f   :  { %v4091_v50 = vpop.f32.mrf.mxu1 }
 0x344   :  { %v582_v62 = vpop.f32.mrf.mxu3 }
 0x345   :  { %v644_v63 = vsel %vm218_vm1, %v582_v62, -inf }
 0x347   :  { %v977_v54 = vpop.f32.mrf.mxu1 }
 0x348   :  { %v1039_v55 = vsel %vm218_vm1, %v977_v54, -inf }
 0x34b   :  { %648 = vmax.xlane.f32.xlu1 %v647_v0 }
 0x34f   :  { %v1033_v60 = vpop.f32.mrf.mxu1 }
 0x350   :  { %v1045_v61 = vsel %vm218_vm1, %v1033_v60, -inf }
 0x364   :  { %789 = vrot.lane.b32.xlu1 %v3974_v21, %s3871_s11 }
 0x368   :  { %v354_v2 = vpop.xlane.xlu1 %353 }
 0x369   :  { %3543 = vrcp.f32 %v354_v2  ;;  %v375_v23 = vand.u32 2147483648, %v354_v2  ;;  %vm369_vm15 = vweird.f32 %v354_v2  ;;  %v373_v24 = vand.u32 2147483647, %v354_v2 }
 0x36b   :  { %v376_v34 = vor.u32 1.1754944e-38, %v375_v23  ;;  %vm374_vm3 = vcmp.eq.f32.partialorder %v373_v24, 8.507059e+37 }
 0x36c   :  { %924 = vrot.lane.b32.xlu1 %v3996_v30, %s3872_s12 }
 0x36f   :  { %v3544_v10 = vpop.eup %3543 }
 0x370   :  { %v365_v12 = vmul.f32 %v3544_v10, %v354_v2  ;;  %vm370_vm14 = vweird.f32 %v3544_v10 }
 0x371   :  { %vm371_vm2 = vmor %vm369_vm15, %vm370_vm14 }
 0x372   :  { %v366_v13 = vsub.f32 1.0, %v365_v12 }
 0x374   :  { %v367_v16 = vmul.f32 %v3544_v10, %v366_v13 }
 0x376   :  { %v368_v19 = vadd.f32 %v3544_v10, %v367_v16 }
 0x378   :  { %v372_v29 = vsel %vm371_vm2, %v3544_v10, %v368_v19 }
 0x379   :  { %v377_v36 = vsel %vm374_vm3, %v376_v34, %v372_v29 }
 0x37a   :  { %v378_v41 = vmul.f32 %v3540_v1, %v377_v36 }
 0x37b   :  { %v360_v11 = vpop.xlane.xlu1 %359 }
 0x37c   :  { %3545 = vrcp.f32 %v360_v11  ;;  %v405_v38 = vand.u32 2147483648, %v360_v11  ;;  %vm399_vm5 = vweird.f32 %v360_v11  ;;  %v403_v39 = vand.u32 2147483647, %v360_v11 }
 0x37e   :  { %v406_v44 = vor.u32 1.1754944e-38, %v405_v38  ;;  %vm404_vm7 = vcmp.eq.f32.partialorder %v403_v39, 8.507059e+37 }
 0x382   :  { %v3546_v14 = vpop.eup %3545 }
 0x383   :  { %v395_v17 = vmul.f32 %v3546_v14, %v360_v11  ;;  %vm400_vm4 = vweird.f32 %v3546_v14 }
 0x384   :  { %vm401_vm6 = vmor %vm399_vm5, %vm400_vm4 }
 0x385   :  { %v396_v20 = vsub.f32 1.0, %v395_v17 }
 0x387   :  { %v397_v31 = vmul.f32 %v3546_v14, %v396_v20 }
 0x389   :  { %v398_v37 = vadd.f32 %v3546_v14, %v397_v31 }
 0x38b   :  { %v402_v43 = vsel %vm401_vm6, %v3546_v14, %v398_v37 }
 0x38c   :  { %v407_v45 = vsel %vm404_vm7, %v406_v44, %v402_v43 }
 0x38d   :  { %v408_v46 = vmul.f32 %v3542_v7, %v407_v45 }
 0x393   :  { %v425_v40 = vpop.permute.xlu1 %424 }
 0x394   :  { %445 = vmatpush.msra.mxu2 %v425_v40  ;;  %v528_v40 = vld [vmem:[#allocation8] sm:$0xff] }
 0x395   :  { %3350 = vmatmul.msk.f32.vlgmr.msra.gmra.mxu2 %vm218_vm1, %v378_v41 }
 0x396   :  { %497 = vmatpush.msrb.mxu2 %v477_v42 }
 0x39d   :  { %3352 = vmatmul.msk.f32.vlgmr.msrb.gmra.mxu2 %vm218_vm1, %v408_v46 }
 0x3be   :  { %v649_v47 = vpop.xlane.xlu1 %648 }
 0x3bf   :  { %v655_v48 = vsub.f32 %v610_v9, %v649_v47 }
 0x3c1   :  { %v661_v49 = vmul.f32 1.442695, %v655_v48 }
 0x3c3   :  { %3547 = vpow2.f32 %v661_v49 }
 0x3c9   :  { %v3548_v51 = vpop.eup %3547 }
 0x3ca   :  { %v671_v52 = vsel %vm218_vm1, %v3548_v51, 0.0 }
 0x3cb   :  { %672 = vadd.xlane.f32.xlu0 %v671_v52 }
 0x3d3   :  { %1040 = vmax.xlane.f32.xlu0 %v1039_v55 }
 0x3d6   :  { %v790_v59 = vpop.permute.xlu1 %789 }
 0x3d7   :  { %810 = vmatpush.msrb.mxu0 %v790_v59 }
 0x3d9   :  { %3374 = vmatpush.xpose.msk.msra.mxu0 %vm218_vm1, %v927_v58 }
 0x3db   :  { %1046 = vmax.xlane.f32.xlu0 %v1045_v61 }
 0x3de   :  { %v925_v31 = vpop.permute.xlu1 %924 }
 0x3e3   :  { %645 = vmax.xlane.f32.xlu0 %v644_v63 }
 0x3f7   :  { %763 = vrot.lane.b32.xlu0 %v3970_v18, %s3871_s11 }
 0x43e   :  { %v673_v57 = vpop.xlane.xlu0 %672 }
 0x43f   :  { %3549 = vrcp.f32 %v673_v57  ;;  %v718_v7 = vand.u32 2147483648, %v673_v57  ;;  %v716_v0 = vand.u32 2147483647, %v673_v57  ;;  %vm712_vm9 = vweird.f32 %v673_v57 }
 0x441   :  { %v719_v10 = vor.u32 1.1754944e-38, %v718_v7  ;;  %vm717_vm11 = vcmp.eq.f32.partialorder %v716_v0, 8.507059e+37 }
 0x445   :  { %v3550_v1 = vpop.eup %3549 }
 0x446   :  { %v708_v3 = vmul.f32 %v3550_v1, %v673_v57  ;;  %v1041_v4 = vpop.xlane.xlu0 %1040  ;;  %vm713_vm8 = vweird.f32 %v3550_v1 }
 0x447   :  { %v1049_v5 = vsub.f32 %v977_v54, %v1041_v4  ;;  %vm714_vm10 = vmor %vm712_vm9, %vm713_vm8 }
 0x448   :  { %v709_v6 = vsub.f32 1.0, %v708_v3 }
 0x449   :  { %v1054_v8 = vmul.f32 1.442695, %v1049_v5 }
 0x44a   :  { %v710_v9 = vmul.f32 %v3550_v1, %v709_v6 }
 0x44b   :  { %3551 = vpow2.f32 %v1054_v8 }
 0x44c   :  { %v711_v2 = vadd.f32 %v3550_v1, %v710_v9 }
 0x44e   :  { %v715_v11 = vsel %vm714_vm10, %v3550_v1, %v711_v2  ;;  %v1047_v12 = vpop.xlane.xlu0 %1046 }
 0x44f   :  { %v720_v13 = vsel %vm717_vm11, %v719_v10, %v715_v11  ;;  %v1051_v14 = vsub.f32 %v1033_v60, %v1047_v12 }
 0x450   :  { %v721_v16 = vmul.f32 %v3548_v51, %v720_v13 }
 0x451   :  { %v4104_v17 = vpop.eup %3551  ;;  %v1058_v19 = vmul.f32 1.442695, %v1051_v14 }
 0x452   :  { %3364 = vmatmul.msk.f32.vlgmr.msrb.gmra.mxu0 %vm218_vm1, %v721_v16  ;;  %v1063_v20 = vsel %vm218_vm1, %v4104_v17, 0.0 }
 0x453   :  { %3553 = vpow2.f32 %v1058_v19  ;;  %1064 = vadd.xlane.f32.xlu1 %v1063_v20 }
 0x456   :  { %v646_v23 = vpop.xlane.xlu0 %645 }
 0x457   :  { %v654_v24 = vsub.f32 %v582_v62, %v646_v23 }
 0x459   :  { %v4109_v29 = vpop.eup %3553  ;;  %v659_v34 = vmul.f32 1.442695, %v654_v24 }
 0x45a   :  { %3375 = vmatmul.msk.f32.vlgmr.msra.gmra.mxu0 %vm218_vm1, %v925_v31  ;;  %v1069_v36 = vsel %vm218_vm1, %v4109_v29, 0.0 }
 0x45b   :  { %3555 = vpow2.f32 %v659_v34  ;;  %1070 = vadd.xlane.f32.xlu0 %v1069_v36  ;;  %v447_v36 = vpop.f32.mrf.mxu2 }
 0x461   :  { %v4114_v37 = vpop.eup %3555 }
 0x462   :  { %v668_v38 = vsel %vm218_vm1, %v4114_v37, 0.0 }
 0x463   :  { %669 = vadd.xlane.f32.xlu2 %v668_v38 }
 0x469   :  { %v764_v39 = vpop.permute.xlu0 %763 }
 0x46a   :  { %784 = vmatpush.msra.mxu3 %v764_v39 }
 0x46c   :  { %982 = vrot.lane.b32.xlu1 %v3974_v21, %s3870_s10  ;;  %910 = vmatpush.msrb.mxu3 %v528_v40 }
 0x46f   :  { %1210 = vrot.lane.b32.xlu0 %v3980_v25, %s3873_s15 }
 0x474   :  { %1284 = vrot.lane.b32.xlu1 %v3966_v15, %s3874_s16 }
 0x477   :  { %1366 = vrot.lane.b32.xlu0 %v3989_v27, %s3875_s17 }
 0x47b   :  { %1158 = vrot.lane.b32.xlu2 %v3970_v18, %s3873_s15 }
 0x47c   :  { %1282 = vrot.lane.b32.xlu1 %v3996_v30, %s3875_s17 }
 0x47f   :  { %529 = vrot.lane.b32.xlu0 %v3996_v30, %s3868_s30 }
 0x483   :  { %980 = vrot.lane.b32.xlu2 %v4002_v32, %s3872_s12 }
 0x484   :  { %1368 = vrot.lane.b32.xlu1 %v3980_v25, %s3874_s16 }
 0x48b   :  { %1340 = vrot.lane.b32.xlu2 %v3974_v21, %s3874_s16 }
 0x48c   :  { %531 = vrot.lane.b32.xlu1 %v3966_v15, %s3867_s3 }
 0x493   :  { %1338 = vrot.lane.b32.xlu2 %v4002_v32, %s3875_s17 }
 0x4c6   :  { %v1065_v27 = vpop.xlane.xlu1 %1064 }
 0x4c7   :  { %3557 = vrcp.f32 %v1065_v27  ;;  %v1098_v48 = vand.u32 2147483648, %v1065_v27  ;;  %vm1092_vm13 = vweird.f32 %v1065_v27  ;;  %v1096_v49 = vand.u32 2147483647, %v1065_v27 }
 0x4c9   :  { %v1099_v58 = vor.u32 1.1754944e-38, %v1098_v48  ;;  %vm1097_vm15 = vcmp.eq.f32.partialorder %v1096_v49, 8.507059e+37 }
 0x4cd   :  { %v3558_v30 = vpop.eup %3557 }
 0x4ce   :  { %v1088_v41 = vmul.f32 %v3558_v30, %v1065_v27  ;;  %v1071_v42 = vpop.xlane.xlu0 %1070  ;;  %vm1093_vm12 = vweird.f32 %v3558_v30  ;;  %v499_v27 = vpop.f32.mrf.mxu2 }
 0x4cf   :  { %3559 = vrcp.f32 %v1071_v42  ;;  %v4142_v43 = vpop.f32.mrf.mxu0  ;;  %vm1094_vm14 = vmor %vm1092_vm13, %vm1093_vm12  ;;  %v1128_v57 = vand.u32 2147483648, %v1071_v42  ;;  %vm1122_vm3 = vweird.f32 %v1071_v42  ;;  %v1126_v1 = vand.u32 2147483647, %v1071_v42 }
 0x4d0   :  { %v1089_v44 = vsub.f32 1.0, %v1088_v41 }
 0x4d1   :  { %v1129_v9 = vor.u32 1.1754944e-38, %v1128_v57  ;;  %vm1127_vm5 = vcmp.eq.f32.partialorder %v1126_v1, 8.507059e+37 }
 0x4d2   :  { %v1090_v45 = vmul.f32 %v3558_v30, %v1089_v44 }
 0x4d4   :  { %v1091_v46 = vadd.f32 %v3558_v30, %v1090_v45 }
 0x4d5   :  { %v3560_v47 = vpop.eup %3559 }
 0x4d6   :  { %v1118_v51 = vmul.f32 %v3560_v47, %v1071_v42  ;;  %v670_v32 = vpop.xlane.xlu2 %669  ;;  %v1095_v54 = vsel %vm1094_vm14, %v3558_v30, %v1091_v46  ;;  %vm1123_vm2 = vweird.f32 %v3560_v47 }
 0x4d7   :  { %3561 = vrcp.f32 %v670_v32  ;;  %v4144_v52 = vpop.f32.mrf.mxu0  ;;  %v1100_v61 = vsel %vm1097_vm15, %v1099_v58, %v1095_v54  ;;  %vm1124_vm4 = vmor %vm1122_vm3, %vm1123_vm2  ;;  %v703_v0 = vand.u32 2147483648, %v670_v32  ;;  %v701_v11 = vand.u32 2147483647, %v670_v32 }
 0x4d8   :  { %v1119_v55 = vsub.f32 1.0, %v1118_v51  ;;  %v1036_v59 = vsel %vm218_vm1, %v4144_v52, -inf  ;;  %v1101_v6 = vmul.f32 %v4104_v17, %v1100_v61  ;;  %vm697_vm7 = vweird.f32 %v670_v32 }
 0x4d9   :  { %1037 = vmax.xlane.f32.xlu2 %v1036_v59  ;;  %v704_v14 = vor.u32 1.1754944e-38, %v703_v0  ;;  %vm702_vm9 = vcmp.eq.f32.partialorder %v701_v11, 8.507059e+37  ;;  %v3497_v51 = vpack.i.bf16 %v3974_v21, %v3966_v15 }
 0x4da   :  { %v1120_v60 = vmul.f32 %v3560_v47, %v1119_v55 }
 0x4dc   :  { %v1121_v62 = vadd.f32 %v3560_v47, %v1120_v60 }
 0x4dd   :  { %v3562_v63 = vpop.eup %3561 }
 0x4de   :  { %v693_v3 = vmul.f32 %v3562_v63, %v670_v32  ;;  %v1159_v4 = vpop.permute.xlu2 %1158  ;;  %v983_v5 = vpop.permute.xlu1 %982  ;;  %v1125_v7 = vsel %vm1124_vm4, %v3560_v47, %v1121_v62  ;;  %vm698_vm6 = vweird.f32 %v3562_v63 }
 0x4df   :  { %3378 = vmatpush.xpose.msk.msrb.mxu0 %vm218_vm1, %v983_v5  ;;  %1179 = vmatpush.msrb.mxu1 %v1159_v4  ;;  %v1130_v12 = vsel %vm1127_vm5, %v1129_v9, %v1125_v7  ;;  %vm699_vm8 = vmor %vm697_vm7, %vm698_vm6 }
 0x4e0   :  { %v694_v8 = vsub.f32 1.0, %v693_v3  ;;  %3383 = vmatmul.msk.f32.vlgmr.msrb.gmra.mxu1 %vm218_vm1, %v1101_v6  ;;  %v1131_v20 = vmul.f32 %v4109_v29, %v1130_v12 }
 0x4e1   :  { %v1211_v2 = vpop.permute.xlu0 %1210 }
 0x4e2   :  { %v695_v10 = vmul.f32 %v3562_v63, %v694_v8  ;;  %1231 = vmatpush.msra.mxu1 %v1211_v2 }
 0x4e4   :  { %v696_v13 = vadd.f32 %v3562_v63, %v695_v10 }
 0x4e6   :  { %v700_v16 = vsel %vm699_vm8, %v3562_v63, %v696_v13  ;;  %v981_v17 = vpop.permute.xlu2 %980  ;;  %v1285_v19 = vpop.permute.xlu1 %1284 }
 0x4e7   :  { %v705_v23 = vsel %vm702_vm9, %v704_v14, %v700_v16  ;;  %3379 = vmatmul.msk.f32.vlgmr.msrb.gmra.mxu0 %vm218_vm1, %v981_v17 }
 0x4e8   :  { %3385 = vmatmul.msk.f32.vlgmr.msra.gmra.mxu1 %vm218_vm1, %v1131_v20  ;;  %v706_v24 = vmul.f32 %v4114_v37, %v705_v23 }
 0x4e9   :  { %v1367_v39 = vpop.permute.xlu0 %1366 }
 0x4ea   :  { %3363 = vmatmul.msk.f32.vlgmr.msra.gmra.mxu3 %vm218_vm1, %v706_v24 }
 0x4eb   :  { %3390 = vmatpush.xpose.msk.msra.mxu3 %vm218_vm1, %v1285_v19 }
 0x4ee   :  { %v1341_v31 = vpop.permute.xlu2 %1340  ;;  %v1283_v34 = vpop.permute.xlu1 %1282 }
 0x4ef   :  { %3394 = vmatpush.xpose.msk.msrb.mxu1 %vm218_vm1, %v1341_v31 }
 0x4f1   :  { %v530_v40 = vpop.permute.xlu0 %529 }
 0x4f2   :  { %3370 = vmatmul.msk.f32.vlgmr.msrb.gmra.mxu3 %vm218_vm1, %v447_v36 }
 0x4f6   :  { %v1339_v38 = vpop.permute.xlu2 %1338  ;;  %v1369_v29 = vpop.permute.xlu1 %1368 }
 0x4f7   :  { %3395 = vmatmul.msk.f32.vlgmr.msrb.gmra.mxu1 %vm218_vm1, %v1339_v38  ;;  %3396 = vmatpush.xpose.msk.msrb.mxu3 %vm218_vm1, %v1369_v29 }
 0x4fa   :  { %3371 = vmatmul.msk.f32.gmra.mxu3 %vm218_vm1, %v4094_v53 }
 0x4fe   :  { %v532_v37 = vpop.permute.xlu1 %531 }
 0x4ff   :  { %3354 = vmatpush.xpose.msk.msra.mxu2 %vm218_vm1, %v532_v37 }
 0x502   :  { %3355 = vmatmul.msk.f32.vlgmr.msra.gmra.mxu2 %vm218_vm1, %v530_v40  ;;  %3372 = vmatmul.msk.f32.gmra.mxu3 %vm218_vm1, %v499_v27 }
 0x50a   :  { %3373 = vmatmul.msk.f32.gmra.mxu3 %vm218_vm1, %v4097_v56 }
 0x512   :  { %3391 = vmatmul.msk.f32.vlgmr.msra.gmra.mxu3 %vm218_vm1, %v1283_v34 }
 0x51a   :  { %3397 = vmatmul.msk.f32.vlgmr.msrb.gmra.mxu3 %vm218_vm1, %v1367_v39 }
 0x54c   :  { %v1038_v30 = vpop.xlane.xlu2 %1037 }
 0x54d   :  { %v1048_v41 = vsub.f32 %v4144_v52, %v1038_v30 }
 0x54f   :  { %v1052_v53 = vmul.f32 1.442695, %v1048_v41 }
 0x551   :  { %3563 = vpow2.f32 %v1052_v53 }
 0x557   :  { %v3564_v45 = vpop.eup %3563 }
 0x558   :  { %v1060_v47 = vsel %vm218_vm1, %v3564_v45, 0.0 }
 0x55d   :  { %v4201_v58 = vpop.f32.mrf.mxu1 }
 0x564   :  { %v1005_v42 = vpop.f32.mrf.mxu0 }
 0x565   :  { %v1042_v44 = vsel %vm218_vm1, %v1005_v42, -inf  ;;  %v4203_v57 = vpop.f32.mrf.mxu1 }
 0x566   :  { %1043 = vmax.xlane.f32.xlu1 %v1042_v44 }
 0x56d   :  { %v4172_v46 = vpop.f32.mrf.mxu3 }
 0x56e   :  { %1061 = vadd.xlane.f32.xlu1 %v1060_v47 }
 0x574   :  { %v1363_v6 = vpop.f32.mrf.mxu1 }
 0x575   :  { %v4175_v56 = vpop.f32.mrf.mxu3  ;;  %v1400_v9 = vsel %vm218_vm1, %v1363_v6, -inf }
 0x57d   :  { %v4177_v48 = vpop.f32.mrf.mxu3 }
 0x585   :  { %v4179_v49 = vpop.f32.mrf.mxu3 }
 0x587   :  { %3498 = vrot.lane.b32.xlu1 %v3497_v51, %s3873_s15 }
 0x58d   :  { %v4184_v32 = vpop.f32.mrf.mxu3 }
 0x58f   :  { %1542 = vrot.lane.b32.xlu1 %v3974_v21, %s3876_s18 }
 0x595   :  { %v1307_v52 = vpop.f32.mrf.mxu3 }
 0x596   :  { %v1394_v54 = vsel %vm218_vm1, %v1307_v52, -inf }
 0x597   :  { %1568 = vrot.lane.b32.xlu1 %v3980_v25, %s3876_s18  ;;  %1395 = vmax.xlane.f32.xlu2 %v1394_v54 }
 0x59d   :  { %v4191_v55 = vpop.f32.mrf.mxu3 }
 0x59e   :  { %v1403_v59 = vsel %vm218_vm1, %v4191_v55, -inf }
 0x59f   :  { %1650 = vrot.lane.b32.xlu1 %v3993_v28, %s3866_s29  ;;  %1404 = vmax.xlane.f32.xlu2 %v1403_v59 }
 0x5a7   :  { %1734 = vrot.lane.b32.xlu1 %v3986_v26, %s3866_s29 }
 0x5af   :  { %737 = vrot.lane.b32.xlu1 %v3966_v15, %s3871_s11 }
 0x5d9   :  { %v1044_v60 = vpop.xlane.xlu1 %1043 }
 0x5da   :  { %v1050_v61 = vsub.f32 %v1005_v42, %v1044_v60 }
 0x5dc   :  { %v1056_v62 = vmul.f32 1.442695, %v1050_v61 }
 0x5de   :  { %3565 = vpow2.f32 %v1056_v62 }
 0x5e1   :  { %v1062_v63 = vpop.xlane.xlu1 %1061 }
 0x5e2   :  { %3567 = vrcp.f32 %v1062_v63  ;;  %v1083_v2 = vand.u32 2147483648, %v1062_v63  ;;  %vm1077_vm11 = vweird.f32 %v1062_v63  ;;  %v1081_v10 = vand.u32 2147483647, %v1062_v63 }
 0x5e4   :  { %v4205_v1 = vpop.eup %3565  ;;  %v1084_v12 = vor.u32 1.1754944e-38, %v1083_v2  ;;  %vm1082_vm13 = vcmp.eq.f32.partialorder %v1081_v10, 8.507059e+37  ;;  %v4240_v2 = vld [vmem:[#allocation8 + $0x18] sm:$0xff] }
 0x5e5   :  { %v1066_v3 = vsel %vm218_vm1, %v4205_v1, 0.0 }
 0x5e6   :  { %1067 = vadd.xlane.f32.xlu0 %v1066_v3 }
 0x5e8   :  { %v3568_v4 = vpop.eup %3567 }
 0x5e9   :  { %v1073_v5 = vmul.f32 %v3568_v4, %v1062_v63  ;;  %vm1078_vm10 = vweird.f32 %v3568_v4 }
 0x5ea   :  { %vm1079_vm12 = vmor %vm1077_vm11, %vm1078_vm10 }
 0x5eb   :  { %v1074_v7 = vsub.f32 1.0, %v1073_v5 }
 0x5ed   :  { %v1075_v8 = vmul.f32 %v3568_v4, %v1074_v7 }
 0x5ee   :  { %1401 = vmax.xlane.f32.xlu0 %v1400_v9  ;;  %v4236_v9 = vpop.f32.mrf.mxu2 }
 0x5ef   :  { %v1076_v0 = vadd.f32 %v3568_v4, %v1075_v8 }
 0x5f1   :  { %v1080_v11 = vsel %vm1079_vm12, %v3568_v4, %v1076_v0  ;;  %v641_v0 = vsel %vm218_vm1, %v4236_v9, -inf }
 0x5f2   :  { %v1085_v13 = vsel %vm1082_vm13, %v1084_v12, %v1080_v11 }
 0x5f3   :  { %v1086_v19 = vmul.f32 %v3564_v45, %v1085_v13 }
 0x5f9   :  { %v3499_v14 = vpop.permute.xlu1 %3498 }
 0x5fa   :  { %v3501_v16 = vunpack.i.h.bf16 %v3499_v14  ;;  %v3500_v17 = vunpack.i.l.bf16 %v3499_v14 }
 0x5fc   :  { %1153 = vmatpush.msra.mxu0 %v3500_v17 }
 0x5fd   :  { %3382 = vmatmul.msk.f32.vlgmr.msra.gmra.mxu0 %vm218_vm1, %v1086_v19 }
 0x5fe   :  { %1205 = vmatpush.msrb.mxu0 %v3501_v16 }
 0x601   :  { %v1543_v20 = vpop.permute.xlu1 %1542 }
 0x602   :  { %1312 = vrot.lane.b32.xlu0 %v3970_v18, %s3874_s16  ;;  %1563 = vmatpush.msra.mxu3 %v1543_v20 }
 0x604   :  { %3470 = vmatpush.msrb.mxu3 %v4240_v2 }
 0x609   :  { %v4213_v23 = vpop.permute.xlu1 %1568 }
 0x60a   :  { %v1396_v31 = vpop.xlane.xlu2 %1395 }
 0x60b   :  { %v1406_v36 = vsub.f32 %v1307_v52, %v1396_v31 }
 0x60d   :  { %v1410_v38 = vmul.f32 1.442695, %v1406_v36 }
 0x60f   :  { %3569 = vpow2.f32 %v1410_v38 }
 0x611   :  { %v4215_v24 = vpop.permute.xlu1 %1650 }
 0x612   :  { %v1405_v30 = vpop.xlane.xlu2 %1404 }
 0x613   :  { %v1409_v45 = vsub.f32 %v4191_v55, %v1405_v30 }
 0x615   :  { %v4219_v39 = vpop.eup %3569  ;;  %v1416_v60 = vmul.f32 1.442695, %v1409_v45 }
 0x616   :  { %v1418_v37 = vsel %vm218_vm1, %v4219_v39, 0.0 }
 0x619   :  { %v4217_v34 = vpop.permute.xlu1 %1734 }
 0x621   :  { %v738_v29 = vpop.permute.xlu1 %737 }
 0x622   :  { %758 = vmatpush.msrb.mxu2 %v738_v29 }
 0x62c   :  { %1419 = vadd.xlane.f32.xlu0 %v1418_v37 }
 0x640   :  { %1490 = vrot.lane.b32.xlu0 %v3966_v15, %s3876_s18 }
 0x659   :  { %v1068_v27 = vpop.xlane.xlu0 %1067 }
 0x65a   :  { %3571 = vrcp.f32 %v1068_v27  ;;  %v1113_v47 = vand.u32 2147483648, %v1068_v27  ;;  %v1111_v54 = vand.u32 2147483647, %v1068_v27  ;;  %vm1107_vm15 = vweird.f32 %v1068_v27 }
 0x65c   :  { %v1114_v61 = vor.u32 1.1754944e-38, %v1113_v47  ;;  %vm1112_vm3 = vcmp.eq.f32.partialorder %v1111_v54, 8.507059e+37 }
 0x660   :  { %v3572_v40 = vpop.eup %3571 }
 0x661   :  { %v1103_v41 = vmul.f32 %v3572_v40, %v1068_v27  ;;  %v1402_v53 = vpop.xlane.xlu0 %1401  ;;  %vm1108_vm14 = vweird.f32 %v3572_v40 }
 0x662   :  { %v1408_v42 = vsub.f32 %v1363_v6, %v1402_v53  ;;  %vm1109_vm2 = vmor %vm1107_vm15, %vm1108_vm14 }
 0x663   :  { %v1104_v44 = vsub.f32 1.0, %v1103_v41 }
 0x664   :  { %v1414_v51 = vmul.f32 1.442695, %v1408_v42 }
 0x665   :  { %v1105_v52 = vmul.f32 %v3572_v40, %v1104_v44 }
 0x666   :  { %3573 = vpow2.f32 %v1414_v51 }
 0x667   :  { %v1106_v59 = vadd.f32 %v3572_v40, %v1105_v52  ;;  %3575 = vpow2.f32 %v1416_v60 }
 0x669   :  { %v1110_v62 = vsel %vm1109_vm2, %v3572_v40, %v1106_v59 }
 0x66a   :  { %v1115_v63 = vsel %vm1112_vm3, %v1114_v61, %v1110_v62 }
 0x66b   :  { %v1116_v3 = vmul.f32 %v4205_v1, %v1115_v63 }
 0x66c   :  { %v3574_v4 = vpop.eup %3573 }
 0x66d   :  { %3384 = vmatmul.msk.f32.vlgmr.msrb.gmra.mxu0 %vm218_vm1, %v1116_v3  ;;  %v1424_v55 = vsel %vm218_vm1, %v3574_v4, 0.0  ;;  %v4229_v5 = vpop.eup %3575 }
 0x66e   :  { %1425 = vadd.xlane.f32.xlu2 %v1424_v55  ;;  %v1427_v7 = vsel %vm218_vm1, %v4229_v5, 0.0 }
 0x674   :  { %v1313_v6 = vpop.permute.xlu0 %1312 }
 0x675   :  { %3392 = vmatpush.xpose.msk.msra.mxu0 %vm218_vm1, %v1313_v6 }
 0x676   :  { %1428 = vadd.xlane.f32.xlu2 %v1427_v7 }
 0x68e   :  { %1310 = vrot.lane.b32.xlu2 %v4010_v35, %s3875_s17 }
 0x69f   :  { %v1420_v1 = vpop.xlane.xlu0 %1419 }
 0x6a0   :  { %3577 = vrcp.f32 %v1420_v1  ;;  %v1441_v29 = vand.u32 2147483648, %v1420_v1  ;;  %vm1435_vm7 = vweird.f32 %v1420_v1  ;;  %v1439_v40 = vand.u32 2147483647, %v1420_v1 }
 0x6a2   :  { %v1442_v47 = vor.u32 1.1754944e-38, %v1441_v29  ;;  %vm1440_vm11 = vcmp.eq.f32.partialorder %v1439_v40, 8.507059e+37 }
 0x6a6   :  { %v3578_v10 = vpop.eup %3577 }
 0x6a7   :  { %v1431_v12 = vmul.f32 %v3578_v10, %v1420_v1  ;;  %vm1436_vm5 = vweird.f32 %v3578_v10 }
 0x6a8   :  { %vm1437_vm9 = vmor %vm1435_vm7, %vm1436_vm5 }
 0x6a9   :  { %v1432_v13 = vsub.f32 1.0, %v1431_v12 }
 0x6ab   :  { %v1433_v17 = vmul.f32 %v3578_v10, %v1432_v13  ;;  %v4268_v13 = vmul.f32 0.35355338, %v3966_v15 }
 0x6ad   :  { %v1434_v38 = vadd.f32 %v3578_v10, %v1433_v17 }
 0x6af   :  { %v1438_v44 = vsel %vm1437_vm9, %v3578_v10, %v1434_v38 }
 0x6b0   :  { %v1443_v54 = vsel %vm1440_vm11, %v1442_v47, %v1438_v44 }
 0x6b1   :  { %v1444_v63 = vmul.f32 %v4219_v39, %v1443_v54  ;;  %v4256_v39 = vpop.f32.mrf.mxu0 }
 0x6b2   :  { %v1491_v8 = vpop.permute.xlu0 %1490 }
 0x6b3   :  { %1511 = vmatpush.msrb.mxu0 %v1491_v8 }
 0x6b7   :  { %642 = vmax.xlane.f32.xlu2 %v641_v0 }
 0x6e1   :  { %v1426_v11 = vpop.xlane.xlu2 %1425 }
 0x6e2   :  { %3579 = vrcp.f32 %v1426_v11  ;;  %v1471_v20 = vand.u32 2147483648, %v1426_v11  ;;  %v1469_v36 = vand.u32 2147483647, %v1426_v11  ;;  %vm1465_vm6 = vweird.f32 %v1426_v11 }
 0x6e4   :  { %v1472_v30 = vor.u32 1.1754944e-38, %v1471_v20  ;;  %vm1470_vm10 = vcmp.eq.f32.partialorder %v1469_v36, 8.507059e+37 }
 0x6e8   :  { %v3580_v35 = vpop.eup %3579 }
 0x6e9   :  { %v1461_v14 = vmul.f32 %v3580_v35, %v1426_v11  ;;  %v1429_v16 = vpop.xlane.xlu2 %1428  ;;  %vm1466_vm4 = vweird.f32 %v3580_v35 }
 0x6ea   :  { %3581 = vrcp.f32 %v1429_v16  ;;  %vm1467_vm8 = vmor %vm1465_vm6, %vm1466_vm4  ;;  %v1486_v61 = vand.u32 2147483648, %v1429_v16  ;;  %vm1480_vm13 = vweird.f32 %v1429_v16  ;;  %v1484_v62 = vand.u32 2147483647, %v1429_v16  ;;  %v4258_v0 = vpop.f32.mrf.mxu0 }
 0x6eb   :  { %v1462_v19 = vsub.f32 1.0, %v1461_v14 }
 0x6ec   :  { %vm1485_vm15 = vcmp.eq.f32.partialorder %v1484_v62, 8.507059e+37 }
 0x6ed   :  { %v1463_v31 = vmul.f32 %v3580_v35, %v1462_v19 }
 0x6ef   :  { %v1464_v37 = vadd.f32 %v3580_v35, %v1463_v31 }
 0x6f0   :  { %v3582_v27 = vpop.eup %3581 }
 0x6f1   :  { %v1468_v41 = vsel %vm1467_vm8, %v3580_v35, %v1464_v37  ;;  %v1476_v53 = vmul.f32 %v3582_v27, %v1429_v16  ;;  %v1311_v42 = vpop.permute.xlu2 %1310  ;;  %vm1481_vm12 = vweird.f32 %v3582_v27  ;;  %v4275_v35 = vmul.f32 0.35355338, %v3980_v25 }
 0x6f2   :  { %v1473_v45 = vsel %vm1470_vm10, %v1472_v30, %v1468_v41  ;;  %3393 = vmatmul.msk.f32.vlgmr.msra.gmra.mxu0 %vm218_vm1, %v1311_v42  ;;  %vm1482_vm14 = vmor %vm1480_vm13, %vm1481_vm12 }
 0x6f3   :  { %v1477_v51 = vsub.f32 1.0, %v1476_v53  ;;  %1589 = vmatpush.msra.mxu0 %v4213_v23  ;;  %v1474_v52 = vmul.f32 %v3574_v4, %v1473_v45  ;;  %v1487_v23 = vor.u32 1.1754944e-38, %v1486_v61  ;;  %v4286_v45 = vmul.f32 0.35355338, %v3970_v18 }
 0x6f5   :  { %v1478_v59 = vmul.f32 %v3582_v27, %v1477_v51  ;;  %3400 = vmatmul.msk.f32.vlgmr.msra.gmra.mxu3 %vm218_vm1, %v1474_v52 }
 0x6f6   :  { %3406 = vmatpush.xpose.msk.msra.mxu3 %vm218_vm1, %v4215_v24 }
 0x6f7   :  { %v1479_v60 = vadd.f32 %v3582_v27, %v1478_v59  ;;  %v841_v59 = vld [vmem:[#allocation8 + $0x8] sm:$0xff] }
 0x6f8   :  { %869 = vmatpush.msra.mxu2 %v841_v59 }
 0x6f9   :  { %v1483_v3 = vsel %vm1482_vm14, %v3582_v27, %v1479_v60 }
 0x6fa   :  { %3398 = vmatmul.msk.f32.vlgmr.msrb.gmra.mxu0 %vm218_vm1, %v1444_v63  ;;  %v1488_v4 = vsel %vm1485_vm15, %v1487_v23, %v1483_v3 }
 0x6fb   :  { %v1489_v55 = vmul.f32 %v4229_v5, %v1488_v4 }
 0x702   :  { %3401 = vmatmul.msk.f32.vlgmr.msra.gmra.mxu0 %vm218_vm1, %v1489_v55 }
 0x72a   :  { %v643_v6 = vpop.xlane.xlu2 %642 }
 0x72b   :  { %v653_v24 = vsub.f32 %v4236_v9, %v643_v6 }
 0x72d   :  { %v657_v7 = vmul.f32 1.442695, %v653_v24 }
 0x72f   :  { %3583 = vpow2.f32 %v657_v7 }
 0x735   :  { %v3584_v1 = vpop.eup %3583 }
 0x736   :  { %v665_v8 = vsel %vm218_vm1, %v3584_v1, 0.0 }
 0x737   :  { %666 = vadd.xlane.f32.xlu0 %v665_v8 }
 0x74b   :  { %1516 = vrot.lane.b32.xlu0 %v3970_v18, %s3876_s18  ;;  %v1236_v18 = vld [vmem:[#allocation8 + $0x10] sm:$0xff] }
 0x76f   :  { %v1335_v10 = vpop.f32.mrf.mxu0 }
 0x770   :  { %v1397_v5 = vsel %vm218_vm1, %v1335_v10, -inf }
 0x771   :  { %1398 = vmax.xlane.f32.xlu1 %v1397_v5 }
 0x777   :  { %v4261_v11 = vpop.f32.mrf.mxu0 }
 0x778   :  { %v1565_v9 = vpop.f32.mrf.mxu3 }
 0x779   :  { %3404 = vmatmul.msk.f32.vlgmr.msrb.gmra.mxu3 %vm218_vm1, %v1565_v9 }
 0x77a   :  { %3412 = vmatpush.xpose.msk.msrb.mxu3 %vm218_vm1, %v4217_v34 }
 0x77f   :  { %v1591_v12 = vpop.f32.mrf.mxu0 }
 0x781   :  { %3405 = vmatmul.msk.f32.gmra.mxu3 %vm218_vm1, %v1591_v12 }
 0x789   :  { %3407 = vmatmul.msk.f32.vlgmr.msra.gmra.mxu3 %vm218_vm1, %v4268_v13 }
 0x78a   :  { %1678 = vrot.lane.b32.xlu1 %v4007_v33, %s3866_s29 }
 0x791   :  { %3413 = vmatmul.msk.f32.vlgmr.msrb.gmra.mxu3 %vm218_vm1, %v4275_v35 }
 0x7aa   :  { %v667_v14 = vpop.xlane.xlu0 %666 }
 0x7ab   :  { %3585 = vrcp.f32 %v667_v14  ;;  %v688_v19 = vand.u32 2147483648, %v667_v14  ;;  %v686_v20 = vand.u32 2147483647, %v667_v14  ;;  %vm682_vm3 = vweird.f32 %v667_v14 }
 0x7ad   :  { %v689_v36 = vor.u32 1.1754944e-38, %v688_v19  ;;  %vm687_vm5 = vcmp.eq.f32.partialorder %v686_v20, 8.507059e+37 }
 0x7b1   :  { %v3586_v34 = vpop.eup %3585 }
 0x7b2   :  { %v678_v16 = vmul.f32 %v3586_v34, %v667_v14  ;;  %vm683_vm2 = vweird.f32 %v3586_v34 }
 0x7b3   :  { %vm684_vm4 = vmor %vm682_vm3, %vm683_vm2 }
 0x7b4   :  { %v679_v17 = vsub.f32 1.0, %v678_v16 }
 0x7b6   :  { %v680_v15 = vmul.f32 %v3586_v34, %v679_v17 }
 0x7b8   :  { %v681_v31 = vadd.f32 %v3586_v34, %v680_v15 }
 0x7ba   :  { %v685_v38 = vsel %vm684_vm4, %v3586_v34, %v681_v31 }
 0x7bb   :  { %v690_v25 = vsel %vm687_vm5, %v689_v36, %v685_v38 }
 0x7bc   :  { %v691_v29 = vmul.f32 %v3584_v1, %v690_v25 }
 0x7bd   :  { %v1517_v37 = vpop.permute.xlu0 %1516 }
 0x7be   :  { %3362 = vmatmul.msk.f32.vlgmr.msrb.gmra.mxu2 %vm218_vm1, %v691_v29  ;;  %1537 = vmatpush.msra.mxu1 %v1517_v37 }
 0x7bf   :  { %1264 = vmatpush.msrb.mxu2 %v1236_v18 }
 0x7c0   :  { %1622 = vmatpush.msrb.mxu1 %v4240_v2 }
 0x7e4   :  { %v1399_v27 = vpop.xlane.xlu1 %1398 }
 0x7e5   :  { %v1407_v40 = vsub.f32 %v1335_v10, %v1399_v27 }
 0x7e7   :  { %v1412_v30 = vmul.f32 1.442695, %v1407_v40 }
 0x7e9   :  { %3587 = vpow2.f32 %v1412_v30 }
 0x7ef   :  { %v3588_v41 = vpop.eup %3587 }
 0x7f0   :  { %v1421_v53 = vsel %vm218_vm1, %v3588_v41, 0.0 }
 0x7f1   :  { %1422 = vadd.xlane.f32.xlu2 %v1421_v53 }
 0x7fc   :  { %v4282_v42 = vpop.f32.mrf.mxu3  ;;  %v1679_v44 = vpop.permute.xlu1 %1678 }
 0x7fd   :  { %3408 = vmatpush.xpose.msk.msrb.mxu0 %vm218_vm1, %v1679_v44 }
 0x800   :  { %3409 = vmatmul.msk.f32.vlgmr.msrb.gmra.mxu0 %vm218_vm1, %v4286_v45 }
 0x804   :  { %v4290_v2 = vpop.f32.mrf.mxu3 }
 0x80c   :  { %v1674_v47 = vpop.f32.mrf.mxu3 }
 0x80d   :  { %v1761_v51 = vsel %vm218_vm1, %v1674_v47, -inf }
 0x80e   :  { %1762 = vmax.xlane.f32.xlu2 %v1761_v51 }
 0x814   :  { %v1758_v52 = vpop.f32.mrf.mxu3 }
 0x815   :  { %v1770_v54 = vsel %vm218_vm1, %v1758_v52, -inf }
 0x816   :  { %1771 = vmax.xlane.f32.xlu2 %v1770_v54 }
 0x82e   :  { %1706 = vrot.lane.b32.xlu2 %v3976_v22, %s3866_s29  ;;  %s3301_s29 = sshll.u32 %s4745_s7, 4  ;;  %s3302_s29 = int_to_ptr.hbm [resolvable:$true] %s3301_s29 }
 0x836   :  { %1857 = vrot.lane.b32.xlu2 %v3993_v28, %s3869_s9 }
 0x83e   :  { %1935 = vrot.lane.b32.xlu2 %v3986_v26, %s3869_s9 }
 0x841   :  { %v760_v60 = vpop.f32.mrf.mxu2 }
 0x842   :  { %3366 = vmatmul.msk.f32.vlgmr.msra.gmra.mxu2 %vm218_vm1, %v760_v60 }
 0x846   :  { %2020 = vrot.lane.b32.xlu2 %v3976_v22, %s3867_s3 }
 0x84a   :  { %3367 = vmatmul.msk.f32.gmra.mxu2 %vm218_vm1, %v4172_v46 }
 0x84e   :  { %2046 = vrot.lane.b32.xlu2 %v4275_v35, %s3868_s30 }
 0x852   :  { %3368 = vmatmul.msk.f32.gmra.mxu2 %vm218_vm1, %v4142_v43 }
 0x85a   :  { %3369 = vmatmul.msk.f32.gmra.mxu2 %vm218_vm1, %v4091_v50 }
 0x862   :  { %3386 = vmatmul.msk.f32.vlgmr.msrb.gmra.mxu2 %vm218_vm1, %v4256_v39 }
 0x864   :  { %v1423_v61 = vpop.xlane.xlu2 %1422 }
 0x865   :  { %3589 = vrcp.f32 %v1423_v61  ;;  %v1456_v3 = vand.u32 2147483648, %v1423_v61  ;;  %v1454_v4 = vand.u32 2147483647, %v1423_v61  ;;  %vm1450_vm7 = vweird.f32 %v1423_v61 }
 0x867   :  { %v1457_v50 = vor.u32 1.1754944e-38, %v1456_v3  ;;  %vm1455_vm9 = vcmp.eq.f32.partialorder %v1454_v4, 8.507059e+37 }
 0x86a   :  { %3387 = vmatmul.msk.f32.gmra.mxu2 %vm218_vm1, %v4201_v58 }
 0x86b   :  { %v3590_v62 = vpop.eup %3589 }
 0x86c   :  { %v1446_v63 = vmul.f32 %v3590_v62, %v1423_v61  ;;  %vm1451_vm6 = vweird.f32 %v3590_v62 }
 0x86d   :  { %vm1452_vm8 = vmor %vm1450_vm7, %vm1451_vm6 }
 0x86e   :  { %v1447_v46 = vsub.f32 1.0, %v1446_v63 }
 0x870   :  { %v1448_v23 = vmul.f32 %v3590_v62, %v1447_v46 }
 0x872   :  { %v1449_v55 = vadd.f32 %v3590_v62, %v1448_v23  ;;  %3388 = vmatmul.msk.f32.gmra.mxu2 %vm218_vm1, %v4258_v0 }
 0x874   :  { %v1453_v43 = vsel %vm1452_vm8, %v3590_v62, %v1449_v55 }
 0x875   :  { %v1458_v6 = vsel %vm1455_vm9, %v1457_v50, %v1453_v43 }
 0x876   :  { %v1459_v24 = vmul.f32 %v3588_v41, %v1458_v6 }
 0x878   :  { %3399 = vmatmul.msk.f32.vlgmr.msra.gmra.mxu1 %vm218_vm1, %v1459_v24 }
 0x87a   :  { %3389 = vmatmul.msk.f32.gmra.mxu2 %vm218_vm1, %v4203_v57  ;;  %v4325_v57 = vmul.f32 0.35355338, %v3974_v21 }
 0x880   :  { %3402 = vmatmul.msk.f32.vlgmr.msrb.gmra.mxu1 %vm218_vm1, %v4261_v11 }
 0x881   :  { %v1763_v58 = vpop.xlane.xlu2 %1762 }
 0x882   :  { %v1773_v7 = vsub.f32 %v1674_v47, %v1763_v58 }
 0x884   :  { %v1777_v1 = vmul.f32 1.442695, %v1773_v7 }
 0x886   :  { %3591 = vpow2.f32 %v1777_v1 }
 0x889   :  { %v1772_v8 = vpop.xlane.xlu2 %1771 }
 0x88a   :  { %v1776_v39 = vsub.f32 %v1758_v52, %v1772_v8 }
 0x88c   :  { %v3592_v0 = vpop.eup %3591  ;;  %v1783_v10 = vmul.f32 1.442695, %v1776_v39 }
 0x88d   :  { %v1785_v5 = vsel %vm218_vm1, %v3592_v0, 0.0 }
 0x88e   :  { %3593 = vpow2.f32 %v1783_v10  ;;  %1786 = vadd.xlane.f32.xlu0 %v1785_v5 }
 0x891   :  { %v1707_v9 = vpop.permute.xlu2 %1706 }
 0x892   :  { %3410 = vmatpush.xpose.msk.msra.mxu2 %vm218_vm1, %v1707_v9 }
 0x894   :  { %v4327_v12 = vpop.eup %3593 }
 0x895   :  { %3411 = vmatmul.msk.f32.vlgmr.msra.gmra.mxu2 %vm218_vm1, %v4325_v57  ;;  %v1794_v11 = vsel %vm218_vm1, %v4327_v12, 0.0 }
 0x896   :  { %1795 = vadd.xlane.f32.xlu1 %v1794_v11  ;;  %v4360_v11 = vpop.f32.mrf.mxu0 }
 0x899   :  { %v1858_v14 = vpop.permute.xlu2 %1857 }
 0x89a   :  { %1878 = vmatpush.msra.mxu0 %v1858_v14 }
 0x8a1   :  { %v1936_v34 = vpop.permute.xlu2 %1935 }
 0x8a2   :  { %2018 = vrot.lane.b32.xlu0 %v4325_v57, %s3868_s30  ;;  %1956 = vmatpush.msrb.mxu0 %v1936_v34 }
 0x8a9   :  { %v2021_v23 = vpop.permute.xlu2 %2020 }
 0x8af   :  { %2048 = vrot.lane.b32.xlu1 %v3986_v26, %s3867_s3 }
 0x8b1   :  { %v2047_v39 = vpop.permute.xlu2 %2046 }
 0x8c5   :  { %v871_v21 = vpop.f32.mrf.mxu2 }
 0x8c6   :  { %v913_v15 = vadd.f32 %v4175_v56, %v871_v21 }
 0x8cd   :  { %v874_v16 = vpop.f32.mrf.mxu2 }
 0x8ce   :  { %v916_v36 = vadd.f32 %v4177_v48, %v874_v16 }
 0x8d5   :  { %v877_v17 = vpop.f32.mrf.mxu2 }
 0x8d6   :  { %v919_v29 = vadd.f32 %v4179_v49, %v877_v17 }
 0x8dd   :  { %v880_v19 = vpop.f32.mrf.mxu2 }
 0x8de   :  { %v922_v30 = vadd.f32 %v4184_v32, %v880_v19 }
 0x8e5   :  { %v1266_v20 = vpop.f32.mrf.mxu2 }
 0x8e6   :  { %v4338_v31 = vadd.f32 %v1266_v20, %v913_v15 }
 0x8ed   :  { %v1269_v38 = vpop.f32.mrf.mxu2 }
 0x8ee   :  { %v1279_v25 = vadd.f32 %v1269_v38, %v916_v36 }
 0x8f5   :  { %v1272_v37 = vpop.f32.mrf.mxu2  ;;  %v1539_v27 = vpop.f32.mrf.mxu1 }
 0x8f6   :  { %v4342_v40 = vadd.f32 %v1272_v37, %v919_v29  ;;  %3403 = vmatmul.msk.f32.gmra.mxu1 %vm218_vm1, %v1539_v27  ;;  %v1764_v27 = vsel %vm218_vm1, %v4360_v11, -inf }
 0x8fd   :  { %v1275_v41 = vpop.f32.mrf.mxu2  ;;  %v4356_v10 = vpop.f32.mrf.mxu1 }
 0x8fe   :  { %v4346_v53 = vadd.f32 %v1275_v41, %v922_v30 }
 0x901   :  { %v1787_v56 = vpop.xlane.xlu0 %1786 }
 0x902   :  { %3595 = vrcp.f32 %v1787_v56  ;;  %v1808_v52 = vand.u32 2147483648, %v1787_v56  ;;  %v1806_v54 = vand.u32 2147483647, %v1787_v56  ;;  %vm1802_vm11 = vweird.f32 %v1787_v56 }
 0x904   :  { %v1809_v60 = vor.u32 1.1754944e-38, %v1808_v52  ;;  %vm1807_vm13 = vcmp.eq.f32.partialorder %v1806_v54, 8.507059e+37 }
 0x908   :  { %v3596_v44 = vpop.eup %3595 }
 0x909   :  { %v1798_v47 = vmul.f32 %v3596_v44, %v1787_v56  ;;  %v1796_v48 = vpop.xlane.xlu1 %1795  ;;  %vm1803_vm10 = vweird.f32 %v3596_v44 }
 0x90a   :  { %3597 = vrcp.f32 %v1796_v48  ;;  %vm1804_vm12 = vmor %vm1802_vm11, %vm1803_vm10  ;;  %v1853_v3 = vand.u32 2147483648, %v1796_v48  ;;  %v1851_v55 = vand.u32 2147483647, %v1796_v48  ;;  %vm1847_vm15 = vweird.f32 %v1796_v48 }
 0x90b   :  { %v1799_v51 = vsub.f32 1.0, %v1798_v47 }
 0x90c   :  { %v1854_v43 = vor.u32 1.1754944e-38, %v1853_v3  ;;  %vm1852_vm3 = vcmp.eq.f32.partialorder %v1851_v55, 8.507059e+37 }
 0x90d   :  { %v1800_v49 = vmul.f32 %v3596_v44, %v1799_v51 }
 0x90f   :  { %v1801_v59 = vadd.f32 %v3596_v44, %v1800_v49 }
 0x910   :  { %v3598_v18 = vpop.eup %3597 }
 0x911   :  { %v1805_v32 = vsel %vm1804_vm12, %v3596_v44, %v1801_v59  ;;  %v1843_v61 = vmul.f32 %v3598_v18, %v1796_v48  ;;  %vm1848_vm14 = vweird.f32 %v3598_v18 }
 0x912   :  { %v1810_v62 = vsel %vm1807_vm13, %v1809_v60, %v1805_v32  ;;  %vm1849_vm2 = vmor %vm1847_vm15, %vm1848_vm14 }
 0x913   :  { %v1844_v63 = vsub.f32 1.0, %v1843_v61  ;;  %v1811_v46 = vmul.f32 %v3592_v0, %v1810_v62 }
 0x914   :  { %v2019_v0 = vpop.permute.xlu0 %2018 }
 0x915   :  { %v1845_v4 = vmul.f32 %v3598_v18, %v1844_v63  ;;  %3414 = vmatmul.msk.f32.vlgmr.msra.gmra.mxu0 %vm218_vm1, %v1811_v46 }
 0x916   :  { %3422 = vmatpush.xpose.msk.msra.mxu0 %vm218_vm1, %v2021_v23 }
 0x917   :  { %v1846_v50 = vadd.f32 %v3598_v18, %v1845_v4 }
 0x918   :  { %v1730_v6 = vpop.f32.mrf.mxu2 }
 0x919   :  { %v1850_v24 = vsel %vm1849_vm2, %v3598_v18, %v1846_v50  ;;  %v1767_v58 = vsel %vm218_vm1, %v1730_v6, -inf }
 0x91a   :  { %v1855_v7 = vsel %vm1852_vm3, %v1854_v43, %v1850_v24  ;;  %1768 = vmax.xlane.f32.xlu1 %v1767_v58 }
 0x91b   :  { %v1856_v1 = vmul.f32 %v4327_v12, %v1855_v7 }
 0x91d   :  { %3417 = vmatmul.msk.f32.vlgmr.msrb.gmra.mxu0 %vm218_vm1, %v1856_v1 }
 0x921   :  { %v2049_v8 = vpop.permute.xlu1 %2048 }
 0x922   :  { %3424 = vmatpush.xpose.msk.msra.mxu1 %vm218_vm1, %v2049_v8 }
 0x925   :  { %3423 = vmatmul.msk.f32.vlgmr.msra.gmra.mxu0 %vm218_vm1, %v2019_v0  ;;  %3425 = vmatmul.msk.f32.vlgmr.msra.gmra.mxu1 %vm218_vm1, %v2047_v39 }
 0x973   :  { %v1627_v5 = vpop.f32.mrf.mxu1 }
 0x974   :  { %v4358_v9 = vadd.f32 %v1627_v5, %v1279_v25  ;;  %v4375_v25 = vpack.i.bf16 %v3986_v26, %v3976_v22 }
 0x98d   :  { %v1769_v14 = vpop.xlane.xlu1 %1768 }
 0x98e   :  { %v1775_v12 = vsub.f32 %v1730_v6, %v1769_v14 }
 0x990   :  { %v1781_v34 = vmul.f32 1.442695, %v1775_v12 }
 0x992   :  { %3599 = vpow2.f32 %v1781_v34  ;;  %v4362_v21 = vpop.f32.mrf.mxu0 }
 0x998   :  { %v3600_v16 = vpop.eup %3599 }
 0x999   :  { %v1791_v17 = vsel %vm218_vm1, %v3600_v16, 0.0 }
 0x99a   :  { %v4365_v19 = vpop.f32.mrf.mxu0  ;;  %1792 = vadd.xlane.f32.xlu1 %v1791_v17 }
 0x9a2   :  { %v2043_v15 = vpop.f32.mrf.mxu0  ;;  %v2071_v20 = vpop.f32.mrf.mxu1 }
 0x9a3   :  { %v2080_v36 = vsel %vm218_vm1, %v2043_v15, -inf  ;;  %v2083_v38 = vsel %vm218_vm1, %v2071_v20, -inf }
 0x9a4   :  { %2081 = vmax.xlane.f32.xlu2 %v2080_v36  ;;  %2084 = vmax.xlane.f32.xlu0 %v2083_v38 }
 0x9b3   :  { %1992 = vrot.lane.b32.xlu1 %v4007_v33, %s3867_s3 }
 0x9b8   :  { %1990 = vrot.lane.b32.xlu0 %v4286_v45, %s3868_s30 }
 0x9bb   :  { %3503 = vrot.lane.b32.xlu1 %v4375_v25, %s3871_s11 }
 0x9bc   :  { %1909 = vrot.lane.b32.xlu2 %v3976_v22, %s3869_s9 }
 0x9c3   :  { %2359 = vrot.lane.b32.xlu1 %v3993_v28, %s3870_s10 }
 0x9cb   :  { %2387 = vrot.lane.b32.xlu1 %v4007_v33, %s3870_s10 }
 0x9d3   :  { %2357 = vrot.lane.b32.xlu1 %v4268_v13, %s3872_s12 }
 0x9db   :  { %2385 = vrot.lane.b32.xlu1 %v4286_v45, %s3872_s12 }
 0x9e3   :  { %2443 = vrot.lane.b32.xlu1 %v3986_v26, %s3870_s10 }
 0x9eb   :  { %2441 = vrot.lane.b32.xlu1 %v4275_v35, %s3872_s12 }
 0xa0d   :  { %v1793_v29 = vpop.xlane.xlu1 %1792 }
 0xa0e   :  { %3601 = vrcp.f32 %v1793_v29  ;;  %v1838_v47 = vand.u32 2147483648, %v1793_v29  ;;  %v1836_v49 = vand.u32 2147483647, %v1793_v29  ;;  %vm1832_vm5 = vweird.f32 %v1793_v29 }
 0xa10   :  { %v1839_v60 = vor.u32 1.1754944e-38, %v1838_v47  ;;  %vm1837_vm7 = vcmp.eq.f32.partialorder %v1836_v49, 8.507059e+37 }
 0xa14   :  { %v3602_v37 = vpop.eup %3601 }
 0xa15   :  { %v1828_v30 = vmul.f32 %v3602_v37, %v1793_v29  ;;  %1765 = vmax.xlane.f32.xlu1 %v1764_v27  ;;  %vm1833_vm4 = vweird.f32 %v3602_v37 }
 0xa16   :  { %vm1834_vm6 = vmor %vm1832_vm5, %vm1833_vm4 }
 0xa17   :  { %v1829_v41 = vsub.f32 1.0, %v1828_v30  ;;  %v2082_v56 = vpop.xlane.xlu2 %2081  ;;  %v2085_v44 = vpop.xlane.xlu0 %2084 }
 0xa18   :  { %v2088_v48 = vsub.f32 %v2043_v15, %v2082_v56  ;;  %v2089_v51 = vsub.f32 %v2071_v20, %v2085_v44 }
 0xa19   :  { %v1830_v52 = vmul.f32 %v3602_v37, %v1829_v41 }
 0xa1a   :  { %v2094_v54 = vmul.f32 1.442695, %v2088_v48  ;;  %v2096_v59 = vmul.f32 1.442695, %v2089_v51 }
 0xa1b   :  { %v1831_v18 = vadd.f32 %v3602_v37, %v1830_v52 }
 0xa1c   :  { %3603 = vpow2.f32 %v2094_v54 }
 0xa1d   :  { %v1835_v32 = vsel %vm1834_vm6, %v3602_v37, %v1831_v18  ;;  %3605 = vpow2.f32 %v2096_v59 }
 0xa1e   :  { %v1840_v61 = vsel %vm1837_vm7, %v1839_v60, %v1835_v32 }
 0xa1f   :  { %v1910_v62 = vpop.permute.xlu2 %1909  ;;  %v1841_v63 = vmul.f32 %v3600_v16, %v1840_v61 }
 0xa20   :  { %1930 = vmatpush.msra.mxu3 %v1910_v62 }
 0xa21   :  { %3416 = vmatmul.msk.f32.vlgmr.msra.gmra.mxu3 %vm218_vm1, %v1841_v63 }
 0xa22   :  { %v4396_v46 = vpop.eup %3603 }
 0xa23   :  { %v4398_v3 = vpop.eup %3605  ;;  %v2104_v23 = vsel %vm218_vm1, %v4396_v46, 0.0 }
 0xa24   :  { %2105 = vadd.xlane.f32.xlu2 %v2104_v23  ;;  %v2107_v4 = vsel %vm218_vm1, %v4398_v3, 0.0 }
 0xa25   :  { %2108 = vadd.xlane.f32.xlu0 %v2107_v4  ;;  %v1993_v55 = vpop.permute.xlu1 %1992 }
 0xa26   :  { %3420 = vmatpush.xpose.msk.msrb.mxu3 %vm218_vm1, %v1993_v55 }
 0xa2a   :  { %v1991_v50 = vpop.permute.xlu0 %1990 }
 0xa2b   :  { %3421 = vmatmul.msk.f32.vlgmr.msrb.gmra.mxu3 %vm218_vm1, %v1991_v50 }
 0xa2d   :  { %v3504_v43 = vpop.permute.xlu1 %3503 }
 0xa2e   :  { %v3506_v6 = vunpack.i.h.bf16 %v3504_v43  ;;  %v3505_v24 = vunpack.i.l.bf16 %v3504_v43  ;;  %1964 = vrot.lane.b32.xlu1 %v3993_v28, %s3867_s3 }
 0xa30   :  { %2243 = vmatpush.msrb.mxu0 %v3505_v24  ;;  %2269 = vmatpush.msrb.mxu1 %v3506_v6 }
 0xa35   :  { %v2360_v58 = vpop.permute.xlu1 %2359 }
 0xa36   :  { %3438 = vmatpush.xpose.msk.msra.mxu0 %vm218_vm1, %v2360_v58 }
 0xa39   :  { %2413 = vrot.lane.b32.xlu0 %v4325_v57, %s3872_s12 }
 0xa3c   :  { %2415 = vrot.lane.b32.xlu2 %v3976_v22, %s3870_s10 }
 0xa3d   :  { %v2388_v7 = vpop.permute.xlu1 %2387 }
 0xa3e   :  { %3440 = vmatpush.xpose.msk.msra.mxu1 %vm218_vm1, %v2388_v7 }
 0xa41   :  { %1883 = vrot.lane.b32.xlu0 %v4007_v33, %s3869_s9 }
 0xa45   :  { %v2358_v1 = vpop.permute.xlu1 %2357 }
 0xa4d   :  { %v2386_v8 = vpop.permute.xlu1 %2385 }
 0xa55   :  { %v2444_v39 = vpop.permute.xlu1 %2443 }
 0xa5d   :  { %v2442_v0 = vpop.permute.xlu1 %2441 }
 0xa88   :  { %v1766_v5 = vpop.xlane.xlu1 %1765 }
 0xa89   :  { %v1774_v14 = vsub.f32 %v4360_v11, %v1766_v5 }
 0xa8b   :  { %v1779_v12 = vmul.f32 1.442695, %v1774_v14 }
 0xa8d   :  { %3607 = vpow2.f32 %v1779_v12 }
 0xa93   :  { %v4417_v34 = vpop.eup %3607 }
 0xa94   :  { %v1788_v16 = vsel %vm218_vm1, %v4417_v34, 0.0 }
 0xa95   :  { %1789 = vadd.xlane.f32.xlu2 %v1788_v16 }
 0xa97   :  { %v2106_v17 = vpop.xlane.xlu2 %2105 }
 0xa98   :  { %3609 = vrcp.f32 %v2106_v17  ;;  %v2109_v15 = vpop.xlane.xlu0 %2108  ;;  %v2151_v27 = vand.u32 2147483648, %v2106_v17  ;;  %v2149_v41 = vand.u32 2147483647, %v2106_v17  ;;  %vm2145_vm10 = vweird.f32 %v2106_v17 }
 0xa99   :  { %3611 = vrcp.f32 %v2109_v15  ;;  %v2166_v56 = vand.u32 2147483648, %v2109_v15  ;;  %v2164_v47 = vand.u32 2147483647, %v2109_v15  ;;  %vm2160_vm12 = vweird.f32 %v2109_v15 }
 0xa9a   :  { %v2152_v51 = vor.u32 1.1754944e-38, %v2151_v27  ;;  %vm2150_vm13 = vcmp.eq.f32.partialorder %v2149_v41, 8.507059e+37 }
 0xa9b   :  { %v2167_v59 = vor.u32 1.1754944e-38, %v2166_v56  ;;  %vm2165_vm15 = vcmp.eq.f32.partialorder %v2164_v47, 8.507059e+37 }
 0xa9e   :  { %v3610_v20 = vpop.eup %3609 }
 0xa9f   :  { %v3612_v36 = vpop.eup %3611  ;;  %v2141_v38 = vmul.f32 %v3610_v20, %v2106_v17  ;;  %vm2146_vm8 = vweird.f32 %v3610_v20  ;;  %v2416_v63 = vpop.permute.xlu2 %2415 }
 0xaa0   :  { %v2156_v29 = vmul.f32 %v3612_v36, %v2109_v15  ;;  %vm2161_vm9 = vweird.f32 %v3612_v36  ;;  %vm2147_vm11 = vmor %vm2145_vm10, %vm2146_vm8 }
 0xaa1   :  { %v2142_v37 = vsub.f32 1.0, %v2141_v38  ;;  %vm2162_vm14 = vmor %vm2160_vm12, %vm2161_vm9 }
 0xaa2   :  { %v2157_v30 = vsub.f32 1.0, %v2156_v29 }
 0xaa3   :  { %v2143_v11 = vmul.f32 %v3610_v20, %v2142_v37 }
 0xaa4   :  { %v2158_v44 = vmul.f32 %v3612_v36, %v2157_v30  ;;  %v4421_v49 = vpop.f32.mrf.mxu3 }
 0xaa5   :  { %v2144_v48 = vadd.f32 %v3610_v20, %v2143_v11 }
 0xaa6   :  { %v2159_v52 = vadd.f32 %v3612_v36, %v2158_v44 }
 0xaa7   :  { %v2148_v54 = vsel %vm2147_vm11, %v3610_v20, %v2144_v48 }
 0xaa8   :  { %v2153_v18 = vsel %vm2150_vm13, %v2152_v51, %v2148_v54  ;;  %v2163_v60 = vsel %vm2162_vm14, %v3612_v36, %v2159_v52 }
 0xaa9   :  { %v2168_v32 = vsel %vm2165_vm15, %v2167_v59, %v2163_v60  ;;  %v2154_v61 = vmul.f32 %v4396_v46, %v2153_v18  ;;  %v1965_v46 = vpop.permute.xlu1 %1964 }
 0xaaa   :  { %v2169_v62 = vmul.f32 %v4398_v3, %v2168_v32 }
 0xaab   :  { %v2414_v23 = vpop.permute.xlu0 %2413  ;;  %3428 = vmatmul.msk.f32.vlgmr.msrb.gmra.mxu0 %vm218_vm1, %v2154_v61 }
 0xaac   :  { %3429 = vmatmul.msk.f32.vlgmr.msrb.gmra.mxu1 %vm218_vm1, %v2169_v62  ;;  %3442 = vmatpush.xpose.msk.msrb.mxu0 %vm218_vm1, %v2416_v63 }
 0xaad   :  { %3444 = vmatpush.xpose.msk.msrb.mxu1 %vm218_vm1, %v2444_v39 }
 0xaae   :  { %v2015_v4 = vpop.f32.mrf.mxu3 }
 0xaaf   :  { %v2077_v55 = vsel %vm218_vm1, %v2015_v4, -inf }
 0xab0   :  { %2078 = vmax.xlane.f32.xlu0 %v2077_v55 }
 0xab3   :  { %v1884_v50 = vpop.permute.xlu0 %1883  ;;  %3439 = vmatmul.msk.f32.vlgmr.msra.gmra.mxu0 %vm218_vm1, %v2358_v1 }
 0xab4   :  { %1904 = vmatpush.msrb.mxu2 %v1884_v50  ;;  %3441 = vmatmul.msk.f32.vlgmr.msra.gmra.mxu1 %vm218_vm1, %v2386_v8 }
 0xab6   :  { %3418 = vmatpush.xpose.msk.msra.mxu2 %vm218_vm1, %v1965_v46 }
 0xabb   :  { %3443 = vmatmul.msk.f32.vlgmr.msrb.gmra.mxu0 %vm218_vm1, %v2414_v23 }
 0xabc   :  { %3445 = vmatmul.msk.f32.vlgmr.msrb.gmra.mxu1 %vm218_vm1, %v2442_v0 }
 0xb08   :  { %v1790_v3 = vpop.xlane.xlu2 %1789 }
 0xb09   :  { %3613 = vrcp.f32 %v1790_v3  ;;  %v1823_v58 = vand.u32 2147483648, %v1790_v3  ;;  %v1821_v39 = vand.u32 2147483647, %v1790_v3  ;;  %vm1817_vm3 = vweird.f32 %v1790_v3 }
 0xb0b   :  { %v1824_v5 = vor.u32 1.1754944e-38, %v1823_v58  ;;  %vm1822_vm5 = vcmp.eq.f32.partialorder %v1821_v39, 8.507059e+37  ;;  %v3507_v39 = vpack.i.bf16 %v4007_v33, %v3993_v28 }
 0xb0f   :  { %v3614_v43 = vpop.eup %3613 }
 0xb10   :  { %v1813_v6 = vmul.f32 %v3614_v43, %v1790_v3  ;;  %vm1818_vm2 = vweird.f32 %v3614_v43  ;;  %v1961_v3 = vld [vmem:[#allocation10] sm:$0xff] }
 0xb11   :  { %vm1819_vm4 = vmor %vm1817_vm3, %vm1818_vm2 }
 0xb12   :  { %v1814_v24 = vsub.f32 1.0, %v1813_v6 }
 0xb14   :  { %v1815_v7 = vmul.f32 %v3614_v43, %v1814_v24 }
 0xb16   :  { %v1816_v1 = vadd.f32 %v3614_v43, %v1815_v7 }
 0xb18   :  { %v1820_v8 = vsel %vm1819_vm4, %v3614_v43, %v1816_v1 }
 0xb19   :  { %v1825_v14 = vsel %vm1822_vm5, %v1824_v5, %v1820_v8 }
 0xb1a   :  { %v1826_v12 = vmul.f32 %v4417_v34, %v1825_v14 }
 0xb1c   :  { %3415 = vmatmul.msk.f32.vlgmr.msrb.gmra.mxu2 %vm218_vm1, %v1826_v12 }
 0xb23   :  { %v2079_v0 = vpop.xlane.xlu0 %2078 }
 0xb24   :  { %v2087_v16 = vsub.f32 %v2015_v4, %v2079_v0 }
 0xb26   :  { %v2092_v17 = vmul.f32 1.442695, %v2087_v16 }
 0xb28   :  { %3615 = vpow2.f32 %v2092_v17  ;;  %v4454_v63 = vpop.f32.mrf.mxu0 }
 0xb29   :  { %v4437_v15 = vpop.f32.mrf.mxu1 }
 0xb2e   :  { %v3616_v20 = vpop.eup %3615 }
 0xb2f   :  { %v2101_v36 = vsel %vm218_vm1, %v3616_v20, 0.0 }
 0xb30   :  { %2102 = vadd.xlane.f32.xlu0 %v2101_v36  ;;  %v2382_v24 = vpop.f32.mrf.mxu0 }
 0xb31   :  { %v2410_v38 = vpop.f32.mrf.mxu1  ;;  %v2469_v7 = vsel %vm218_vm1, %v2382_v24, -inf }
 0xb32   :  { %v2472_v29 = vsel %vm218_vm1, %v2410_v38, -inf }
 0xb33   :  { %2473 = vmax.xlane.f32.xlu2 %v2472_v29 }
 0xb38   :  { %v2438_v1 = vpop.f32.mrf.mxu0 }
 0xb39   :  { %v2466_v37 = vpop.f32.mrf.mxu1  ;;  %v2475_v8 = vsel %vm218_vm1, %v2438_v1, -inf }
 0xb3a   :  { %v2478_v27 = vsel %vm218_vm1, %v2466_v37, -inf }
 0xb3b   :  { %2479 = vmax.xlane.f32.xlu2 %v2478_v27 }
 0xb44   :  { %2196 = vrot.lane.b32.xlu0 %v4007_v33, %s3871_s11 }
 0xb53   :  { %1962 = vrot.lane.b32.xlu2 %v4268_v13, %s3868_s30 }
 0xb5b   :  { %2717 = vrot.lane.b32.xlu2 %v3993_v28, %s3874_s16 }
 0xb63   :  { %2745 = vrot.lane.b32.xlu2 %v4007_v33, %s3874_s16 }
 0xb9f   :  { %v1906_v5 = vpop.f32.mrf.mxu2 }
 0xba3   :  { %v2103_v34 = vpop.xlane.xlu0 %2102 }
 0xba4   :  { %3617 = vrcp.f32 %v2103_v34  ;;  %v2136_v48 = vand.u32 2147483648, %v2103_v34  ;;  %v2134_v54 = vand.u32 2147483647, %v2103_v34  ;;  %vm2130_vm7 = vweird.f32 %v2103_v34 }
 0xba6   :  { %v2474_v30 = vpop.xlane.xlu2 %2473  ;;  %v2137_v61 = vor.u32 1.1754944e-38, %v2136_v48  ;;  %vm2135_vm9 = vcmp.eq.f32.partialorder %v2134_v54, 8.507059e+37 }
 0xba7   :  { %v2482_v11 = vsub.f32 %v2410_v38, %v2474_v30 }
 0xba9   :  { %v2487_v41 = vmul.f32 1.442695, %v2482_v11 }
 0xbaa   :  { %v3618_v56 = vpop.eup %3617 }
 0xbab   :  { %v2126_v44 = vmul.f32 %v3618_v56, %v2103_v34  ;;  %3619 = vpow2.f32 %v2487_v41  ;;  %vm2131_vm6 = vweird.f32 %v3618_v56 }
 0xbac   :  { %vm2132_vm8 = vmor %vm2130_vm7, %vm2131_vm6 }
 0xbad   :  { %v2127_v47 = vsub.f32 1.0, %v2126_v44 }
 0xbae   :  { %v2480_v51 = vpop.xlane.xlu2 %2479 }
 0xbaf   :  { %v2128_v52 = vmul.f32 %v3618_v56, %v2127_v47  ;;  %v2484_v59 = vsub.f32 %v2466_v37, %v2480_v51 }
 0xbb1   :  { %v4450_v18 = vpop.eup %3619  ;;  %v2129_v60 = vadd.f32 %v3618_v56, %v2128_v52  ;;  %v2491_v32 = vmul.f32 1.442695, %v2484_v59 }
 0xbb2   :  { %v2496_v62 = vsel %vm218_vm1, %v4450_v18, 0.0 }
 0xbb3   :  { %v2133_v23 = vsel %vm2132_vm8, %v3618_v56, %v2129_v60  ;;  %3621 = vpow2.f32 %v2491_v32  ;;  %2497 = vadd.xlane.f32.xlu0 %v2496_v62 }
 0xbb4   :  { %v2138_v4 = vsel %vm2135_vm9, %v2137_v61, %v2133_v23 }
 0xbb5   :  { %v2139_v55 = vmul.f32 %v3616_v20, %v2138_v4 }
 0xbb6   :  { %v1963_v50 = vpop.permute.xlu2 %1962  ;;  %v2197_v46 = vpop.permute.xlu0 %2196 }
 0xbb7   :  { %3419 = vmatmul.msk.f32.vlgmr.msra.gmra.mxu2 %vm218_vm1, %v1963_v50  ;;  %2217 = vmatpush.msra.mxu3 %v2197_v46 }
 0xbb8   :  { %3427 = vmatmul.msk.f32.vlgmr.msra.gmra.mxu3 %vm218_vm1, %v2139_v55 }
 0xbb9   :  { %v4458_v43 = vpop.eup %3621  ;;  %2343 = vmatpush.msrb.mxu3 %v1961_v3 }
 0xbba   :  { %v2502_v6 = vsel %vm218_vm1, %v4458_v43, 0.0 }
 0xbbb   :  { %2503 = vadd.xlane.f32.xlu1 %v2502_v6 }
 0xbbe   :  { %v2718_v58 = vpop.permute.xlu2 %2717 }
 0xbbf   :  { %3454 = vmatpush.xpose.msk.msra.mxu3 %vm218_vm1, %v2718_v58 }
 0xbc0   :  { %3434 = vmatmul.msk.f32.vlgmr.msrb.gmra.mxu3 %vm218_vm1, %v4362_v21 }
 0xbc3   :  { %2470 = vmax.xlane.f32.xlu1 %v2469_v7 }
 0xbc7   :  { %3508 = vrot.lane.b32.xlu0 %v3507_v39, %s3873_s15 }
 0xbc8   :  { %3435 = vmatmul.msk.f32.gmra.mxu3 %vm218_vm1, %v1906_v5 }
 0xbcb   :  { %2476 = vmax.xlane.f32.xlu1 %v2475_v8  ;;  %v2746_v8 = vpop.permute.xlu2 %2745 }
 0xbcf   :  { %3513 = vrot.lane.b32.xlu0 %v4375_v25, %s3873_s15 }
 0xbd0   :  { %3436 = vmatmul.msk.f32.gmra.mxu3 %vm218_vm1, %v4421_v49 }
 0xbd7   :  { %2773 = vrot.lane.b32.xlu0 %v3976_v22, %s3874_s16 }
 0xbd8   :  { %3437 = vmatmul.msk.f32.gmra.mxu3 %vm218_vm1, %v4365_v19 }
 0xbdf   :  { %2801 = vrot.lane.b32.xlu0 %v3986_v26, %s3874_s16 }
 0xbe4   :  { %2715 = vrot.lane.b32.xlu1 %v4268_v13, %s3875_s17 }
 0xc26   :  { %v2498_v21 = vpop.xlane.xlu0 %2497 }
 0xc27   :  { %3623 = vrcp.f32 %v2498_v21  ;;  %v2531_v16 = vand.u32 2147483648, %v2498_v21  ;;  %v2529_v17 = vand.u32 2147483647, %v2498_v21  ;;  %vm2525_vm11 = vweird.f32 %v2498_v21 }
 0xc29   :  { %v2532_v38 = vor.u32 1.1754944e-38, %v2531_v16  ;;  %vm2530_vm13 = vcmp.eq.f32.partialorder %v2529_v17, 8.507059e+37 }
 0xc2d   :  { %v3624_v14 = vpop.eup %3623 }
 0xc2e   :  { %v2521_v12 = vmul.f32 %v3624_v14, %v2498_v21  ;;  %v2504_v25 = vpop.xlane.xlu1 %2503  ;;  %vm2526_vm10 = vweird.f32 %v3624_v14 }
 0xc2f   :  { %3625 = vrcp.f32 %v2504_v25  ;;  %vm2527_vm12 = vmor %vm2525_vm11, %vm2526_vm10  ;;  %v2561_v30 = vand.u32 2147483648, %v2504_v25  ;;  %v2559_v48 = vand.u32 2147483647, %v2504_v25  ;;  %vm2555_vm15 = vweird.f32 %v2504_v25 }
 0xc30   :  { %v2522_v0 = vsub.f32 1.0, %v2521_v12 }
 0xc31   :  { %v2562_v59 = vor.u32 1.1754944e-38, %v2561_v30  ;;  %vm2560_vm3 = vcmp.eq.f32.partialorder %v2559_v48, 8.507059e+37 }
 0xc32   :  { %v2523_v49 = vmul.f32 %v3624_v14, %v2522_v0 }
 0xc34   :  { %v2524_v20 = vadd.f32 %v3624_v14, %v2523_v49 }
 0xc35   :  { %v3626_v19 = vpop.eup %3625 }
 0xc36   :  { %v2528_v36 = vsel %vm2527_vm12, %v3624_v14, %v2524_v20  ;;  %v2551_v29 = vmul.f32 %v3626_v19, %v2504_v25  ;;  %v2471_v37 = vpop.xlane.xlu1 %2470  ;;  %vm2556_vm14 = vweird.f32 %v3626_v19 }
 0xc37   :  { %v2481_v13 = vsub.f32 %v2382_v24, %v2471_v37  ;;  %v2533_v27 = vsel %vm2530_vm13, %v2532_v38, %v2528_v36  ;;  %vm2557_vm2 = vmor %vm2555_vm15, %vm2556_vm14 }
 0xc38   :  { %v2552_v34 = vsub.f32 1.0, %v2551_v29  ;;  %v2534_v51 = vmul.f32 %v4450_v18, %v2533_v27 }
 0xc39   :  { %v2485_v11 = vmul.f32 1.442695, %v2481_v13  ;;  %v3509_v41 = vpop.permute.xlu0 %3508 }
 0xc3a   :  { %v2553_v56 = vmul.f32 %v3626_v19, %v2552_v34  ;;  %v3511_v44 = vunpack.i.h.bf16 %v3509_v41  ;;  %v3510_v47 = vunpack.i.l.bf16 %v3509_v41 }
 0xc3b   :  { %3627 = vpow2.f32 %v2485_v11 }
 0xc3c   :  { %v2554_v52 = vadd.f32 %v3626_v19, %v2553_v56  ;;  %2586 = vmatpush.msra.mxu0 %v3510_v47  ;;  %2612 = vmatpush.msra.mxu1 %v3511_v44 }
 0xc3d   :  { %3447 = vmatmul.msk.f32.vlgmr.msra.gmra.mxu1 %vm218_vm1, %v2534_v51 }
 0xc3e   :  { %v2558_v54 = vsel %vm2557_vm2, %v3626_v19, %v2554_v52  ;;  %v2477_v60 = vpop.xlane.xlu1 %2476 }
 0xc3f   :  { %v2483_v32 = vsub.f32 %v2438_v1, %v2477_v60  ;;  %v2563_v61 = vsel %vm2560_vm3, %v2562_v59, %v2558_v54  ;;  %v4499_v1 = vpop.f32.mrf.mxu3 }
 0xc40   :  { %v2564_v46 = vmul.f32 %v4458_v43, %v2563_v61  ;;  %v1987_v43 = vpop.f32.mrf.mxu2 }
 0xc41   :  { %v3628_v62 = vpop.eup %3627  ;;  %v2489_v23 = vmul.f32 1.442695, %v2483_v32  ;;  %v3514_v4 = vpop.permute.xlu0 %3513  ;;  %v2074_v39 = vsel %vm218_vm1, %v1987_v43, -inf }
 0xc42   :  { %v3516_v55 = vunpack.i.h.bf16 %v3514_v4  ;;  %v3515_v50 = vunpack.i.l.bf16 %v3514_v4  ;;  %v2493_v18 = vsel %vm218_vm1, %v3628_v62, 0.0 }
 0xc43   :  { %3629 = vpow2.f32 %v2489_v23  ;;  %2494 = vadd.xlane.f32.xlu1 %v2493_v18 }
 0xc44   :  { %2638 = vmatpush.msrb.mxu0 %v3515_v50  ;;  %2664 = vmatpush.msrb.mxu1 %v3516_v55 }
 0xc45   :  { %3449 = vmatmul.msk.f32.vlgmr.msrb.gmra.mxu1 %vm218_vm1, %v2564_v46 }
 0xc47   :  { %v4501_v5 = vpop.f32.mrf.mxu3 }
 0xc49   :  { %v3630_v3 = vpop.eup %3629  ;;  %v2774_v6 = vpop.permute.xlu0 %2773 }
 0xc4a   :  { %3458 = vmatpush.xpose.msk.msra.mxu1 %vm218_vm1, %v2774_v6  ;;  %v2499_v24 = vsel %vm218_vm1, %v3630_v3, 0.0 }
 0xc4b   :  { %2500 = vadd.xlane.f32.xlu2 %v2499_v24 }
 0xc4f   :  { %v4503_v12 = vpop.f32.mrf.mxu3 }
 0xc51   :  { %v2802_v58 = vpop.permute.xlu0 %2801 }
 0xc52   :  { %3460 = vmatpush.xpose.msk.msrb.mxu3 %vm218_vm1, %v2802_v58 }
 0xc56   :  { %v2716_v7 = vpop.permute.xlu1 %2715 }
 0xc57   :  { %3455 = vmatmul.msk.f32.vlgmr.msra.gmra.mxu3 %vm218_vm1, %v2716_v7  ;;  %v4506_v37 = vpop.f32.mrf.mxu3 }
 0xc5c   :  { %2743 = vrot.lane.b32.xlu1 %v4286_v45, %s3875_s17 }
 0xc5f   :  { %v4510_v52 = vpop.f32.mrf.mxu3 }
 0xc63   :  { %2771 = vrot.lane.b32.xlu2 %v4325_v57, %s3875_s17 }
 0xc64   :  { %2799 = vrot.lane.b32.xlu1 %v4275_v35, %s3875_s17 }
 0xc8c   :  { %2075 = vmax.xlane.f32.xlu2 %v2074_v39 }
 0xcb6   :  { %v2495_v21 = vpop.xlane.xlu1 %2494 }
 0xcb7   :  { %3631 = vrcp.f32 %v2495_v21  ;;  %v2516_v0 = vand.u32 2147483648, %v2495_v21  ;;  %v2514_v49 = vand.u32 2147483647, %v2495_v21  ;;  %vm2510_vm5 = vweird.f32 %v2495_v21 }
 0xcb9   :  { %v2517_v20 = vor.u32 1.1754944e-38, %v2516_v0  ;;  %vm2515_vm7 = vcmp.eq.f32.partialorder %v2514_v49, 8.507059e+37  ;;  %v3523_v0 = vld [vmem:[%s4744_s6] ss:$0 sm:$0xff]  ;;  %v1639_v49 = vadd.f32 %v4290_v2, %v4346_v53 }
 0xcba   :  { %v4520_v55 = vpop.f32.mrf.mxu1 }
 0xcbd   :  { %v3632_v14 = vpop.eup %3631 }
 0xcbe   :  { %v2506_v45 = vmul.f32 %v3632_v14, %v2495_v21  ;;  %v2501_v25 = vpop.xlane.xlu2 %2500  ;;  %vm2511_vm4 = vweird.f32 %v3632_v14 }
 0xcbf   :  { %3633 = vrcp.f32 %v2501_v25  ;;  %vm2512_vm6 = vmor %vm2510_vm5, %vm2511_vm4  ;;  %v2546_v34 = vand.u32 2147483648, %v2501_v25  ;;  %v2544_v11 = vand.u32 2147483647, %v2501_v25  ;;  %vm2540_vm9 = vweird.f32 %v2501_v25 }
 0xcc0   :  { %v2507_v57 = vsub.f32 1.0, %v2506_v45 }
 0xcc1   :  { %v2547_v56 = vor.u32 1.1754944e-38, %v2546_v34  ;;  %vm2545_vm11 = vcmp.eq.f32.partialorder %v2544_v11, 8.507059e+37 }
 0xcc2   :  { %v2508_v35 = vmul.f32 %v3632_v14, %v2507_v57  ;;  %v4522_v50 = vpop.f32.mrf.mxu1  ;;  %v1636_v57 = vadd.f32 %v4356_v10, %v4338_v31 }
 0xcc4   :  { %v2509_v16 = vadd.f32 %v3632_v14, %v2508_v35  ;;  %v1641_v35 = vadd.f32 %v3523_v0, %v1636_v57  ;;  %v3676_v57 = vld [vmem:[#allocation5 + $0x8] sm:$0xff] }
 0xcc5   :  { %v3634_v17 = vpop.eup %3633 }
 0xcc6   :  { %v2513_v19 = vsel %vm2512_vm6, %v3632_v14, %v2509_v16  ;;  %v2536_v36 = vmul.f32 %v3634_v17, %v2501_v25  ;;  %v2772_v38 = vpop.permute.xlu2 %2771  ;;  %vm2541_vm8 = vweird.f32 %v3634_v17  ;;  %v3517_v25 = vpack.i.bf16 %v3976_v22, %v4007_v33  ;;  %v3673_v16 = vld [vmem:[#allocation5] sm:$0xff]  ;;  %v3674_v33 = vld [vmem:[#allocation5 + $0x18] sm:$0xff] }
 0xcc7   :  { %v2518_v29 = vsel %vm2515_vm7, %v2517_v20, %v2513_v19  ;;  %3459 = vmatmul.msk.f32.vlgmr.msra.gmra.mxu1 %vm218_vm1, %v2772_v38  ;;  %vm2542_vm10 = vmor %vm2540_vm9, %vm2541_vm8  ;;  %v1644_v22 = vadd.f32 %v3523_v0, %v1639_v49 }
 0xcc8   :  { %v2537_v13 = vsub.f32 1.0, %v2536_v36  ;;  %v2519_v27 = vmul.f32 %v3628_v62, %v2518_v29 }
 0xcc9   :  { %v4551_v19 = vadd.f32 %v3674_v33, %v1644_v22 }
 0xcca   :  { %v2538_v30 = vmul.f32 %v3634_v17, %v2537_v13  ;;  %3446 = vmatmul.msk.f32.vlgmr.msra.gmra.mxu0 %vm218_vm1, %v2519_v27 }
 0xccb   :  { %3456 = vmatpush.xpose.msk.msra.mxu0 %vm218_vm1, %v2746_v8  ;;  %v3091_v31 = vsel %vm124_vm0, %v4551_v19, 0.0 }
 0xccc   :  { %v2539_v41 = vadd.f32 %v3634_v17, %v2538_v30 }
 0xcce   :  { %v2543_v44 = vsel %vm2542_vm10, %v3634_v17, %v2539_v41  ;;  %v2744_v47 = vpop.permute.xlu1 %2743  ;;  %v4547_v17 = vadd.f32 %v3673_v16, %v1641_v35 }
 0xccf   :  { %v2548_v48 = vsel %vm2545_vm11, %v2547_v56, %v2543_v44 }
 0xcd0   :  { %v2549_v51 = vmul.f32 %v3630_v3, %v2548_v48  ;;  %v3082_v20 = vsel %vm124_vm0, %v4547_v17, 0.0 }
 0xcd2   :  { %3448 = vmatmul.msk.f32.vlgmr.msrb.gmra.mxu0 %vm218_vm1, %v2549_v51 }
 0xcd6   :  { %v2800_v54 = vpop.permute.xlu1 %2799 }
 0xcd7   :  { %3461 = vmatmul.msk.f32.vlgmr.msrb.gmra.mxu3 %vm218_vm1, %v2800_v54 }
 0xcda   :  { %v2740_v59 = vpop.f32.mrf.mxu3  ;;  %3457 = vmatmul.msk.f32.vlgmr.msra.gmra.mxu0 %vm218_vm1, %v2744_v47 }
 0xcdb   :  { %v2827_v60 = vsel %vm218_vm1, %v2740_v59, -inf }
 0xcdc   :  { %2828 = vmax.xlane.f32.xlu0 %v2827_v60 }
 0xcff   :  { %v2076_v32 = vpop.xlane.xlu2 %2075 }
 0xd00   :  { %v2086_v61 = vsub.f32 %v1987_v43, %v2076_v32 }
 0xd02   :  { %v2090_v62 = vmul.f32 1.442695, %v2086_v61 }
 0xd04   :  { %3635 = vpow2.f32 %v2090_v62 }
 0xd0a   :  { %v4516_v23 = vpop.eup %3635 }
 0xd0b   :  { %v2098_v4 = vsel %vm218_vm1, %v4516_v23, 0.0 }
 0xd0c   :  { %2099 = vadd.xlane.f32.xlu1 %v2098_v4 }
 0xd44   :  { %v2796_v18 = vpop.f32.mrf.mxu1 }
 0xd45   :  { %v2833_v46 = vsel %vm218_vm1, %v2796_v18, -inf }
 0xd46   :  { %2834 = vmax.xlane.f32.xlu0 %v2833_v46 }
 0xd47   :  { %v4525_v3 = vpop.f32.mrf.mxu0 }
 0xd4f   :  { %v2829_v6 = vpop.xlane.xlu0 %2828  ;;  %v4527_v24 = vpop.f32.mrf.mxu0 }
 0xd50   :  { %v2839_v58 = vsub.f32 %v2740_v59, %v2829_v6 }
 0xd52   :  { %v2843_v7 = vmul.f32 1.442695, %v2839_v58 }
 0xd54   :  { %3637 = vpow2.f32 %v2843_v7 }
 0xd57   :  { %v2768_v43 = vpop.f32.mrf.mxu0 }
 0xd58   :  { %v2830_v39 = vsel %vm218_vm1, %v2768_v43, -inf }
 0xd59   :  { %2831 = vmax.xlane.f32.xlu2 %v2830_v39 }
 0xd5a   :  { %v4530_v8 = vpop.eup %3637  ;;  %v2824_v21 = vpop.f32.mrf.mxu3 }
 0xd5b   :  { %v2851_v14 = vsel %vm218_vm1, %v4530_v8, 0.0  ;;  %v2836_v45 = vsel %vm218_vm1, %v2824_v21, -inf }
 0xd5c   :  { %2852 = vadd.xlane.f32.xlu0 %v2851_v14  ;;  %2837 = vmax.xlane.f32.xlu1 %v2836_v45  ;;  %v1642_v14 = vadd.f32 %v3523_v0, %v4358_v9  ;;  %v3675_v45 = vld [vmem:[#allocation5 + $0x10] sm:$0xff] }
 0xd5e   :  { %v4578_v35 = vadd.f32 %v3676_v57, %v1642_v14 }
 0xd71   :  { %2170 = vrot.lane.b32.xlu2 %v3993_v28, %s3871_s11 }
 0xd79   :  { %3518 = vrot.lane.b32.xlu2 %v3517_v25, %s3876_s18 }
 0xd7f   :  { %v2100_v10 = vpop.xlane.xlu1 %2099 }
 0xd80   :  { %3639 = vrcp.f32 %v2100_v10  ;;  %v2121_v41 = vand.u32 2147483648, %v2100_v10  ;;  %vm2115_vm13 = vweird.f32 %v2100_v10  ;;  %v2119_v56 = vand.u32 2147483647, %v2100_v10 }
 0xd82   :  { %v2122_v51 = vor.u32 1.1754944e-38, %v2121_v41  ;;  %vm2120_vm15 = vcmp.eq.f32.partialorder %v2119_v56, 8.507059e+37 }
 0xd86   :  { %v3640_v2 = vpop.eup %3639 }
 0xd87   :  { %v2111_v29 = vmul.f32 %v3640_v2, %v2100_v10  ;;  %vm2116_vm12 = vweird.f32 %v3640_v2 }
 0xd88   :  { %vm2117_vm14 = vmor %vm2115_vm13, %vm2116_vm12 }
 0xd89   :  { %v2112_v13 = vsub.f32 1.0, %v2111_v29 }
 0xd8b   :  { %v2113_v30 = vmul.f32 %v3640_v2, %v2112_v13 }
 0xd8d   :  { %v2114_v11 = vadd.f32 %v3640_v2, %v2113_v30 }
 0xd8f   :  { %v2118_v48 = vsel %vm2117_vm14, %v3640_v2, %v2114_v11  ;;  %v2669_v11 = vld [vmem:[#allocation10 + $0x10] sm:$0xff] }
 0xd90   :  { %v2123_v60 = vsel %vm2120_vm15, %v2122_v51, %v2118_v48 }
 0xd91   :  { %v2124_v4 = vmul.f32 %v4516_v23, %v2123_v60  ;;  %v1638_v23 = vadd.f32 %v4282_v42, %v4342_v40  ;;  %v2274_v42 = vld [vmem:[#allocation10 + $0x8] sm:$0xff] }
 0xda2   :  { %3083 = vadd.xlane.f32.xlu2 %v3082_v20 }
 0xdaa   :  { %3092 = vadd.xlane.f32.xlu2 %v3091_v31 }
 0xdb9   :  { %v2835_v36 = vpop.xlane.xlu0 %2834 }
 0xdba   :  { %v2841_v38 = vsub.f32 %v2796_v18, %v2835_v36 }
 0xdbc   :  { %v2847_v53 = vmul.f32 1.442695, %v2841_v38 }
 0xdbe   :  { %3641 = vpow2.f32 %v2847_v53 }
 0xdc4   :  { %v4555_v27 = vpop.eup %3641 }
 0xdc5   :  { %v2857_v34 = vsel %vm218_vm1, %v4555_v27, 0.0 }
 0xdc6   :  { %2858 = vadd.xlane.f32.xlu0 %v2857_v34 }
 0xdcc   :  { %v2832_v44 = vpop.xlane.xlu2 %2831 }
 0xdcd   :  { %v2840_v47 = vsub.f32 %v2768_v43, %v2832_v44 }
 0xdcf   :  { %v2845_v54 = vmul.f32 1.442695, %v2840_v47  ;;  %v2838_v59 = vpop.xlane.xlu1 %2837 }
 0xdd0   :  { %v2842_v32 = vsub.f32 %v2824_v21, %v2838_v59  ;;  %v1643_v21 = vadd.f32 %v3523_v0, %v1638_v23 }
 0xdd1   :  { %3643 = vpow2.f32 %v2845_v54 }
 0xdd2   :  { %v2849_v61 = vmul.f32 1.442695, %v2842_v32  ;;  %v4576_v25 = vadd.f32 %v3675_v45, %v1643_v21 }
 0xdd4   :  { %v2171_v62 = vpop.permute.xlu2 %2170  ;;  %3645 = vpow2.f32 %v2849_v61  ;;  %v3088_v49 = vsel %vm124_vm0, %v4576_v25, 0.0 }
 0xdd5   :  { %2191 = vmatpush.msrb.mxu2 %v2171_v62 }
 0xdd6   :  { %3426 = vmatmul.msk.f32.vlgmr.msrb.gmra.mxu2 %vm218_vm1, %v2124_v4 }
 0xdd7   :  { %v4561_v18 = vpop.eup %3643  ;;  %2302 = vmatpush.msra.mxu2 %v2274_v42 }
 0xdd8   :  { %v2854_v46 = vsel %vm218_vm1, %v4561_v18, 0.0 }
 0xdd9   :  { %2855 = vadd.xlane.f32.xlu1 %v2854_v46  ;;  %2697 = vmatpush.msrb.mxu2 %v2669_v11 }
 0xdda   :  { %v4565_v6 = vpop.eup %3645 }
 0xddb   :  { %v2860_v7 = vsel %vm218_vm1, %v4565_v6, 0.0 }
 0xddc   :  { %v3519_v58 = vpop.permute.xlu2 %3518  ;;  %2861 = vadd.xlane.f32.xlu0 %v2860_v7 }
 0xddd   :  { %v3521_v43 = vunpack.i.h.bf16 %v3519_v58  ;;  %v3520_v39 = vunpack.i.l.bf16 %v3519_v58 }
 0xddf   :  { %2970 = vmatpush.msrb.mxu1 %v3520_v39  ;;  %2996 = vmatpush.msra.mxu3 %v3521_v43 }
 0xdf0   :  { %3001 = vrot.lane.b32.xlu0 %v3986_v26, %s3876_s18  ;;  %v3085_v26 = vsel %vm124_vm0, %v4578_v35, 0.0 }
 0xdf2   :  { %2923 = vrot.lane.b32.xlu1 %v3993_v28, %s3876_s18  ;;  %v2853_v28 = vpop.xlane.xlu0 %2852 }
 0xdf3   :  { %v2874_v4 = vand.u32 2147483648, %v2853_v28  ;;  %vm2868_vm10 = vweird.f32 %v2853_v28  ;;  %v2872_v58 = vand.u32 2147483647, %v2853_v28 }
 0xdf5   :  { %v2875_v14 = vor.u32 1.1754944e-38, %v2874_v4  ;;  %vm2873_vm13 = vcmp.eq.f32.partialorder %v2872_v58, 8.507059e+37 }
 0xe1a   :  { %3089 = vadd.xlane.f32.xlu0 %v3088_v49 }
 0xe1c   :  { %3086 = vadd.xlane.f32.xlu1 %v3085_v26 }
 0xe39   :  { %v2859_v16 = vpop.xlane.xlu0 %2858 }
 0xe3a   :  { %3647 = vrcp.f32 %v2859_v16  ;;  %v2904_v20 = vand.u32 2147483648, %v2859_v16  ;;  %v2902_v33 = vand.u32 2147483647, %v2859_v16  ;;  %vm2898_vm3 = vweird.f32 %v2859_v16 }
 0xe3b   :  { %3649 = vrcp.f32 %v2853_v28 }
 0xe3c   :  { %v2905_v10 = vor.u32 1.1754944e-38, %v2904_v20  ;;  %vm2903_vm5 = vcmp.eq.f32.partialorder %v2902_v33, 8.507059e+37 }
 0xe40   :  { %v3648_v40 = vpop.eup %3647 }
 0xe41   :  { %v2894_v9 = vmul.f32 %v3648_v40, %v2859_v16  ;;  %vm2899_vm2 = vweird.f32 %v3648_v40  ;;  %v3650_v2 = vpop.eup %3649 }
 0xe42   :  { %vm2900_vm4 = vmor %vm2898_vm3, %vm2899_vm2  ;;  %v2864_v13 = vmul.f32 %v3650_v2, %v2853_v28  ;;  %vm2869_vm7 = vweird.f32 %v3650_v2 }
 0xe43   :  { %v2895_v0 = vsub.f32 1.0, %v2894_v9  ;;  %vm2870_vm12 = vmor %vm2868_vm10, %vm2869_vm7 }
 0xe44   :  { %v2865_v30 = vsub.f32 1.0, %v2864_v13 }
 0xe45   :  { %v2896_v22 = vmul.f32 %v3648_v40, %v2895_v0 }
 0xe46   :  { %v2866_v44 = vmul.f32 %v3650_v2, %v2865_v30 }
 0xe47   :  { %v2897_v31 = vadd.f32 %v3648_v40, %v2896_v22  ;;  %v3877_v22 = vmov 32.0  }
 0xe48   :  { %v2867_v32 = vadd.f32 %v3650_v2, %v2866_v44 }
 0xe49   :  { %v2901_v36 = vsel %vm2900_vm4, %v3648_v40, %v2897_v31 }
 0xe4a   :  { %v2906_v38 = vsel %vm2903_vm5, %v2905_v10, %v2901_v36  ;;  %v2871_v39 = vsel %vm2870_vm12, %v3650_v2, %v2867_v32  ;;  %v3524_v2 = vld [vmem:[%s4744_s6 + $0x1] ss:$0 sm:$0xff] }
 0xe4b   :  { %v2907_v53 = vmul.f32 %v4555_v27, %v2906_v38  ;;  %v2876_v45 = vsel %vm2873_vm13, %v2875_v14, %v2871_v39 }
 0xe4c   :  { %v2856_v29 = vpop.xlane.xlu1 %2855  ;;  %v2877_v26 = vmul.f32 %v4530_v8, %v2876_v45 }
 0xe4d   :  { %3651 = vrcp.f32 %v2856_v29  ;;  %3464 = vmatmul.msk.f32.vlgmr.msra.gmra.mxu3 %vm218_vm1, %v2907_v53  ;;  %v2889_v51 = vand.u32 2147483648, %v2856_v29  ;;  %v2887_v59 = vand.u32 2147483647, %v2856_v29  ;;  %vm2883_vm8 = vweird.f32 %v2856_v29 }
 0xe4f   :  { %v2862_v34 = vpop.xlane.xlu0 %2861  ;;  %v2890_v46 = vor.u32 1.1754944e-38, %v2889_v51  ;;  %vm2888_vm11 = vcmp.eq.f32.partialorder %v2887_v59, 8.507059e+37 }
 0xe50   :  { %3653 = vrcp.f32 %v2862_v34  ;;  %v2919_v49 = vand.u32 2147483648, %v2862_v34  ;;  %vm2913_vm15 = vweird.f32 %v2862_v34  ;;  %v2917_v28 = vand.u32 2147483647, %v2862_v34 }
 0xe51   :  { %3655 = vrcp.f32 %v3877_v22 }
 0xe52   :  { %v2920_v40 = vor.u32 1.1754944e-38, %v2919_v49  ;;  %vm2918_vm3 = vcmp.eq.f32.partialorder %v2917_v28, 8.507059e+37  ;;  %v3679_v49 = vld [vmem:[#allocation2 + $0x10] sm:$0xff] }
 0xe53   :  { %v3652_v41 = vpop.eup %3651 }
 0xe54   :  { %v2879_v56 = vmul.f32 %v3652_v41, %v2856_v29  ;;  %vm2884_vm6 = vweird.f32 %v3652_v41 }
 0xe55   :  { %vm2885_vm9 = vmor %vm2883_vm8, %vm2884_vm6 }
 0xe56   :  { %v2880_v47 = vsub.f32 1.0, %v2879_v56  ;;  %v3654_v48 = vpop.eup %3653  ;;  %v3677_v56 = vld [vmem:[#allocation2] sm:$0xff] }
 0xe57   :  { %v2909_v27 = vmul.f32 %v3654_v48, %v2862_v34  ;;  %vm2914_vm14 = vweird.f32 %v3654_v48 }
 0xe58   :  { %v2881_v54 = vmul.f32 %v3652_v41, %v2880_v47  ;;  %vm2915_vm2 = vmor %vm2913_vm15, %vm2914_vm14  ;;  %v3084_v47 = vpop.xlane.xlu2 %3083 }
 0xe59   :  { %v2193_v60 = vpop.f32.mrf.mxu2  ;;  %v2910_v62 = vsub.f32 1.0, %v2909_v27 }
 0xe5a   :  { %v2882_v61 = vadd.f32 %v3652_v41, %v2881_v54  ;;  %3430 = vmatmul.msk.f32.vlgmr.msra.gmra.mxu2 %vm218_vm1, %v2193_v60 }
 0xe5b   :  { %v2911_v23 = vmul.f32 %v3654_v48, %v2910_v62  ;;  %v3678_v62 = vld [vmem:[#allocation2 + $0x8] sm:$0xff] }
 0xe5c   :  { %v2886_v7 = vsel %vm2885_vm9, %v3652_v41, %v2882_v61 }
 0xe5d   :  { %v2891_v43 = vsel %vm2888_vm11, %v2890_v46, %v2886_v7  ;;  %v2912_v57 = vadd.f32 %v3654_v48, %v2911_v23 }
 0xe5e   :  { %v2892_v21 = vmul.f32 %v4561_v18, %v2891_v43 }
 0xe5f   :  { %v2916_v42 = vsel %vm2915_vm2, %v3654_v48, %v2912_v57 }
 0xe60   :  { %3463 = vmatmul.msk.f32.vlgmr.msrb.gmra.mxu1 %vm218_vm1, %v2892_v21  ;;  %v2921_v9 = vsel %vm2918_vm3, %v2920_v40, %v2916_v42  ;;  %v3093_v39 = vpop.xlane.xlu2 %3092 }
 0xe62   :  { %3431 = vmatmul.msk.f32.gmra.mxu2 %vm218_vm1, %v4499_v1  ;;  %v3002_v18 = vpop.permute.xlu0 %3001  ;;  %v2922_v1 = vmul.f32 %v4565_v6, %v2921_v9 }
 0xe64   :  { %v2924_v16 = vpop.permute.xlu1 %2923 }
 0xe65   :  { %2944 = vmatpush.msrb.mxu0 %v2924_v16 }
 0xe66   :  { %3462 = vmatmul.msk.f32.vlgmr.msrb.gmra.mxu0 %vm218_vm1, %v2877_v26 }
 0xe67   :  { %3022 = vmatpush.msra.mxu0 %v3002_v18 }
 0xe6a   :  { %3432 = vmatmul.msk.f32.gmra.mxu2 %vm218_vm1, %v4454_v63  ;;  %v3027_v63 = vld [vmem:[#allocation10 + $0x18] sm:$0xff] }
 0xe6b   :  { %3055 = vmatpush.msra.mxu1 %v3027_v63 }
 0xe6e   :  { %3465 = vmatmul.msk.f32.vlgmr.msra.gmra.mxu0 %vm218_vm1, %v2922_v1 }
 0xe72   :  { %3433 = vmatmul.msk.f32.gmra.mxu2 %vm218_vm1, %v4437_v15 }
 0xe7a   :  { %3450 = vmatmul.msk.f32.vlgmr.msrb.gmra.mxu2 %vm218_vm1, %v4525_v3 }
 0xe82   :  { %3451 = vmatmul.msk.f32.gmra.mxu2 %vm218_vm1, %v4520_v55 }
 0xe8a   :  { %3452 = vmatmul.msk.f32.gmra.mxu2 %vm218_vm1, %v4527_v24 }
 0xe8d   :  { %v3090_v9 = vpop.xlane.xlu0 %3089 }
 0xe8f   :  { %v3087_v7 = vpop.xlane.xlu1 %3086 }
 0xe92   :  { %3453 = vmatmul.msk.f32.gmra.mxu2 %vm218_vm1, %v4522_v50  ;;  %v3656_v50 = vpop.eup %3655 }
 0xe93   :  { %v3095_v31 = vmul.f32 32.0, %v3656_v50 }
 0xe95   :  { %v3096_v10 = vsub.f32 1.0, %v3095_v31 }
 0xe97   :  { %v3097_v53 = vmul.f32 %v3656_v50, %v3096_v10 }
 0xe99   :  { %v3098_v11 = vadd.f32 %v3656_v50, %v3097_v53 }
 0xed0   :  { %v2998_v15 = vpop.f32.mrf.mxu3 }
 0xedd   :  { %v2972_v6 = vpop.f32.mrf.mxu1  ;;  %v2304_v55 = vpop.f32.mrf.mxu2 }
 0xede   :  { %v2346_v36 = vadd.f32 %v4501_v5, %v2304_v55 }
 0xee3   :  { %v2946_v8 = vpop.f32.mrf.mxu0 }
 0xee4   :  { %3466 = vmatmul.msk.f32.vlgmr.msra.gmra.mxu1 %vm218_vm1, %v2946_v8 }
 0xee5   :  { %v2307_v0 = vpop.f32.mrf.mxu2 }
 0xee6   :  { %v2349_v41 = vadd.f32 %v4503_v12, %v2307_v0 }
 0xeeb   :  { %v3024_v3 = vpop.f32.mrf.mxu0 }
 0xeec   :  { %3467 = vmatmul.msk.f32.gmra.mxu1 %vm218_vm1, %v2972_v6 }
 0xeed   :  { %v2310_v24 = vpop.f32.mrf.mxu2 }
 0xeee   :  { %v2352_v61 = vadd.f32 %v4506_v37, %v2310_v24 }
 0xef4   :  { %3468 = vmatmul.msk.f32.gmra.mxu1 %vm218_vm1, %v2998_v15  ;;  %v3680_v15 = vld [vmem:[#allocation2 + $0x18] sm:$0xff] }
 0xef5   :  { %v2313_v20 = vpop.f32.mrf.mxu2 }
 0xefc   :  { %3469 = vmatmul.msk.f32.gmra.mxu1 %vm218_vm1, %v3024_v3  ;;  %vm3099_vm1 = vweird.f32 %v3656_v50 }
 0xefd   :  { %v2699_v33 = vpop.f32.mrf.mxu2  ;;  %v4617_v51 = vsel %vm3099_vm1, %v3656_v50, %v3098_v11 }
 0xefe   :  { %v2711_v38 = vadd.f32 %v2699_v33, %v2346_v36  ;;  %v3101_v60 = vmul.f32 %v4617_v51, %v3084_v47  ;;  %v3102_v21 = vmul.f32 %v4617_v51, %v3087_v7  ;;  %v3104_v37 = vmul.f32 %v4617_v51, %v3093_v39 }
 0xf00   :  { %v4622_v12 = vsub.f32 %v4547_v17, %v3101_v60  ;;  %v2355_v17 = vadd.f32 %v4510_v52, %v2313_v20  ;;  %v4631_v28 = vsub.f32 %v4578_v35, %v3102_v21  ;;  %v4636_v40 = vsub.f32 %v4551_v19, %v3104_v37 }
 0xf01   :  { %v3103_v52 = vmul.f32 %v4617_v51, %v3090_v9  ;;  %v4688_v9 = vld [vmem:[%s4744_s6 + $0x3] ss:$0 sm:$0xff] }
 0xf02   :  { %v3109_v45 = vmul.f32 %v4622_v12, %v4622_v12  ;;  %v3110_v35 = vmul.f32 %v4631_v28, %v4631_v28  ;;  %v3112_v6 = vmul.f32 %v4636_v40, %v4636_v40 }
 0xf03   :  { %v4644_v55 = vsub.f32 %v4576_v25, %v3103_v52 }
 0xf04   :  { %v3113_v42 = vsel %vm124_vm0, %v3109_v45, 0.0  ;;  %v3116_v0 = vsel %vm124_vm0, %v3110_v35, 0.0  ;;  %v3122_v24 = vsel %vm124_vm0, %v3112_v6, 0.0 }
 0xf05   :  { %v2702_v29 = vpop.f32.mrf.mxu2  ;;  %v3111_v20 = vmul.f32 %v4644_v55, %v4644_v55 }
 0xf06   :  { %v2712_v48 = vadd.f32 %v2702_v29, %v2349_v41 }
 0xf07   :  { %v3119_v22 = vsel %vm124_vm0, %v3111_v20, 0.0 }
 0xf0d   :  { %v2705_v27 = vpop.f32.mrf.mxu2 }
 0xf0e   :  { %v2713_v46 = vadd.f32 %v2705_v27, %v2352_v61 }
 0xf15   :  { %v2708_v57 = vpop.f32.mrf.mxu2 }
 0xf16   :  { %v2714_v16 = vadd.f32 %v2708_v57, %v2355_v17 }
 0xf61   :  { %v3057_v13 = vpop.f32.mrf.mxu1 }
 0xf62   :  { %v3069_v34 = vadd.f32 %v3057_v13, %v2711_v38 }
 0xf64   :  { %v3074_v30 = vadd.f32 %v3524_v2, %v3069_v34 }
 0xf66   :  { %v3191_v44 = vadd.f32 %v3677_v56, %v3074_v30 }
 0xf68   :  { %v3195_v5 = vsel %vm124_vm0, %v3191_v44, 0.0 }
 0xf69   :  { %v3060_v54 = vpop.f32.mrf.mxu1  ;;  %3196 = vadd.xlane.f32.xlu2 %v3195_v5 }
 0xf6a   :  { %v3070_v59 = vadd.f32 %v3060_v54, %v2712_v48 }
 0xf6c   :  { %v3075_v32 = vadd.f32 %v3524_v2, %v3070_v59 }
 0xf6e   :  { %v3192_v4 = vadd.f32 %v3678_v62, %v3075_v32 }
 0xf70   :  { %v3198_v58 = vsel %vm124_vm0, %v3192_v4, 0.0 }
 0xf71   :  { %3199 = vadd.xlane.f32.xlu1 %v3198_v58  ;;  %v3063_v43 = vpop.f32.mrf.mxu1 }
 0xf72   :  { %v3071_v23 = vadd.f32 %v3063_v43, %v2713_v46 }
 0xf74   :  { %v3076_v14 = vadd.f32 %v3524_v2, %v3071_v23 }
 0xf76   :  { %v3193_v26 = vadd.f32 %v3679_v49, %v3076_v14 }
 0xf78   :  { %v3201_v18 = vsel %vm124_vm0, %v3193_v26, 0.0 }
 0xf79   :  { %3114 = vadd.xlane.f32.xlu1 %v3113_v42  ;;  %v3066_v1 = vpop.f32.mrf.mxu1  ;;  %3202 = vadd.xlane.f32.xlu2 %v3201_v18 }
 0xf7a   :  { %v3072_v63 = vadd.f32 %v3066_v1, %v2714_v16 }
 0xf7c   :  { %v3077_v8 = vadd.f32 %v3524_v2, %v3072_v63 }
 0xf7e   :  { %v3194_v3 = vadd.f32 %v3680_v15, %v3077_v8 }
 0xf80   :  { %v3204_v19 = vsel %vm124_vm0, %v3194_v3, 0.0 }
 0xf81   :  { %3205 = vadd.xlane.f32.xlu0 %v3204_v19  ;;  %3117 = vadd.xlane.f32.xlu2 %v3116_v0 }
 0xf82   :  { %3123 = vadd.xlane.f32.xlu1 %v3122_v24 }
 0xf89   :  { %3120 = vadd.xlane.f32.xlu0 %v3119_v22 }
 0xfdc   :  { %v3197_v50 = vpop.xlane.xlu2 %3196 }
 0xfdd   :  { %v3207_v33 = vmul.f32 %v3197_v50, %v4617_v51 }
 0xfdf   :  { %v4653_v25 = vsub.f32 %v3191_v44, %v3207_v33 }
 0xfe1   :  { %v3215_v31 = vmul.f32 %v4653_v25, %v4653_v25 }
 0xfe3   :  { %v3219_v10 = vsel %vm124_vm0, %v3215_v31, 0.0 }
 0xfe4   :  { %v3200_v36 = vpop.xlane.xlu1 %3199  ;;  %3220 = vadd.xlane.f32.xlu2 %v3219_v10 }
 0xfe5   :  { %v3208_v38 = vmul.f32 %v3200_v36, %v4617_v51 }
 0xfe7   :  { %v4659_v2 = vsub.f32 %v3192_v4, %v3208_v38 }
 0xfe9   :  { %v3216_v53 = vmul.f32 %v4659_v2, %v4659_v2 }
 0xfeb   :  { %v3222_v29 = vsel %vm124_vm0, %v3216_v53, 0.0 }
 0xfec   :  { %3223 = vadd.xlane.f32.xlu0 %v3222_v29  ;;  %v3115_v13 = vpop.xlane.xlu1 %3114  ;;  %v3203_v34 = vpop.xlane.xlu2 %3202 }
 0xfed   :  { %v3125_v30 = vmul.f32 %v3115_v13, %v4617_v51  ;;  %v3209_v11 = vmul.f32 %v3203_v34, %v4617_v51 }
 0xfef   :  { %v3129_v41 = vadd.f32 1e-05, %v3125_v30  ;;  %v4666_v56 = vsub.f32 %v3193_v26, %v3209_v11  ;;  %v4683_v26 = vld [vmem:[%s4744_s6 + $0x2] ss:$0 sm:$0xff]  ;;  %s3878_s6 = smov [#allocation12]  }
 0xff0   :  { %s3312_s24 = sshll.u32 %s3878_s6, 4  ;;  %s3313_s24 = int_to_ptr.vmem [resolvable:$true] %s3312_s24 }
 0xff1   :  { %3657 = vrsqrt.f32 %v3129_v41  ;;  %v3217_v44 = vmul.f32 %v4666_v56, %v4666_v56  ;;  %vm3139_vm5 = vweird.f32 %v3129_v41 }
 0xff3   :  { %v3225_v47 = vsel %vm124_vm0, %v3217_v44, 0.0 }
 0xff4   :  { %v3206_v48 = vpop.xlane.xlu0 %3205  ;;  %3226 = vadd.xlane.f32.xlu1 %v3225_v47  ;;  %v3118_v5 = vpop.xlane.xlu2 %3117 }
 0xff5   :  { %v3210_v54 = vmul.f32 %v3206_v48, %v4617_v51  ;;  %v3124_v59 = vpop.xlane.xlu1 %3123  ;;  %v3126_v27 = vmul.f32 %v3118_v5, %v4617_v51 }
 0xff6   :  { %v3128_v60 = vmul.f32 %v3124_v59, %v4617_v51 }
 0xff7   :  { %v3658_v32 = vpop.eup %3657  ;;  %v4674_v61 = vsub.f32 %v3194_v3, %v3210_v54  ;;  %v3130_v62 = vadd.f32 1e-05, %v3126_v27 }
 0xff8   :  { %v3134_v4 = vmul.f32 %v3658_v32, %v3129_v41  ;;  %v3132_v46 = vadd.f32 1e-05, %v3128_v60  ;;  %vm3140_vm4 = vweird.f32 %v3658_v32 }
 0xff9   :  { %3659 = vrsqrt.f32 %v3130_v62  ;;  %v3218_v58 = vmul.f32 %v4674_v61, %v4674_v61  ;;  %vm3141_vm6 = vmor %vm3139_vm5, %vm3140_vm4  ;;  %vm3149_vm9 = vweird.f32 %v3130_v62 }
 0xffa   :  { %v3135_v7 = vmul.f32 %v3658_v32, %v3134_v4  ;;  %3661 = vrsqrt.f32 %v3132_v46  ;;  %vm3169_vm10 = vweird.f32 %v3132_v46 }
 0xffb   :  { %v3228_v43 = vsel %vm124_vm0, %v3218_v58, 0.0 }
 0xffc   :  { %v3136_v39 = vmul.f32 0.5, %v3135_v7  ;;  %v3121_v23 = vpop.xlane.xlu0 %3120  ;;  %3229 = vadd.xlane.f32.xlu2 %v3228_v43 }
 0xffd   :  { %v3127_v21 = vmul.f32 %v3121_v23, %v4617_v51 }
 0xffe   :  { %v3137_v14 = vsub.f32 1.5, %v3136_v39 }
 0xfff   :  { %v3660_v45 = vpop.eup %3659  ;;  %v3131_v37 = vadd.f32 1e-05, %v3127_v21 }
0x1000   :  { %v3662_v57 = vpop.eup %3661  ;;  %v3138_v17 = vmul.f32 %v3658_v32, %v3137_v14  ;;  %v3144_v49 = vmul.f32 %v3660_v45, %v3130_v62  ;;  %vm3150_vm7 = vweird.f32 %v3660_v45 }
0x1001   :  { %v3164_v16 = vmul.f32 %v3662_v57, %v3132_v46  ;;  %3663 = vrsqrt.f32 %v3131_v37  ;;  %vm3170_vm8 = vweird.f32 %v3662_v57  ;;  %vm3151_vm11 = vmor %vm3149_vm9, %vm3150_vm7  ;;  %vm3159_vm14 = vweird.f32 %v3131_v37 }
0x1002   :  { %v3142_v42 = vsel %vm3141_vm6, %v3658_v32, %v3138_v17  ;;  %v3145_v18 = vmul.f32 %v3660_v45, %v3144_v49  ;;  %vm3171_vm12 = vmor %vm3169_vm10, %vm3170_vm8 }
0x1003   :  { %v3173_v1 = vmul.f32 %v3142_v42, %v4622_v12  ;;  %v3165_v63 = vmul.f32 %v3662_v57, %v3164_v16 }
0x1004   :  { %v3146_v52 = vmul.f32 0.5, %v3145_v18 }
0x1005   :  { %v3178_v8 = vmul.f32 %v4683_v26, %v3173_v1  ;;  %v3166_v35 = vmul.f32 0.5, %v3165_v63 }
0x1006   :  { %v3147_v6 = vsub.f32 1.5, %v3146_v52 }
0x1007   :  { %v3664_v15 = vpop.eup %3663  ;;  %v3183_v3 = vadd.f32 %v4688_v9, %v3178_v8  ;;  %v3167_v19 = vsub.f32 1.5, %v3166_v35 }
0x1008   :  { %v3148_v0 = vmul.f32 %v3660_v45, %v3147_v6  ;;  %v3154_v24 = vmul.f32 %v3664_v15, %v3131_v37  ;;  %vm3160_vm13 = vweird.f32 %v3664_v15 }
0x1009   :  { %3187 = vst.msk [vmem:[#allocation12] sm:$0xff] %vm124_vm0, %v3183_v3  ;;  %v3168_v20 = vmul.f32 %v3662_v57, %v3167_v19  ;;  %vm3161_vm15 = vmor %vm3159_vm14, %vm3160_vm13 }
0x100a   :  { %v3152_v12 = vsel %vm3151_vm11, %v3660_v45, %v3148_v0  ;;  %v3155_v22 = vmul.f32 %v3664_v15, %v3154_v24 }
0x100b   :  { %v3172_v50 = vsel %vm3171_vm12, %v3662_v57, %v3168_v20  ;;  %v3174_v33 = vmul.f32 %v3152_v12, %v4631_v28 }
0x100c   :  { %v3176_v31 = vmul.f32 %v3172_v50, %v4636_v40  ;;  %v3156_v10 = vmul.f32 0.5, %v3155_v22 }
0x100d   :  { %v3179_v36 = vmul.f32 %v4683_v26, %v3174_v33 }
0x100e   :  { %v3181_v38 = vmul.f32 %v4683_v26, %v3176_v31  ;;  %v3157_v53 = vsub.f32 1.5, %v3156_v10 }
0x100f   :  { %v3184_v29 = vadd.f32 %v4688_v9, %v3179_v36 }
0x1010   :  { %v3186_v13 = vadd.f32 %v4688_v9, %v3181_v38  ;;  %v3158_v34 = vmul.f32 %v3664_v15, %v3157_v53 }
0x1011   :  { %3188 = vst.msk [vmem:[#allocation12 + $0x8] sm:$0xff] %vm124_vm0, %v3184_v29 }
0x1012   :  { %3190 = vst.msk [vmem:[#allocation12 + $0x18] sm:$0xff] %vm124_vm0, %v3186_v13  ;;  %v3162_v28 = vsel %vm3161_vm15, %v3664_v15, %v3158_v34 }
0x1013   :  { %v3175_v40 = vmul.f32 %v3162_v28, %v4644_v55 }
0x1015   :  { %v3180_v30 = vmul.f32 %v4683_v26, %v3175_v40 }
0x1017   :  { %v3185_v11 = vadd.f32 %v4688_v9, %v3180_v30 }
0x1019   :  { %3189 = vst.msk [vmem:[#allocation12 + $0x10] sm:$0xff] %vm124_vm0, %v3185_v11 }
0x101a   :  { %3320 = dma.vmem_to_hbm [thread:$0]  %s3313_s24, 512, %s3315_s2, [#allocation13], %s3860_s13, %s3860_s13, %s3861_s14  }
0x1057   :  { %v3221_v41 = vpop.xlane.xlu2 %3220 }
0x1058   :  { %v3231_v55 = vmul.f32 %v3221_v41, %v4617_v51 }
0x105a   :  { %v3235_v44 = vadd.f32 1e-05, %v3231_v55 }
0x105c   :  { %3665 = vrsqrt.f32 %v3235_v44  ;;  %vm3245_vm3 = vweird.f32 %v3235_v44 }
0x105f   :  { %v3224_v47 = vpop.xlane.xlu0 %3223 }
0x1060   :  { %v3232_v48 = vmul.f32 %v3224_v47, %v4617_v51 }
0x1062   :  { %v3666_v5 = vpop.eup %3665  ;;  %v3236_v54 = vadd.f32 1e-05, %v3232_v48 }
0x1063   :  { %v3240_v59 = vmul.f32 %v3666_v5, %v3235_v44  ;;  %vm3246_vm2 = vweird.f32 %v3666_v5 }
0x1064   :  { %3667 = vrsqrt.f32 %v3236_v54  ;;  %vm3247_vm1 = vmor %vm3245_vm3, %vm3246_vm2  ;;  %vm3255_vm5 = vweird.f32 %v3236_v54 }
0x1065   :  { %v3241_v27 = vmul.f32 %v3666_v5, %v3240_v59 }
0x1067   :  { %v3242_v60 = vmul.f32 0.5, %v3241_v27  ;;  %v3227_v32 = vpop.xlane.xlu1 %3226 }
0x1068   :  { %v3233_v62 = vmul.f32 %v3227_v32, %v4617_v51 }
0x1069   :  { %v3243_v4 = vsub.f32 1.5, %v3242_v60 }
0x106a   :  { %v3668_v46 = vpop.eup %3667  ;;  %v3237_v58 = vadd.f32 1e-05, %v3233_v62 }
0x106b   :  { %v3244_v7 = vmul.f32 %v3666_v5, %v3243_v4  ;;  %v3250_v43 = vmul.f32 %v3668_v46, %v3236_v54  ;;  %vm3256_vm4 = vweird.f32 %v3668_v46 }
0x106c   :  { %3669 = vrsqrt.f32 %v3237_v58  ;;  %vm3257_vm6 = vmor %vm3255_vm5, %vm3256_vm4  ;;  %vm3265_vm8 = vweird.f32 %v3237_v58 }
0x106d   :  { %v3248_v39 = vsel %vm3247_vm1, %v3666_v5, %v3244_v7  ;;  %v3251_v23 = vmul.f32 %v3668_v46, %v3250_v43 }
0x106e   :  { %v3279_v21 = vmul.f32 %v3248_v39, %v4653_v25 }
0x106f   :  { %v3252_v14 = vmul.f32 0.5, %v3251_v23  ;;  %v3230_v45 = vpop.xlane.xlu2 %3229 }
0x1070   :  { %v3283_v37 = vmul.f32 %v4683_v26, %v3279_v21  ;;  %v3234_v57 = vmul.f32 %v3230_v45, %v4617_v51 }
0x1071   :  { %v3253_v17 = vsub.f32 1.5, %v3252_v14 }
0x1072   :  { %v3670_v49 = vpop.eup %3669  ;;  %v3287_v16 = vadd.f32 %v4688_v9, %v3283_v37  ;;  %v3238_v42 = vadd.f32 1e-05, %v3234_v57 }
0x1073   :  { %v3254_v18 = vmul.f32 %v3668_v46, %v3253_v17  ;;  %v3260_v1 = vmul.f32 %v3670_v49, %v3237_v58  ;;  %vm3266_vm7 = vweird.f32 %v3670_v49 }
0x1074   :  { %3291 = vst.msk [vmem:[#allocation11] sm:$0xff] %vm124_vm0, %v3287_v16  ;;  %3671 = vrsqrt.f32 %v3238_v42  ;;  %vm3267_vm9 = vmor %vm3265_vm8, %vm3266_vm7  ;;  %vm3275_vm11 = vweird.f32 %v3238_v42 }
0x1075   :  { %v3258_v25 = vsel %vm3257_vm6, %v3668_v46, %v3254_v18  ;;  %v3261_v63 = vmul.f32 %v3670_v49, %v3260_v1 }
0x1076   :  { %v3280_v52 = vmul.f32 %v3258_v25, %v4659_v2 }
0x1077   :  { %v3262_v8 = vmul.f32 0.5, %v3261_v63 }
0x1078   :  { %v3284_v51 = vmul.f32 %v4683_v26, %v3280_v52 }
0x1079   :  { %v3263_v35 = vsub.f32 1.5, %v3262_v8 }
0x107a   :  { %v3672_v6 = vpop.eup %3671  ;;  %v3288_v15 = vadd.f32 %v4688_v9, %v3284_v51 }
0x107b   :  { %v3264_v3 = vmul.f32 %v3670_v49, %v3263_v35  ;;  %v3270_v19 = vmul.f32 %v3672_v6, %v3238_v42  ;;  %vm3276_vm10 = vweird.f32 %v3672_v6 }
0x107c   :  { %3292 = vst.msk [vmem:[#allocation11 + $0x8] sm:$0xff] %vm124_vm0, %v3288_v15  ;;  %vm3277_vm12 = vmor %vm3275_vm11, %vm3276_vm10 }
0x107d   :  { %v3268_v0 = vsel %vm3267_vm9, %v3670_v49, %v3264_v3  ;;  %v3271_v24 = vmul.f32 %v3672_v6, %v3270_v19 }
0x107e   :  { %v3281_v20 = vmul.f32 %v3268_v0, %v4666_v56 }
0x107f   :  { %v3272_v12 = vmul.f32 0.5, %v3271_v24 }
0x1080   :  { %v3285_v2 = vmul.f32 %v4683_v26, %v3281_v20 }
0x1081   :  { %v3273_v22 = vsub.f32 1.5, %v3272_v12 }
0x1082   :  { %v3289_v50 = vadd.f32 %v4688_v9, %v3285_v2 }
0x1083   :  { %v3274_v33 = vmul.f32 %v3672_v6, %v3273_v22 }
0x1084   :  { %3293 = vst.msk [vmem:[#allocation11 + $0x10] sm:$0xff] %vm124_vm0, %v3289_v50 }
0x1085   :  { %v3278_v31 = vsel %vm3277_vm12, %v3672_v6, %v3274_v33 }
0x1086   :  { %v3282_v10 = vmul.f32 %v3278_v31, %v4674_v61 }
0x1088   :  { %v3286_v56 = vmul.f32 %v4683_v26, %v3282_v10 }
0x108a   :  { %v3290_v36 = vadd.f32 %v4688_v9, %v3286_v56 }
0x108c   :  { %3294 = vst.msk [vmem:[#allocation11 + $0x18] sm:$0xff] %vm124_vm0, %v3290_v36 }
0x108d   :  { %3307 = dma.vmem_to_hbm [thread:$0]  %s3300_s27, 512, %s3302_s29, [#allocation4], %s3860_s13, %s3860_s13, %s3861_s14  }
0x108e   :  { %3855 = dma.done.wait [#allocation4], 512  }
0x108f   :  { %3856 = vsyncadd [#allocation4], 4294966784 }
0x1090   :  { %3857 = dma.done.wait [#allocation13], 512  }
0x1091   :  { %3858 = vsyncadd [#allocation13], 4294966784 }
0x1092   :  { %3329 = vsyncpa [#allocation3], 1 }
0x1093   :  { %3330 = vsyncpa [#allocation6], 1 }
0x1094   :  { %3331 = vsyncpa [#allocation9], 1 }
0x1095   :  { %3332 = vsyncpa [#allocation4], 1 }
0x1096   :  { %3333 = vsyncpa [#allocation13], 1 }

</bundles_post_ra>
